<compile_context>
chip_gen: v6e
topology: v6e:2x2x1
jax: 0.10.0
libtpu: 0.0.40
codegen_flags: <defaults>
</compile_context>

<pallas_src>
import jax
import jax.numpy as jnp
from jax.experimental import pallas as pl
from jax.experimental.pallas import tpu as pltpu

# Module structure implied by IDCNN.__init__ add_module name-overwrite rules:
#   net (ONE module shared by all 4 blocks) =
#       layer0 -> Sigmoid -> LayerNorm -> layer1 -> layer2 -> layer3 -> layer4
#   idcnn = block0(net) -> Sigmoid -> LayerNorm -> block1(net) -> block2(net) -> block3(net)
DILATIONS = (1, 1, 2, 4, 1)   # per conv layer; padding = dilation ("same")
NUM_BLOCK = 4
EPS = 1e-6                    # custom LayerNorm eps (added to std, not var)


def idcnn_kernel(x_ref, wlin_ref, blin_ref, convw_ref, convb_ref,
                 a1_ref, b1_ref, a2_ref, b2_ref, ksi_ref, out_ref):
    F, T = out_ref.shape
    inv_tm1 = 1.0 / (T - 1)
    # Lane (= time) index, hoisted once: reused by every conv boundary mask.
    lane = jax.lax.broadcasted_iota(jnp.int32, (F, T), 1)

    def _sigmoid(v):
        # exp + approximate reciprocal both run on the EUP slot;
        # avoids a full-tensor VPU divide.
        return pl.reciprocal(1.0 + jnp.exp(-v), approx=True)

    def conv1d(h, li):
        # 'same' Conv1d(F->F, k=3, dilation=d, padding=d) on (F, T).
        # Single fused matmul: all 3 taps stacked on M -> (3F, T); then the
        # tap results are time-shifted with XLU lane rolls + zero-masking.
        d = DILATIONS[li]
        y = jnp.dot(convw_ref[li], h, preferred_element_type=jnp.float32)   # (3F, T)
        ym = jnp.where(lane < d, 0.0,
                       pltpu.roll(y[0:F], d, axis=1))                       # tap at t-d
        yp = jnp.where(lane >= T - d, 0.0,
                       pltpu.roll(y[2 * F:3 * F], T - d, axis=1))           # tap at t+d
        return ym + y[F:2 * F] + yp + convb_ref[li]

    def layernorm_time(h, a_ref, b_ref):
        # torch custom LayerNorm(128) applied to (B, F, T): normalize over
        # TIME per channel, unbiased std (N-1), eps added to std.
        c = h - jnp.mean(h, axis=1, keepdims=True)               # (F, T)
        var = jnp.sum(c * c, axis=1, keepdims=True) * inv_tm1    # (F, 1)
        inv = pl.reciprocal(jnp.sqrt(var) + EPS, approx=True)    # per-channel, EUP
        return a_ref[...] * (c * inv) + b_ref[...]

    def block(h):
        # Shared 'net' block (same conv + LN params for all 4 blocks).
        h = conv1d(h, 0)
        h = _sigmoid(h)
        h = layernorm_time(h, a1_ref, b1_ref)
        h = conv1d(h, 1)
        h = conv1d(h, 2)
        h = conv1d(h, 3)
        h = conv1d(h, 4)
        return h

    # Linear(input_size -> filters), directly channels-first: (F,In) @ (In,T).
    emb = jnp.dot(wlin_ref[...], x_ref[...],
                  preferred_element_type=jnp.float32) + blin_ref[...]       # (F, T)
    emb1 = emb

    # idcnn: block0 -> Sigmoid -> LayerNorm -> block1 -> block2 -> block3
    h = block(emb)
    h = _sigmoid(h)
    h = layernorm_time(h, a2_ref, b2_ref)
    for _ in range(NUM_BLOCK - 1):
        h = block(h)
    output = h

    # Gated residual tail, factored: (emb1 + out) * sigmoid(out * (1 + ksi)).
    gate = _sigmoid(output * (1.0 + ksi_ref[...]))
    out_ref[...] = (emb1 + output) * gate


def idcnn_forward(x, params, ksi):
    """x: (B, T, input_size), ksi: (B, T, filters) -> (B, T, filters)."""
    B, T, In = x.shape
    F = params["w_lin"].shape[0]

    # Channels-first inside the kernel (lane axis = T = 128); the tiny wrapper
    # transposes are layout plumbing outside the kernel.
    x_ft = jnp.swapaxes(x, 1, 2)       # (B, In, T)
    ksi_ft = jnp.swapaxes(ksi, 1, 2)   # (B, F, T)

    def full(a):
        n = a.ndim
        return pl.BlockSpec(a.shape, lambda b: (0,) * n)

    out_ft = pl.pallas_call(
        idcnn_kernel,
        out_shape=jax.ShapeDtypeStruct((B, F, T), jnp.float32),
        grid=(B,),
        in_specs=[
            pl.BlockSpec((None, In, T), lambda b: (b, 0, 0)),   # x, channels-first
            full(params["w_lin"]),                              # (F, In)
            full(params["b_lin"]),                              # (F, 1)
            full(params["conv_w"]),                             # (5, 3F, F)
            full(params["conv_b"]),                             # (5, F, 1)
            full(params["a1"]), full(params["b1"]),             # (1, T)
            full(params["a2"]), full(params["b2"]),             # (1, T)
            pl.BlockSpec((None, F, T), lambda b: (b, 0, 0)),    # ksi
        ],
        out_specs=pl.BlockSpec((None, F, T), lambda b: (b, 0, 0)),
        compiler_params=pltpu.CompilerParams(
            dimension_semantics=("parallel",)),   # one batch element per TC on v7x
    )(x_ft, params["w_lin"], params["b_lin"], params["conv_w"], params["conv_b"],
      params["a1"], params["b1"], params["a2"], params["b2"], ksi_ft)

    return jnp.swapaxes(out_ft, 1, 2)             # back to torch (B, T, F)


def make_params(key, input_size, filters, seq_len):
    ks = jax.random.split(key, 4)
    F = filters
    # Linear(input_size, filters), torch weight layout (F, In).
    w_lin = (jax.random.normal(ks[0], (F, input_size), jnp.float32)
             / jnp.sqrt(float(input_size)))
    b_lin = 0.01 * jax.random.normal(ks[1], (F, 1), jnp.float32)
    # 5 Conv1d(F, F, k=3) weights, torch layout (layer, out, in, k), packed as
    # an M-stacked slab (layer, 3F, F) = [W_k0; W_k1; W_k2] per layer.
    conv_w_oik = (jax.random.normal(ks[2], (5, F, F, 3), jnp.float32)
                  / jnp.sqrt(float(3 * F)))
    conv_w = jnp.concatenate(
        [conv_w_oik[..., 0], conv_w_oik[..., 1], conv_w_oik[..., 2]], axis=1)
    conv_b = 0.01 * jax.random.normal(ks[3], (5, F, 1), jnp.float32)
    # LayerNorm(128) params (features == seq_len): init ones / zeros, stored
    # as (1, T) lane vectors (they scale per time position).
    a1 = jnp.ones((1, seq_len), jnp.float32)
    b1 = jnp.zeros((1, seq_len), jnp.float32)
    a2 = jnp.ones((1, seq_len), jnp.float32)
    b2 = jnp.zeros((1, seq_len), jnp.float32)
    return dict(w_lin=w_lin, b_lin=b_lin, conv_w=conv_w, conv_b=conv_b,
                a1=a1, b1=b1, a2=a2, b2=b2)


def idcnn_reference(x, params, ksi):
    """Pure-JAX reference mirroring the torch module (for a sanity check)."""
    P = jax.lax.Precision.HIGHEST
    F = params["w_lin"].shape[0]
    T = x.shape[1]

    emb = jnp.einsum("bti,fi->btf", x, params["w_lin"],
                     precision=P) + params["b_lin"][:, 0]
    emb1 = emb                                      # (B, T, F)
    h = jnp.swapaxes(emb, 1, 2)                     # (B, F, T)

    def conv(h, li):
        d = DILATIONS[li]
        w = params["conv_w"][li]                    # (3F, F)
        wm, w0, wp = w[:F], w[F:2 * F], w[2 * F:]
        z = jnp.zeros(h.shape[:2] + (d,), h.dtype)
        hm = jnp.concatenate([z, h[..., :T - d]], axis=-1)   # h[t-d]
        hp = jnp.concatenate([h[..., d:], z], axis=-1)       # h[t+d]
        y = (jnp.einsum("fk,bkt->bft", wm, hm, precision=P)
             + jnp.einsum("fk,bkt->bft", w0, h, precision=P)
             + jnp.einsum("fk,bkt->bft", wp, hp, precision=P))
        return y + params["conv_b"][li][None]

    def ln(h, a, b):
        mean = jnp.mean(h, axis=-1, keepdims=True)
        var = jnp.sum((h - mean) ** 2, axis=-1, keepdims=True) / (T - 1)
        return a[None] * (h - mean) / (jnp.sqrt(var) + EPS) + b[None]

    def block(h):
        h = conv(h, 0)
        h = jax.nn.sigmoid(h)
        h = ln(h, params["a1"], params["b1"])
        for li in (1, 2, 3, 4):
            h = conv(h, li)
        return h

    h = block(h)
    h = jax.nn.sigmoid(h)
    h = ln(h, params["a2"], params["b2"])
    for _ in range(NUM_BLOCK - 1):
        h = block(h)
    output = jnp.swapaxes(h, 1, 2)                  # (B, T, F)
    gate = jax.nn.sigmoid(output * (1.0 + ksi))
    return (emb1 + output) * gate


if __name__ == "__main__":
    # Shapes consistent with the module: LayerNorm(128) forces seq_len = 128.
    B, T, IN, FILT = 2, 128, 16, 32

    key = jax.random.PRNGKey(0)
    k_x, k_ksi, k_p = jax.random.split(key, 3)

    x = jax.random.normal(k_x, (B, T, IN), jnp.float32)
    params = make_params(k_p, IN, FILT, T)
    # ksi ~ N(0, 0.1) is drawn inside the torch forward; here it is drawn
    # host-side with the JAX PRNG and passed in deterministically.
    ksi = 0.1 * jax.random.normal(k_ksi, (B, T, FILT), jnp.float32)

    out = jax.jit(idcnn_forward)(x, params, ksi)
    out = jax.block_until_ready(out)

    assert out.shape == (B, T, FILT), out.shape
    assert bool(jnp.all(jnp.isfinite(out)))

    # Structural sanity check against a pure-JAX reference.  Loose norm-based
    # tolerance: robust to MXU / approximate-EUP precision differences while
    # still catching layout / shift-direction / LN-axis errors (which give
    # O(1) relative error).
    ref = jax.jit(idcnn_reference)(x, params, ksi)
    rel = float(jnp.linalg.norm(out - ref) / (jnp.linalg.norm(ref) + 1e-12))
    assert rel < 0.1, f"kernel vs reference relative error too large: {rel:.3e}"

    print("KERNEL_OK")
</pallas_src>

<mosaic_0001>
module attributes {stable_mosaic.version = 11 : i64} {
  func.func @idcnn_kernel(%arg0: i32, %arg1: memref<1x16x128xf32, #tpu.memory_space<vmem>>, %arg2: memref<32x16xf32, #tpu.memory_space<vmem>>, %arg3: memref<32x1xf32, #tpu.memory_space<vmem>>, %arg4: memref<5x96x32xf32, #tpu.memory_space<vmem>>, %arg5: memref<5x32x1xf32, #tpu.memory_space<vmem>>, %arg6: memref<1x128xf32, #tpu.memory_space<vmem>>, %arg7: memref<1x128xf32, #tpu.memory_space<vmem>>, %arg8: memref<1x128xf32, #tpu.memory_space<vmem>>, %arg9: memref<1x128xf32, #tpu.memory_space<vmem>>, %arg10: memref<1x32x128xf32, #tpu.memory_space<vmem>>, %arg11: memref<1x32x128xf32, #tpu.memory_space<vmem>>) attributes {dimension_semantics = [#tpu.dimension_semantics<parallel>], iteration_bounds = array<i64: 2>, scalar_prefetch = 0 : i64, scratch_operands = 0 : i64, tpu.core_type = #tpu.core_type<tc>, window_params = [{transform_indices = @transform_0, window_bounds = array<i64: 1, 16, 128>}, {pipeline_mode = #tpu.pipeline_mode<synchronous>, transform_indices = @transform_1, window_bounds = array<i64: 32, 16>}, {pipeline_mode = #tpu.pipeline_mode<synchronous>, transform_indices = @transform_2, window_bounds = array<i64: 32, 1>}, {pipeline_mode = #tpu.pipeline_mode<synchronous>, transform_indices = @transform_3, window_bounds = array<i64: 5, 96, 32>}, {pipeline_mode = #tpu.pipeline_mode<synchronous>, transform_indices = @transform_4, window_bounds = array<i64: 5, 32, 1>}, {pipeline_mode = #tpu.pipeline_mode<synchronous>, transform_indices = @transform_5, window_bounds = array<i64: 1, 128>}, {pipeline_mode = #tpu.pipeline_mode<synchronous>, transform_indices = @transform_6, window_bounds = array<i64: 1, 128>}, {pipeline_mode = #tpu.pipeline_mode<synchronous>, transform_indices = @transform_7, window_bounds = array<i64: 1, 128>}, {pipeline_mode = #tpu.pipeline_mode<synchronous>, transform_indices = @transform_8, window_bounds = array<i64: 1, 128>}, {transform_indices = @transform_9, window_bounds = array<i64: 1, 32, 128>}, {transform_indices = @transform_10, window_bounds = array<i64: 1, 32, 128>}]} {
    %0 = tpu.iota {dimensions = array<i32: 1>} : vector<32x128xi32>
    %c0 = arith.constant 0 : index
    %c0_0 = arith.constant 0 : index
    %1 = vector.load %arg2[%c0, %c0_0] : memref<32x16xf32, #tpu.memory_space<vmem>>, vector<32x16xf32>
    %c0_1 = arith.constant 0 : index
    %c0_2 = arith.constant 0 : index
    %c0_3 = arith.constant 0 : index
    %2 = vector.load %arg1[%c0_1, %c0_2, %c0_3] : memref<1x16x128xf32, #tpu.memory_space<vmem>>, vector<1x16x128xf32>
    %3 = vector.shape_cast %2 : vector<1x16x128xf32> to vector<16x128xf32>
    %cst = arith.constant dense<0.000000e+00> : vector<32x128xf32>
    %4 = tpu.matmul %1, %3, %cst {dimension_numbers = #tpu.dot_dimension_numbers<[1], [0], [0], [1], [0, 0, 1, 1], [], []>} : vector<32x16xf32>, vector<16x128xf32>, vector<32x128xf32> -> vector<32x128xf32>
    %c0_4 = arith.constant 0 : index
    %c0_5 = arith.constant 0 : index
    %5 = vector.load %arg3[%c0_4, %c0_5] : memref<32x1xf32, #tpu.memory_space<vmem>>, vector<32x1xf32>
    %6 = vector.broadcast %5 : vector<32x1xf32> to vector<32x128xf32>
    %7 = arith.addf %4, %6 : vector<32x128xf32>
    %c0_6 = arith.constant 0 : index
    %c0_7 = arith.constant 0 : index
    %c0_8 = arith.constant 0 : index
    %8 = vector.load %arg4[%c0_6, %c0_7, %c0_8] : memref<5x96x32xf32, #tpu.memory_space<vmem>>, vector<1x96x32xf32>
    %9 = vector.shape_cast %8 : vector<1x96x32xf32> to vector<96x32xf32>
    %cst_9 = arith.constant dense<0.000000e+00> : vector<96x128xf32>
    %10 = tpu.matmul %9, %7, %cst_9 {dimension_numbers = #tpu.dot_dimension_numbers<[1], [0], [0], [1], [0, 0, 1, 1], [], []>} : vector<96x32xf32>, vector<32x128xf32>, vector<96x128xf32> -> vector<96x128xf32>
    %c1_i32 = arith.constant 1 : i32
    %11 = vector.broadcast %c1_i32 : i32 to vector<32x128xi32>
    %12 = arith.cmpi slt, %0, %11 : vector<32x128xi32>
    %13 = vector.extract_strided_slice %10 {offsets = [0, 0], sizes = [32, 128], strides = [1, 1]} : vector<96x128xf32> to vector<32x128xf32>
    %c1_i32_10 = arith.constant 1 : i32
    %14 = tpu.dynamic_rotate %13 by %c1_i32_10 dim 1 : vector<32x128xf32>, i32 -> vector<32x128xf32>
    %cst_11 = arith.constant 0.000000e+00 : f32
    %15 = vector.broadcast %cst_11 : f32 to vector<32x128xf32>
    %16 = arith.select %12, %15, %14 : vector<32x128xi1>, vector<32x128xf32>
    %c127_i32 = arith.constant 127 : i32
    %17 = vector.broadcast %c127_i32 : i32 to vector<32x128xi32>
    %18 = arith.cmpi sge, %0, %17 : vector<32x128xi32>
    %19 = vector.extract_strided_slice %10 {offsets = [64, 0], sizes = [32, 128], strides = [1, 1]} : vector<96x128xf32> to vector<32x128xf32>
    %c127_i32_12 = arith.constant 127 : i32
    %20 = tpu.dynamic_rotate %19 by %c127_i32_12 dim 1 : vector<32x128xf32>, i32 -> vector<32x128xf32>
    %cst_13 = arith.constant 0.000000e+00 : f32
    %21 = vector.broadcast %cst_13 : f32 to vector<32x128xf32>
    %22 = arith.select %18, %21, %20 : vector<32x128xi1>, vector<32x128xf32>
    %23 = vector.extract_strided_slice %10 {offsets = [32, 0], sizes = [32, 128], strides = [1, 1]} : vector<96x128xf32> to vector<32x128xf32>
    %24 = arith.addf %16, %23 : vector<32x128xf32>
    %25 = arith.addf %24, %22 : vector<32x128xf32>
    %c0_14 = arith.constant 0 : index
    %c0_15 = arith.constant 0 : index
    %c0_16 = arith.constant 0 : index
    %26 = vector.load %arg5[%c0_14, %c0_15, %c0_16] : memref<5x32x1xf32, #tpu.memory_space<vmem>>, vector<1x32x1xf32>
    %27 = vector.shape_cast %26 : vector<1x32x1xf32> to vector<32x1xf32>
    %28 = vector.broadcast %27 : vector<32x1xf32> to vector<32x128xf32>
    %29 = arith.addf %25, %28 : vector<32x128xf32>
    %cst_17 = arith.constant 0.000000e+00 : f32
    %30 = vector.broadcast %cst_17 : f32 to vector<32x128xf32>
    %31 = arith.subf %30, %29 : vector<32x128xf32>
    %32 = math.exp %31 : vector<32x128xf32>
    %cst_18 = arith.constant 1.000000e+00 : f32
    %33 = vector.broadcast %cst_18 : f32 to vector<32x128xf32>
    %34 = arith.addf %33, %32 : vector<32x128xf32>
    %35 = tpu.reciprocal %34 {approx = true} : vector<32x128xf32> -> vector<32x128xf32>
    %cst_19 = arith.constant dense<0.000000e+00> : vector<32xf32>
    %36 = vector.multi_reduction <add>, %35, %cst_19 [1] : vector<32x128xf32> to vector<32xf32>
    %37 = vector.shape_cast %36 : vector<32xf32> to vector<32x1xf32>
    %cst_20 = arith.constant 1.280000e+02 : f32
    %38 = vector.broadcast %cst_20 : f32 to vector<32x1xf32>
    %39 = arith.divf %37, %38 : vector<32x1xf32>
    %40 = vector.broadcast %39 : vector<32x1xf32> to vector<32x128xf32>
    %41 = arith.subf %35, %40 : vector<32x128xf32>
    %42 = arith.mulf %41, %41 : vector<32x128xf32>
    %cst_21 = arith.constant dense<0.000000e+00> : vector<32xf32>
    %43 = vector.multi_reduction <add>, %42, %cst_21 [1] : vector<32x128xf32> to vector<32xf32>
    %44 = vector.shape_cast %43 : vector<32xf32> to vector<32x1xf32>
    %cst_22 = arith.constant 0.00787401571 : f32
    %45 = vector.broadcast %cst_22 : f32 to vector<32x1xf32>
    %46 = arith.mulf %44, %45 : vector<32x1xf32>
    %47 = math.sqrt %46 : vector<32x1xf32>
    %cst_23 = arith.constant 9.99999997E-7 : f32
    %48 = vector.broadcast %cst_23 : f32 to vector<32x1xf32>
    %49 = arith.addf %47, %48 : vector<32x1xf32>
    %50 = tpu.reciprocal %49 {approx = true} : vector<32x1xf32> -> vector<32x1xf32>
    %c0_24 = arith.constant 0 : index
    %c0_25 = arith.constant 0 : index
    %51 = vector.load %arg6[%c0_24, %c0_25] : memref<1x128xf32, #tpu.memory_space<vmem>>, vector<1x128xf32>
    %52 = vector.broadcast %50 : vector<32x1xf32> to vector<32x128xf32>
    %53 = arith.mulf %41, %52 : vector<32x128xf32>
    %54 = vector.broadcast %51 : vector<1x128xf32> to vector<32x128xf32>
    %55 = arith.mulf %54, %53 : vector<32x128xf32>
    %c0_26 = arith.constant 0 : index
    %c0_27 = arith.constant 0 : index
    %56 = vector.load %arg7[%c0_26, %c0_27] : memref<1x128xf32, #tpu.memory_space<vmem>>, vector<1x128xf32>
    %57 = vector.broadcast %56 : vector<1x128xf32> to vector<32x128xf32>
    %58 = arith.addf %55, %57 : vector<32x128xf32>
    %c1 = arith.constant 1 : index
    %c0_28 = arith.constant 0 : index
    %c0_29 = arith.constant 0 : index
    %59 = vector.load %arg4[%c1, %c0_28, %c0_29] : memref<5x96x32xf32, #tpu.memory_space<vmem>>, vector<1x96x32xf32>
    %60 = vector.shape_cast %59 : vector<1x96x32xf32> to vector<96x32xf32>
    %cst_30 = arith.constant dense<0.000000e+00> : vector<96x128xf32>
    %61 = tpu.matmul %60, %58, %cst_30 {dimension_numbers = #tpu.dot_dimension_numbers<[1], [0], [0], [1], [0, 0, 1, 1], [], []>} : vector<96x32xf32>, vector<32x128xf32>, vector<96x128xf32> -> vector<96x128xf32>
    %c1_i32_31 = arith.constant 1 : i32
    %62 = vector.broadcast %c1_i32_31 : i32 to vector<32x128xi32>
    %63 = arith.cmpi slt, %0, %62 : vector<32x128xi32>
    %64 = vector.extract_strided_slice %61 {offsets = [0, 0], sizes = [32, 128], strides = [1, 1]} : vector<96x128xf32> to vector<32x128xf32>
    %c1_i32_32 = arith.constant 1 : i32
    %65 = tpu.dynamic_rotate %64 by %c1_i32_32 dim 1 : vector<32x128xf32>, i32 -> vector<32x128xf32>
    %cst_33 = arith.constant 0.000000e+00 : f32
    %66 = vector.broadcast %cst_33 : f32 to vector<32x128xf32>
    %67 = arith.select %63, %66, %65 : vector<32x128xi1>, vector<32x128xf32>
    %c127_i32_34 = arith.constant 127 : i32
    %68 = vector.broadcast %c127_i32_34 : i32 to vector<32x128xi32>
    %69 = arith.cmpi sge, %0, %68 : vector<32x128xi32>
    %70 = vector.extract_strided_slice %61 {offsets = [64, 0], sizes = [32, 128], strides = [1, 1]} : vector<96x128xf32> to vector<32x128xf32>
    %c127_i32_35 = arith.constant 127 : i32
    %71 = tpu.dynamic_rotate %70 by %c127_i32_35 dim 1 : vector<32x128xf32>, i32 -> vector<32x128xf32>
    %cst_36 = arith.constant 0.000000e+00 : f32
    %72 = vector.broadcast %cst_36 : f32 to vector<32x128xf32>
    %73 = arith.select %69, %72, %71 : vector<32x128xi1>, vector<32x128xf32>
    %74 = vector.extract_strided_slice %61 {offsets = [32, 0], sizes = [32, 128], strides = [1, 1]} : vector<96x128xf32> to vector<32x128xf32>
    %75 = arith.addf %67, %74 : vector<32x128xf32>
    %76 = arith.addf %75, %73 : vector<32x128xf32>
    %c1_37 = arith.constant 1 : index
    %c0_38 = arith.constant 0 : index
    %c0_39 = arith.constant 0 : index
    %77 = vector.load %arg5[%c1_37, %c0_38, %c0_39] : memref<5x32x1xf32, #tpu.memory_space<vmem>>, vector<1x32x1xf32>
    %78 = vector.shape_cast %77 : vector<1x32x1xf32> to vector<32x1xf32>
    %79 = vector.broadcast %78 : vector<32x1xf32> to vector<32x128xf32>
    %80 = arith.addf %76, %79 : vector<32x128xf32>
    %c2 = arith.constant 2 : index
    %c0_40 = arith.constant 0 : index
    %c0_41 = arith.constant 0 : index
    %81 = vector.load %arg4[%c2, %c0_40, %c0_41] : memref<5x96x32xf32, #tpu.memory_space<vmem>>, vector<1x96x32xf32>
    %82 = vector.shape_cast %81 : vector<1x96x32xf32> to vector<96x32xf32>
    %cst_42 = arith.constant dense<0.000000e+00> : vector<96x128xf32>
    %83 = tpu.matmul %82, %80, %cst_42 {dimension_numbers = #tpu.dot_dimension_numbers<[1], [0], [0], [1], [0, 0, 1, 1], [], []>} : vector<96x32xf32>, vector<32x128xf32>, vector<96x128xf32> -> vector<96x128xf32>
    %c2_i32 = arith.constant 2 : i32
    %84 = vector.broadcast %c2_i32 : i32 to vector<32x128xi32>
    %85 = arith.cmpi slt, %0, %84 : vector<32x128xi32>
    %86 = vector.extract_strided_slice %83 {offsets = [0, 0], sizes = [32, 128], strides = [1, 1]} : vector<96x128xf32> to vector<32x128xf32>
    %c2_i32_43 = arith.constant 2 : i32
    %87 = tpu.dynamic_rotate %86 by %c2_i32_43 dim 1 : vector<32x128xf32>, i32 -> vector<32x128xf32>
    %cst_44 = arith.constant 0.000000e+00 : f32
    %88 = vector.broadcast %cst_44 : f32 to vector<32x128xf32>
    %89 = arith.select %85, %88, %87 : vector<32x128xi1>, vector<32x128xf32>
    %c126_i32 = arith.constant 126 : i32
    %90 = vector.broadcast %c126_i32 : i32 to vector<32x128xi32>
    %91 = arith.cmpi sge, %0, %90 : vector<32x128xi32>
    %92 = vector.extract_strided_slice %83 {offsets = [64, 0], sizes = [32, 128], strides = [1, 1]} : vector<96x128xf32> to vector<32x128xf32>
    %c126_i32_45 = arith.constant 126 : i32
    %93 = tpu.dynamic_rotate %92 by %c126_i32_45 dim 1 : vector<32x128xf32>, i32 -> vector<32x128xf32>
    %cst_46 = arith.constant 0.000000e+00 : f32
    %94 = vector.broadcast %cst_46 : f32 to vector<32x128xf32>
    %95 = arith.select %91, %94, %93 : vector<32x128xi1>, vector<32x128xf32>
    %96 = vector.extract_strided_slice %83 {offsets = [32, 0], sizes = [32, 128], strides = [1, 1]} : vector<96x128xf32> to vector<32x128xf32>
    %97 = arith.addf %89, %96 : vector<32x128xf32>
    %98 = arith.addf %97, %95 : vector<32x128xf32>
    %c2_47 = arith.constant 2 : index
    %c0_48 = arith.constant 0 : index
    %c0_49 = arith.constant 0 : index
    %99 = vector.load %arg5[%c2_47, %c0_48, %c0_49] : memref<5x32x1xf32, #tpu.memory_space<vmem>>, vector<1x32x1xf32>
    %100 = vector.shape_cast %99 : vector<1x32x1xf32> to vector<32x1xf32>
    %101 = vector.broadcast %100 : vector<32x1xf32> to vector<32x128xf32>
    %102 = arith.addf %98, %101 : vector<32x128xf32>
    %c3 = arith.constant 3 : index
    %c0_50 = arith.constant 0 : index
    %c0_51 = arith.constant 0 : index
    %103 = vector.load %arg4[%c3, %c0_50, %c0_51] : memref<5x96x32xf32, #tpu.memory_space<vmem>>, vector<1x96x32xf32>
    %104 = vector.shape_cast %103 : vector<1x96x32xf32> to vector<96x32xf32>
    %cst_52 = arith.constant dense<0.000000e+00> : vector<96x128xf32>
    %105 = tpu.matmul %104, %102, %cst_52 {dimension_numbers = #tpu.dot_dimension_numbers<[1], [0], [0], [1], [0, 0, 1, 1], [], []>} : vector<96x32xf32>, vector<32x128xf32>, vector<96x128xf32> -> vector<96x128xf32>
    %c4_i32 = arith.constant 4 : i32
    %106 = vector.broadcast %c4_i32 : i32 to vector<32x128xi32>
    %107 = arith.cmpi slt, %0, %106 : vector<32x128xi32>
    %108 = vector.extract_strided_slice %105 {offsets = [0, 0], sizes = [32, 128], strides = [1, 1]} : vector<96x128xf32> to vector<32x128xf32>
    %c4_i32_53 = arith.constant 4 : i32
    %109 = tpu.dynamic_rotate %108 by %c4_i32_53 dim 1 : vector<32x128xf32>, i32 -> vector<32x128xf32>
    %cst_54 = arith.constant 0.000000e+00 : f32
    %110 = vector.broadcast %cst_54 : f32 to vector<32x128xf32>
    %111 = arith.select %107, %110, %109 : vector<32x128xi1>, vector<32x128xf32>
    %c124_i32 = arith.constant 124 : i32
    %112 = vector.broadcast %c124_i32 : i32 to vector<32x128xi32>
    %113 = arith.cmpi sge, %0, %112 : vector<32x128xi32>
    %114 = vector.extract_strided_slice %105 {offsets = [64, 0], sizes = [32, 128], strides = [1, 1]} : vector<96x128xf32> to vector<32x128xf32>
    %c124_i32_55 = arith.constant 124 : i32
    %115 = tpu.dynamic_rotate %114 by %c124_i32_55 dim 1 : vector<32x128xf32>, i32 -> vector<32x128xf32>
    %cst_56 = arith.constant 0.000000e+00 : f32
    %116 = vector.broadcast %cst_56 : f32 to vector<32x128xf32>
    %117 = arith.select %113, %116, %115 : vector<32x128xi1>, vector<32x128xf32>
    %118 = vector.extract_strided_slice %105 {offsets = [32, 0], sizes = [32, 128], strides = [1, 1]} : vector<96x128xf32> to vector<32x128xf32>
    %119 = arith.addf %111, %118 : vector<32x128xf32>
    %120 = arith.addf %119, %117 : vector<32x128xf32>
    %c3_57 = arith.constant 3 : index
    %c0_58 = arith.constant 0 : index
    %c0_59 = arith.constant 0 : index
    %121 = vector.load %arg5[%c3_57, %c0_58, %c0_59] : memref<5x32x1xf32, #tpu.memory_space<vmem>>, vector<1x32x1xf32>
    %122 = vector.shape_cast %121 : vector<1x32x1xf32> to vector<32x1xf32>
    %123 = vector.broadcast %122 : vector<32x1xf32> to vector<32x128xf32>
    %124 = arith.addf %120, %123 : vector<32x128xf32>
    %c4 = arith.constant 4 : index
    %c0_60 = arith.constant 0 : index
    %c0_61 = arith.constant 0 : index
    %125 = vector.load %arg4[%c4, %c0_60, %c0_61] : memref<5x96x32xf32, #tpu.memory_space<vmem>>, vector<1x96x32xf32>
    %126 = vector.shape_cast %125 : vector<1x96x32xf32> to vector<96x32xf32>
    %cst_62 = arith.constant dense<0.000000e+00> : vector<96x128xf32>
    %127 = tpu.matmul %126, %124, %cst_62 {dimension_numbers = #tpu.dot_dimension_numbers<[1], [0], [0], [1], [0, 0, 1, 1], [], []>} : vector<96x32xf32>, vector<32x128xf32>, vector<96x128xf32> -> vector<96x128xf32>
    %c1_i32_63 = arith.constant 1 : i32
    %128 = vector.broadcast %c1_i32_63 : i32 to vector<32x128xi32>
    %129 = arith.cmpi slt, %0, %128 : vector<32x128xi32>
    %130 = vector.extract_strided_slice %127 {offsets = [0, 0], sizes = [32, 128], strides = [1, 1]} : vector<96x128xf32> to vector<32x128xf32>
    %c1_i32_64 = arith.constant 1 : i32
    %131 = tpu.dynamic_rotate %130 by %c1_i32_64 dim 1 : vector<32x128xf32>, i32 -> vector<32x128xf32>
    %cst_65 = arith.constant 0.000000e+00 : f32
    %132 = vector.broadcast %cst_65 : f32 to vector<32x128xf32>
    %133 = arith.select %129, %132, %131 : vector<32x128xi1>, vector<32x128xf32>
    %c127_i32_66 = arith.constant 127 : i32
    %134 = vector.broadcast %c127_i32_66 : i32 to vector<32x128xi32>
    %135 = arith.cmpi sge, %0, %134 : vector<32x128xi32>
    %136 = vector.extract_strided_slice %127 {offsets = [64, 0], sizes = [32, 128], strides = [1, 1]} : vector<96x128xf32> to vector<32x128xf32>
    %c127_i32_67 = arith.constant 127 : i32
    %137 = tpu.dynamic_rotate %136 by %c127_i32_67 dim 1 : vector<32x128xf32>, i32 -> vector<32x128xf32>
    %cst_68 = arith.constant 0.000000e+00 : f32
    %138 = vector.broadcast %cst_68 : f32 to vector<32x128xf32>
    %139 = arith.select %135, %138, %137 : vector<32x128xi1>, vector<32x128xf32>
    %140 = vector.extract_strided_slice %127 {offsets = [32, 0], sizes = [32, 128], strides = [1, 1]} : vector<96x128xf32> to vector<32x128xf32>
    %141 = arith.addf %133, %140 : vector<32x128xf32>
    %142 = arith.addf %141, %139 : vector<32x128xf32>
    %c4_69 = arith.constant 4 : index
    %c0_70 = arith.constant 0 : index
    %c0_71 = arith.constant 0 : index
    %143 = vector.load %arg5[%c4_69, %c0_70, %c0_71] : memref<5x32x1xf32, #tpu.memory_space<vmem>>, vector<1x32x1xf32>
    %144 = vector.shape_cast %143 : vector<1x32x1xf32> to vector<32x1xf32>
    %145 = vector.broadcast %144 : vector<32x1xf32> to vector<32x128xf32>
    %146 = arith.addf %142, %145 : vector<32x128xf32>
    %cst_72 = arith.constant 0.000000e+00 : f32
    %147 = vector.broadcast %cst_72 : f32 to vector<32x128xf32>
    %148 = arith.subf %147, %146 : vector<32x128xf32>
    %149 = math.exp %148 : vector<32x128xf32>
    %cst_73 = arith.constant 1.000000e+00 : f32
    %150 = vector.broadcast %cst_73 : f32 to vector<32x128xf32>
    %151 = arith.addf %150, %149 : vector<32x128xf32>
    %152 = tpu.reciprocal %151 {approx = true} : vector<32x128xf32> -> vector<32x128xf32>
    %cst_74 = arith.constant dense<0.000000e+00> : vector<32xf32>
    %153 = vector.multi_reduction <add>, %152, %cst_74 [1] : vector<32x128xf32> to vector<32xf32>
    %154 = vector.shape_cast %153 : vector<32xf32> to vector<32x1xf32>
    %cst_75 = arith.constant 1.280000e+02 : f32
    %155 = vector.broadcast %cst_75 : f32 to vector<32x1xf32>
    %156 = arith.divf %154, %155 : vector<32x1xf32>
    %157 = vector.broadcast %156 : vector<32x1xf32> to vector<32x128xf32>
    %158 = arith.subf %152, %157 : vector<32x128xf32>
    %159 = arith.mulf %158, %158 : vector<32x128xf32>
    %cst_76 = arith.constant dense<0.000000e+00> : vector<32xf32>
    %160 = vector.multi_reduction <add>, %159, %cst_76 [1] : vector<32x128xf32> to vector<32xf32>
    %161 = vector.shape_cast %160 : vector<32xf32> to vector<32x1xf32>
    %cst_77 = arith.constant 0.00787401571 : f32
    %162 = vector.broadcast %cst_77 : f32 to vector<32x1xf32>
    %163 = arith.mulf %161, %162 : vector<32x1xf32>
    %164 = math.sqrt %163 : vector<32x1xf32>
    %cst_78 = arith.constant 9.99999997E-7 : f32
    %165 = vector.broadcast %cst_78 : f32 to vector<32x1xf32>
    %166 = arith.addf %164, %165 : vector<32x1xf32>
    %167 = tpu.reciprocal %166 {approx = true} : vector<32x1xf32> -> vector<32x1xf32>
    %c0_79 = arith.constant 0 : index
    %c0_80 = arith.constant 0 : index
    %168 = vector.load %arg8[%c0_79, %c0_80] : memref<1x128xf32, #tpu.memory_space<vmem>>, vector<1x128xf32>
    %169 = vector.broadcast %167 : vector<32x1xf32> to vector<32x128xf32>
    %170 = arith.mulf %158, %169 : vector<32x128xf32>
    %171 = vector.broadcast %168 : vector<1x128xf32> to vector<32x128xf32>
    %172 = arith.mulf %171, %170 : vector<32x128xf32>
    %c0_81 = arith.constant 0 : index
    %c0_82 = arith.constant 0 : index
    %173 = vector.load %arg9[%c0_81, %c0_82] : memref<1x128xf32, #tpu.memory_space<vmem>>, vector<1x128xf32>
    %174 = vector.broadcast %173 : vector<1x128xf32> to vector<32x128xf32>
    %175 = arith.addf %172, %174 : vector<32x128xf32>
    %c0_83 = arith.constant 0 : index
    %c0_84 = arith.constant 0 : index
    %c0_85 = arith.constant 0 : index
    %176 = vector.load %arg4[%c0_83, %c0_84, %c0_85] : memref<5x96x32xf32, #tpu.memory_space<vmem>>, vector<1x96x32xf32>
    %177 = vector.shape_cast %176 : vector<1x96x32xf32> to vector<96x32xf32>
    %cst_86 = arith.constant dense<0.000000e+00> : vector<96x128xf32>
    %178 = tpu.matmul %177, %175, %cst_86 {dimension_numbers = #tpu.dot_dimension_numbers<[1], [0], [0], [1], [0, 0, 1, 1], [], []>} : vector<96x32xf32>, vector<32x128xf32>, vector<96x128xf32> -> vector<96x128xf32>
    %c1_i32_87 = arith.constant 1 : i32
    %179 = vector.broadcast %c1_i32_87 : i32 to vector<32x128xi32>
    %180 = arith.cmpi slt, %0, %179 : vector<32x128xi32>
    %181 = vector.extract_strided_slice %178 {offsets = [0, 0], sizes = [32, 128], strides = [1, 1]} : vector<96x128xf32> to vector<32x128xf32>
    %c1_i32_88 = arith.constant 1 : i32
    %182 = tpu.dynamic_rotate %181 by %c1_i32_88 dim 1 : vector<32x128xf32>, i32 -> vector<32x128xf32>
    %cst_89 = arith.constant 0.000000e+00 : f32
    %183 = vector.broadcast %cst_89 : f32 to vector<32x128xf32>
    %184 = arith.select %180, %183, %182 : vector<32x128xi1>, vector<32x128xf32>
    %c127_i32_90 = arith.constant 127 : i32
    %185 = vector.broadcast %c127_i32_90 : i32 to vector<32x128xi32>
    %186 = arith.cmpi sge, %0, %185 : vector<32x128xi32>
    %187 = vector.extract_strided_slice %178 {offsets = [64, 0], sizes = [32, 128], strides = [1, 1]} : vector<96x128xf32> to vector<32x128xf32>
    %c127_i32_91 = arith.constant 127 : i32
    %188 = tpu.dynamic_rotate %187 by %c127_i32_91 dim 1 : vector<32x128xf32>, i32 -> vector<32x128xf32>
    %cst_92 = arith.constant 0.000000e+00 : f32
    %189 = vector.broadcast %cst_92 : f32 to vector<32x128xf32>
    %190 = arith.select %186, %189, %188 : vector<32x128xi1>, vector<32x128xf32>
    %191 = vector.extract_strided_slice %178 {offsets = [32, 0], sizes = [32, 128], strides = [1, 1]} : vector<96x128xf32> to vector<32x128xf32>
    %192 = arith.addf %184, %191 : vector<32x128xf32>
    %193 = arith.addf %192, %190 : vector<32x128xf32>
    %c0_93 = arith.constant 0 : index
    %c0_94 = arith.constant 0 : index
    %c0_95 = arith.constant 0 : index
    %194 = vector.load %arg5[%c0_93, %c0_94, %c0_95] : memref<5x32x1xf32, #tpu.memory_space<vmem>>, vector<1x32x1xf32>
    %195 = vector.shape_cast %194 : vector<1x32x1xf32> to vector<32x1xf32>
    %196 = vector.broadcast %195 : vector<32x1xf32> to vector<32x128xf32>
    %197 = arith.addf %193, %196 : vector<32x128xf32>
    %cst_96 = arith.constant 0.000000e+00 : f32
    %198 = vector.broadcast %cst_96 : f32 to vector<32x128xf32>
    %199 = arith.subf %198, %197 : vector<32x128xf32>
    %200 = math.exp %199 : vector<32x128xf32>
    %cst_97 = arith.constant 1.000000e+00 : f32
    %201 = vector.broadcast %cst_97 : f32 to vector<32x128xf32>
    %202 = arith.addf %201, %200 : vector<32x128xf32>
    %203 = tpu.reciprocal %202 {approx = true} : vector<32x128xf32> -> vector<32x128xf32>
    %cst_98 = arith.constant dense<0.000000e+00> : vector<32xf32>
    %204 = vector.multi_reduction <add>, %203, %cst_98 [1] : vector<32x128xf32> to vector<32xf32>
    %205 = vector.shape_cast %204 : vector<32xf32> to vector<32x1xf32>
    %cst_99 = arith.constant 1.280000e+02 : f32
    %206 = vector.broadcast %cst_99 : f32 to vector<32x1xf32>
    %207 = arith.divf %205, %206 : vector<32x1xf32>
    %208 = vector.broadcast %207 : vector<32x1xf32> to vector<32x128xf32>
    %209 = arith.subf %203, %208 : vector<32x128xf32>
    %210 = arith.mulf %209, %209 : vector<32x128xf32>
    %cst_100 = arith.constant dense<0.000000e+00> : vector<32xf32>
    %211 = vector.multi_reduction <add>, %210, %cst_100 [1] : vector<32x128xf32> to vector<32xf32>
    %212 = vector.shape_cast %211 : vector<32xf32> to vector<32x1xf32>
    %cst_101 = arith.constant 0.00787401571 : f32
    %213 = vector.broadcast %cst_101 : f32 to vector<32x1xf32>
    %214 = arith.mulf %212, %213 : vector<32x1xf32>
    %215 = math.sqrt %214 : vector<32x1xf32>
    %cst_102 = arith.constant 9.99999997E-7 : f32
    %216 = vector.broadcast %cst_102 : f32 to vector<32x1xf32>
    %217 = arith.addf %215, %216 : vector<32x1xf32>
    %218 = tpu.reciprocal %217 {approx = true} : vector<32x1xf32> -> vector<32x1xf32>
    %c0_103 = arith.constant 0 : index
    %c0_104 = arith.constant 0 : index
    %219 = vector.load %arg6[%c0_103, %c0_104] : memref<1x128xf32, #tpu.memory_space<vmem>>, vector<1x128xf32>
    %220 = vector.broadcast %218 : vector<32x1xf32> to vector<32x128xf32>
    %221 = arith.mulf %209, %220 : vector<32x128xf32>
    %222 = vector.broadcast %219 : vector<1x128xf32> to vector<32x128xf32>
    %223 = arith.mulf %222, %221 : vector<32x128xf32>
    %c0_105 = arith.constant 0 : index
    %c0_106 = arith.constant 0 : index
    %224 = vector.load %arg7[%c0_105, %c0_106] : memref<1x128xf32, #tpu.memory_space<vmem>>, vector<1x128xf32>
    %225 = vector.broadcast %224 : vector<1x128xf32> to vector<32x128xf32>
    %226 = arith.addf %223, %225 : vector<32x128xf32>
    %c1_107 = arith.constant 1 : index
    %c0_108 = arith.constant 0 : index
    %c0_109 = arith.constant 0 : index
    %227 = vector.load %arg4[%c1_107, %c0_108, %c0_109] : memref<5x96x32xf32, #tpu.memory_space<vmem>>, vector<1x96x32xf32>
    %228 = vector.shape_cast %227 : vector<1x96x32xf32> to vector<96x32xf32>
    %cst_110 = arith.constant dense<0.000000e+00> : vector<96x128xf32>
    %229 = tpu.matmul %228, %226, %cst_110 {dimension_numbers = #tpu.dot_dimension_numbers<[1], [0], [0], [1], [0, 0, 1, 1], [], []>} : vector<96x32xf32>, vector<32x128xf32>, vector<96x128xf32> -> vector<96x128xf32>
    %c1_i32_111 = arith.constant 1 : i32
    %230 = vector.broadcast %c1_i32_111 : i32 to vector<32x128xi32>
    %231 = arith.cmpi slt, %0, %230 : vector<32x128xi32>
    %232 = vector.extract_strided_slice %229 {offsets = [0, 0], sizes = [32, 128], strides = [1, 1]} : vector<96x128xf32> to vector<32x128xf32>
    %c1_i32_112 = arith.constant 1 : i32
    %233 = tpu.dynamic_rotate %232 by %c1_i32_112 dim 1 : vector<32x128xf32>, i32 -> vector<32x128xf32>
    %cst_113 = arith.constant 0.000000e+00 : f32
    %234 = vector.broadcast %cst_113 : f32 to vector<32x128xf32>
    %235 = arith.select %231, %234, %233 : vector<32x128xi1>, vector<32x128xf32>
    %c127_i32_114 = arith.constant 127 : i32
    %236 = vector.broadcast %c127_i32_114 : i32 to vector<32x128xi32>
    %237 = arith.cmpi sge, %0, %236 : vector<32x128xi32>
    %238 = vector.extract_strided_slice %229 {offsets = [64, 0], sizes = [32, 128], strides = [1, 1]} : vector<96x128xf32> to vector<32x128xf32>
    %c127_i32_115 = arith.constant 127 : i32
    %239 = tpu.dynamic_rotate %238 by %c127_i32_115 dim 1 : vector<32x128xf32>, i32 -> vector<32x128xf32>
    %cst_116 = arith.constant 0.000000e+00 : f32
    %240 = vector.broadcast %cst_116 : f32 to vector<32x128xf32>
    %241 = arith.select %237, %240, %239 : vector<32x128xi1>, vector<32x128xf32>
    %242 = vector.extract_strided_slice %229 {offsets = [32, 0], sizes = [32, 128], strides = [1, 1]} : vector<96x128xf32> to vector<32x128xf32>
    %243 = arith.addf %235, %242 : vector<32x128xf32>
    %244 = arith.addf %243, %241 : vector<32x128xf32>
    %c1_117 = arith.constant 1 : index
    %c0_118 = arith.constant 0 : index
    %c0_119 = arith.constant 0 : index
    %245 = vector.load %arg5[%c1_117, %c0_118, %c0_119] : memref<5x32x1xf32, #tpu.memory_space<vmem>>, vector<1x32x1xf32>
    %246 = vector.shape_cast %245 : vector<1x32x1xf32> to vector<32x1xf32>
    %247 = vector.broadcast %246 : vector<32x1xf32> to vector<32x128xf32>
    %248 = arith.addf %244, %247 : vector<32x128xf32>
    %c2_120 = arith.constant 2 : index
    %c0_121 = arith.constant 0 : index
    %c0_122 = arith.constant 0 : index
    %249 = vector.load %arg4[%c2_120, %c0_121, %c0_122] : memref<5x96x32xf32, #tpu.memory_space<vmem>>, vector<1x96x32xf32>
    %250 = vector.shape_cast %249 : vector<1x96x32xf32> to vector<96x32xf32>
    %cst_123 = arith.constant dense<0.000000e+00> : vector<96x128xf32>
    %251 = tpu.matmul %250, %248, %cst_123 {dimension_numbers = #tpu.dot_dimension_numbers<[1], [0], [0], [1], [0, 0, 1, 1], [], []>} : vector<96x32xf32>, vector<32x128xf32>, vector<96x128xf32> -> vector<96x128xf32>
    %c2_i32_124 = arith.constant 2 : i32
    %252 = vector.broadcast %c2_i32_124 : i32 to vector<32x128xi32>
    %253 = arith.cmpi slt, %0, %252 : vector<32x128xi32>
    %254 = vector.extract_strided_slice %251 {offsets = [0, 0], sizes = [32, 128], strides = [1, 1]} : vector<96x128xf32> to vector<32x128xf32>
    %c2_i32_125 = arith.constant 2 : i32
    %255 = tpu.dynamic_rotate %254 by %c2_i32_125 dim 1 : vector<32x128xf32>, i32 -> vector<32x128xf32>
    %cst_126 = arith.constant 0.000000e+00 : f32
    %256 = vector.broadcast %cst_126 : f32 to vector<32x128xf32>
    %257 = arith.select %253, %256, %255 : vector<32x128xi1>, vector<32x128xf32>
    %c126_i32_127 = arith.constant 126 : i32
    %258 = vector.broadcast %c126_i32_127 : i32 to vector<32x128xi32>
    %259 = arith.cmpi sge, %0, %258 : vector<32x128xi32>
    %260 = vector.extract_strided_slice %251 {offsets = [64, 0], sizes = [32, 128], strides = [1, 1]} : vector<96x128xf32> to vector<32x128xf32>
    %c126_i32_128 = arith.constant 126 : i32
    %261 = tpu.dynamic_rotate %260 by %c126_i32_128 dim 1 : vector<32x128xf32>, i32 -> vector<32x128xf32>
    %cst_129 = arith.constant 0.000000e+00 : f32
    %262 = vector.broadcast %cst_129 : f32 to vector<32x128xf32>
    %263 = arith.select %259, %262, %261 : vector<32x128xi1>, vector<32x128xf32>
    %264 = vector.extract_strided_slice %251 {offsets = [32, 0], sizes = [32, 128], strides = [1, 1]} : vector<96x128xf32> to vector<32x128xf32>
    %265 = arith.addf %257, %264 : vector<32x128xf32>
    %266 = arith.addf %265, %263 : vector<32x128xf32>
    %c2_130 = arith.constant 2 : index
    %c0_131 = arith.constant 0 : index
    %c0_132 = arith.constant 0 : index
    %267 = vector.load %arg5[%c2_130, %c0_131, %c0_132] : memref<5x32x1xf32, #tpu.memory_space<vmem>>, vector<1x32x1xf32>
    %268 = vector.shape_cast %267 : vector<1x32x1xf32> to vector<32x1xf32>
    %269 = vector.broadcast %268 : vector<32x1xf32> to vector<32x128xf32>
    %270 = arith.addf %266, %269 : vector<32x128xf32>
    %c3_133 = arith.constant 3 : index
    %c0_134 = arith.constant 0 : index
    %c0_135 = arith.constant 0 : index
    %271 = vector.load %arg4[%c3_133, %c0_134, %c0_135] : memref<5x96x32xf32, #tpu.memory_space<vmem>>, vector<1x96x32xf32>
    %272 = vector.shape_cast %271 : vector<1x96x32xf32> to vector<96x32xf32>
    %cst_136 = arith.constant dense<0.000000e+00> : vector<96x128xf32>
    %273 = tpu.matmul %272, %270, %cst_136 {dimension_numbers = #tpu.dot_dimension_numbers<[1], [0], [0], [1], [0, 0, 1, 1], [], []>} : vector<96x32xf32>, vector<32x128xf32>, vector<96x128xf32> -> vector<96x128xf32>
    %c4_i32_137 = arith.constant 4 : i32
    %274 = vector.broadcast %c4_i32_137 : i32 to vector<32x128xi32>
    %275 = arith.cmpi slt, %0, %274 : vector<32x128xi32>
    %276 = vector.extract_strided_slice %273 {offsets = [0, 0], sizes = [32, 128], strides = [1, 1]} : vector<96x128xf32> to vector<32x128xf32>
    %c4_i32_138 = arith.constant 4 : i32
    %277 = tpu.dynamic_rotate %276 by %c4_i32_138 dim 1 : vector<32x128xf32>, i32 -> vector<32x128xf32>
    %cst_139 = arith.constant 0.000000e+00 : f32
    %278 = vector.broadcast %cst_139 : f32 to vector<32x128xf32>
    %279 = arith.select %275, %278, %277 : vector<32x128xi1>, vector<32x128xf32>
    %c124_i32_140 = arith.constant 124 : i32
    %280 = vector.broadcast %c124_i32_140 : i32 to vector<32x128xi32>
    %281 = arith.cmpi sge, %0, %280 : vector<32x128xi32>
    %282 = vector.extract_strided_slice %273 {offsets = [64, 0], sizes = [32, 128], strides = [1, 1]} : vector<96x128xf32> to vector<32x128xf32>
    %c124_i32_141 = arith.constant 124 : i32
    %283 = tpu.dynamic_rotate %282 by %c124_i32_141 dim 1 : vector<32x128xf32>, i32 -> vector<32x128xf32>
    %cst_142 = arith.constant 0.000000e+00 : f32
    %284 = vector.broadcast %cst_142 : f32 to vector<32x128xf32>
    %285 = arith.select %281, %284, %283 : vector<32x128xi1>, vector<32x128xf32>
    %286 = vector.extract_strided_slice %273 {offsets = [32, 0], sizes = [32, 128], strides = [1, 1]} : vector<96x128xf32> to vector<32x128xf32>
    %287 = arith.addf %279, %286 : vector<32x128xf32>
    %288 = arith.addf %287, %285 : vector<32x128xf32>
    %c3_143 = arith.constant 3 : index
    %c0_144 = arith.constant 0 : index
    %c0_145 = arith.constant 0 : index
    %289 = vector.load %arg5[%c3_143, %c0_144, %c0_145] : memref<5x32x1xf32, #tpu.memory_space<vmem>>, vector<1x32x1xf32>
    %290 = vector.shape_cast %289 : vector<1x32x1xf32> to vector<32x1xf32>
    %291 = vector.broadcast %290 : vector<32x1xf32> to vector<32x128xf32>
    %292 = arith.addf %288, %291 : vector<32x128xf32>
    %c4_146 = arith.constant 4 : index
    %c0_147 = arith.constant 0 : index
    %c0_148 = arith.constant 0 : index
    %293 = vector.load %arg4[%c4_146, %c0_147, %c0_148] : memref<5x96x32xf32, #tpu.memory_space<vmem>>, vector<1x96x32xf32>
    %294 = vector.shape_cast %293 : vector<1x96x32xf32> to vector<96x32xf32>
    %cst_149 = arith.constant dense<0.000000e+00> : vector<96x128xf32>
    %295 = tpu.matmul %294, %292, %cst_149 {dimension_numbers = #tpu.dot_dimension_numbers<[1], [0], [0], [1], [0, 0, 1, 1], [], []>} : vector<96x32xf32>, vector<32x128xf32>, vector<96x128xf32> -> vector<96x128xf32>
    %c1_i32_150 = arith.constant 1 : i32
    %296 = vector.broadcast %c1_i32_150 : i32 to vector<32x128xi32>
    %297 = arith.cmpi slt, %0, %296 : vector<32x128xi32>
    %298 = vector.extract_strided_slice %295 {offsets = [0, 0], sizes = [32, 128], strides = [1, 1]} : vector<96x128xf32> to vector<32x128xf32>
    %c1_i32_151 = arith.constant 1 : i32
    %299 = tpu.dynamic_rotate %298 by %c1_i32_151 dim 1 : vector<32x128xf32>, i32 -> vector<32x128xf32>
    %cst_152 = arith.constant 0.000000e+00 : f32
    %300 = vector.broadcast %cst_152 : f32 to vector<32x128xf32>
    %301 = arith.select %297, %300, %299 : vector<32x128xi1>, vector<32x128xf32>
    %c127_i32_153 = arith.constant 127 : i32
    %302 = vector.broadcast %c127_i32_153 : i32 to vector<32x128xi32>
    %303 = arith.cmpi sge, %0, %302 : vector<32x128xi32>
    %304 = vector.extract_strided_slice %295 {offsets = [64, 0], sizes = [32, 128], strides = [1, 1]} : vector<96x128xf32> to vector<32x128xf32>
    %c127_i32_154 = arith.constant 127 : i32
    %305 = tpu.dynamic_rotate %304 by %c127_i32_154 dim 1 : vector<32x128xf32>, i32 -> vector<32x128xf32>
    %cst_155 = arith.constant 0.000000e+00 : f32
    %306 = vector.broadcast %cst_155 : f32 to vector<32x128xf32>
    %307 = arith.select %303, %306, %305 : vector<32x128xi1>, vector<32x128xf32>
    %308 = vector.extract_strided_slice %295 {offsets = [32, 0], sizes = [32, 128], strides = [1, 1]} : vector<96x128xf32> to vector<32x128xf32>
    %309 = arith.addf %301, %308 : vector<32x128xf32>
    %310 = arith.addf %309, %307 : vector<32x128xf32>
    %c4_156 = arith.constant 4 : index
    %c0_157 = arith.constant 0 : index
    %c0_158 = arith.constant 0 : index
    %311 = vector.load %arg5[%c4_156, %c0_157, %c0_158] : memref<5x32x1xf32, #tpu.memory_space<vmem>>, vector<1x32x1xf32>
    %312 = vector.shape_cast %311 : vector<1x32x1xf32> to vector<32x1xf32>
    %313 = vector.broadcast %312 : vector<32x1xf32> to vector<32x128xf32>
    %314 = arith.addf %310, %313 : vector<32x128xf32>
    %c0_159 = arith.constant 0 : index
    %c0_160 = arith.constant 0 : index
    %c0_161 = arith.constant 0 : index
    %315 = vector.load %arg4[%c0_159, %c0_160, %c0_161] : memref<5x96x32xf32, #tpu.memory_space<vmem>>, vector<1x96x32xf32>
    %316 = vector.shape_cast %315 : vector<1x96x32xf32> to vector<96x32xf32>
    %cst_162 = arith.constant dense<0.000000e+00> : vector<96x128xf32>
    %317 = tpu.matmul %316, %314, %cst_162 {dimension_numbers = #tpu.dot_dimension_numbers<[1], [0], [0], [1], [0, 0, 1, 1], [], []>} : vector<96x32xf32>, vector<32x128xf32>, vector<96x128xf32> -> vector<96x128xf32>
    %c1_i32_163 = arith.constant 1 : i32
    %318 = vector.broadcast %c1_i32_163 : i32 to vector<32x128xi32>
    %319 = arith.cmpi slt, %0, %318 : vector<32x128xi32>
    %320 = vector.extract_strided_slice %317 {offsets = [0, 0], sizes = [32, 128], strides = [1, 1]} : vector<96x128xf32> to vector<32x128xf32>
    %c1_i32_164 = arith.constant 1 : i32
    %321 = tpu.dynamic_rotate %320 by %c1_i32_164 dim 1 : vector<32x128xf32>, i32 -> vector<32x128xf32>
    %cst_165 = arith.constant 0.000000e+00 : f32
    %322 = vector.broadcast %cst_165 : f32 to vector<32x128xf32>
    %323 = arith.select %319, %322, %321 : vector<32x128xi1>, vector<32x128xf32>
    %c127_i32_166 = arith.constant 127 : i32
    %324 = vector.broadcast %c127_i32_166 : i32 to vector<32x128xi32>
    %325 = arith.cmpi sge, %0, %324 : vector<32x128xi32>
    %326 = vector.extract_strided_slice %317 {offsets = [64, 0], sizes = [32, 128], strides = [1, 1]} : vector<96x128xf32> to vector<32x128xf32>
    %c127_i32_167 = arith.constant 127 : i32
    %327 = tpu.dynamic_rotate %326 by %c127_i32_167 dim 1 : vector<32x128xf32>, i32 -> vector<32x128xf32>
    %cst_168 = arith.constant 0.000000e+00 : f32
    %328 = vector.broadcast %cst_168 : f32 to vector<32x128xf32>
    %329 = arith.select %325, %328, %327 : vector<32x128xi1>, vector<32x128xf32>
    %330 = vector.extract_strided_slice %317 {offsets = [32, 0], sizes = [32, 128], strides = [1, 1]} : vector<96x128xf32> to vector<32x128xf32>
    %331 = arith.addf %323, %330 : vector<32x128xf32>
    %332 = arith.addf %331, %329 : vector<32x128xf32>
    %c0_169 = arith.constant 0 : index
    %c0_170 = arith.constant 0 : index
    %c0_171 = arith.constant 0 : index
    %333 = vector.load %arg5[%c0_169, %c0_170, %c0_171] : memref<5x32x1xf32, #tpu.memory_space<vmem>>, vector<1x32x1xf32>
    %334 = vector.shape_cast %333 : vector<1x32x1xf32> to vector<32x1xf32>
    %335 = vector.broadcast %334 : vector<32x1xf32> to vector<32x128xf32>
    %336 = arith.addf %332, %335 : vector<32x128xf32>
    %cst_172 = arith.constant 0.000000e+00 : f32
    %337 = vector.broadcast %cst_172 : f32 to vector<32x128xf32>
    %338 = arith.subf %337, %336 : vector<32x128xf32>
    %339 = math.exp %338 : vector<32x128xf32>
    %cst_173 = arith.constant 1.000000e+00 : f32
    %340 = vector.broadcast %cst_173 : f32 to vector<32x128xf32>
    %341 = arith.addf %340, %339 : vector<32x128xf32>
    %342 = tpu.reciprocal %341 {approx = true} : vector<32x128xf32> -> vector<32x128xf32>
    %cst_174 = arith.constant dense<0.000000e+00> : vector<32xf32>
    %343 = vector.multi_reduction <add>, %342, %cst_174 [1] : vector<32x128xf32> to vector<32xf32>
    %344 = vector.shape_cast %343 : vector<32xf32> to vector<32x1xf32>
    %cst_175 = arith.constant 1.280000e+02 : f32
    %345 = vector.broadcast %cst_175 : f32 to vector<32x1xf32>
    %346 = arith.divf %344, %345 : vector<32x1xf32>
    %347 = vector.broadcast %346 : vector<32x1xf32> to vector<32x128xf32>
    %348 = arith.subf %342, %347 : vector<32x128xf32>
    %349 = arith.mulf %348, %348 : vector<32x128xf32>
    %cst_176 = arith.constant dense<0.000000e+00> : vector<32xf32>
    %350 = vector.multi_reduction <add>, %349, %cst_176 [1] : vector<32x128xf32> to vector<32xf32>
    %351 = vector.shape_cast %350 : vector<32xf32> to vector<32x1xf32>
    %cst_177 = arith.constant 0.00787401571 : f32
    %352 = vector.broadcast %cst_177 : f32 to vector<32x1xf32>
    %353 = arith.mulf %351, %352 : vector<32x1xf32>
    %354 = math.sqrt %353 : vector<32x1xf32>
    %cst_178 = arith.constant 9.99999997E-7 : f32
    %355 = vector.broadcast %cst_178 : f32 to vector<32x1xf32>
    %356 = arith.addf %354, %355 : vector<32x1xf32>
    %357 = tpu.reciprocal %356 {approx = true} : vector<32x1xf32> -> vector<32x1xf32>
    %c0_179 = arith.constant 0 : index
    %c0_180 = arith.constant 0 : index
    %358 = vector.load %arg6[%c0_179, %c0_180] : memref<1x128xf32, #tpu.memory_space<vmem>>, vector<1x128xf32>
    %359 = vector.broadcast %357 : vector<32x1xf32> to vector<32x128xf32>
    %360 = arith.mulf %348, %359 : vector<32x128xf32>
    %361 = vector.broadcast %358 : vector<1x128xf32> to vector<32x128xf32>
    %362 = arith.mulf %361, %360 : vector<32x128xf32>
    %c0_181 = arith.constant 0 : index
    %c0_182 = arith.constant 0 : index
    %363 = vector.load %arg7[%c0_181, %c0_182] : memref<1x128xf32, #tpu.memory_space<vmem>>, vector<1x128xf32>
    %364 = vector.broadcast %363 : vector<1x128xf32> to vector<32x128xf32>
    %365 = arith.addf %362, %364 : vector<32x128xf32>
    %c1_183 = arith.constant 1 : index
    %c0_184 = arith.constant 0 : index
    %c0_185 = arith.constant 0 : index
    %366 = vector.load %arg4[%c1_183, %c0_184, %c0_185] : memref<5x96x32xf32, #tpu.memory_space<vmem>>, vector<1x96x32xf32>
    %367 = vector.shape_cast %366 : vector<1x96x32xf32> to vector<96x32xf32>
    %cst_186 = arith.constant dense<0.000000e+00> : vector<96x128xf32>
    %368 = tpu.matmul %367, %365, %cst_186 {dimension_numbers = #tpu.dot_dimension_numbers<[1], [0], [0], [1], [0, 0, 1, 1], [], []>} : vector<96x32xf32>, vector<32x128xf32>, vector<96x128xf32> -> vector<96x128xf32>
    %c1_i32_187 = arith.constant 1 : i32
    %369 = vector.broadcast %c1_i32_187 : i32 to vector<32x128xi32>
    %370 = arith.cmpi slt, %0, %369 : vector<32x128xi32>
    %371 = vector.extract_strided_slice %368 {offsets = [0, 0], sizes = [32, 128], strides = [1, 1]} : vector<96x128xf32> to vector<32x128xf32>
    %c1_i32_188 = arith.constant 1 : i32
    %372 = tpu.dynamic_rotate %371 by %c1_i32_188 dim 1 : vector<32x128xf32>, i32 -> vector<32x128xf32>
    %cst_189 = arith.constant 0.000000e+00 : f32
    %373 = vector.broadcast %cst_189 : f32 to vector<32x128xf32>
    %374 = arith.select %370, %373, %372 : vector<32x128xi1>, vector<32x128xf32>
    %c127_i32_190 = arith.constant 127 : i32
    %375 = vector.broadcast %c127_i32_190 : i32 to vector<32x128xi32>
    %376 = arith.cmpi sge, %0, %375 : vector<32x128xi32>
    %377 = vector.extract_strided_slice %368 {offsets = [64, 0], sizes = [32, 128], strides = [1, 1]} : vector<96x128xf32> to vector<32x128xf32>
    %c127_i32_191 = arith.constant 127 : i32
    %378 = tpu.dynamic_rotate %377 by %c127_i32_191 dim 1 : vector<32x128xf32>, i32 -> vector<32x128xf32>
    %cst_192 = arith.constant 0.000000e+00 : f32
    %379 = vector.broadcast %cst_192 : f32 to vector<32x128xf32>
    %380 = arith.select %376, %379, %378 : vector<32x128xi1>, vector<32x128xf32>
    %381 = vector.extract_strided_slice %368 {offsets = [32, 0], sizes = [32, 128], strides = [1, 1]} : vector<96x128xf32> to vector<32x128xf32>
    %382 = arith.addf %374, %381 : vector<32x128xf32>
    %383 = arith.addf %382, %380 : vector<32x128xf32>
    %c1_193 = arith.constant 1 : index
    %c0_194 = arith.constant 0 : index
    %c0_195 = arith.constant 0 : index
    %384 = vector.load %arg5[%c1_193, %c0_194, %c0_195] : memref<5x32x1xf32, #tpu.memory_space<vmem>>, vector<1x32x1xf32>
    %385 = vector.shape_cast %384 : vector<1x32x1xf32> to vector<32x1xf32>
    %386 = vector.broadcast %385 : vector<32x1xf32> to vector<32x128xf32>
    %387 = arith.addf %383, %386 : vector<32x128xf32>
    %c2_196 = arith.constant 2 : index
    %c0_197 = arith.constant 0 : index
    %c0_198 = arith.constant 0 : index
    %388 = vector.load %arg4[%c2_196, %c0_197, %c0_198] : memref<5x96x32xf32, #tpu.memory_space<vmem>>, vector<1x96x32xf32>
    %389 = vector.shape_cast %388 : vector<1x96x32xf32> to vector<96x32xf32>
    %cst_199 = arith.constant dense<0.000000e+00> : vector<96x128xf32>
    %390 = tpu.matmul %389, %387, %cst_199 {dimension_numbers = #tpu.dot_dimension_numbers<[1], [0], [0], [1], [0, 0, 1, 1], [], []>} : vector<96x32xf32>, vector<32x128xf32>, vector<96x128xf32> -> vector<96x128xf32>
    %c2_i32_200 = arith.constant 2 : i32
    %391 = vector.broadcast %c2_i32_200 : i32 to vector<32x128xi32>
    %392 = arith.cmpi slt, %0, %391 : vector<32x128xi32>
    %393 = vector.extract_strided_slice %390 {offsets = [0, 0], sizes = [32, 128], strides = [1, 1]} : vector<96x128xf32> to vector<32x128xf32>
    %c2_i32_201 = arith.constant 2 : i32
    %394 = tpu.dynamic_rotate %393 by %c2_i32_201 dim 1 : vector<32x128xf32>, i32 -> vector<32x128xf32>
    %cst_202 = arith.constant 0.000000e+00 : f32
    %395 = vector.broadcast %cst_202 : f32 to vector<32x128xf32>
    %396 = arith.select %392, %395, %394 : vector<32x128xi1>, vector<32x128xf32>
    %c126_i32_203 = arith.constant 126 : i32
    %397 = vector.broadcast %c126_i32_203 : i32 to vector<32x128xi32>
    %398 = arith.cmpi sge, %0, %397 : vector<32x128xi32>
    %399 = vector.extract_strided_slice %390 {offsets = [64, 0], sizes = [32, 128], strides = [1, 1]} : vector<96x128xf32> to vector<32x128xf32>
    %c126_i32_204 = arith.constant 126 : i32
    %400 = tpu.dynamic_rotate %399 by %c126_i32_204 dim 1 : vector<32x128xf32>, i32 -> vector<32x128xf32>
    %cst_205 = arith.constant 0.000000e+00 : f32
    %401 = vector.broadcast %cst_205 : f32 to vector<32x128xf32>
    %402 = arith.select %398, %401, %400 : vector<32x128xi1>, vector<32x128xf32>
    %403 = vector.extract_strided_slice %390 {offsets = [32, 0], sizes = [32, 128], strides = [1, 1]} : vector<96x128xf32> to vector<32x128xf32>
    %404 = arith.addf %396, %403 : vector<32x128xf32>
    %405 = arith.addf %404, %402 : vector<32x128xf32>
    %c2_206 = arith.constant 2 : index
    %c0_207 = arith.constant 0 : index
    %c0_208 = arith.constant 0 : index
    %406 = vector.load %arg5[%c2_206, %c0_207, %c0_208] : memref<5x32x1xf32, #tpu.memory_space<vmem>>, vector<1x32x1xf32>
    %407 = vector.shape_cast %406 : vector<1x32x1xf32> to vector<32x1xf32>
    %408 = vector.broadcast %407 : vector<32x1xf32> to vector<32x128xf32>
    %409 = arith.addf %405, %408 : vector<32x128xf32>
    %c3_209 = arith.constant 3 : index
    %c0_210 = arith.constant 0 : index
    %c0_211 = arith.constant 0 : index
    %410 = vector.load %arg4[%c3_209, %c0_210, %c0_211] : memref<5x96x32xf32, #tpu.memory_space<vmem>>, vector<1x96x32xf32>
    %411 = vector.shape_cast %410 : vector<1x96x32xf32> to vector<96x32xf32>
    %cst_212 = arith.constant dense<0.000000e+00> : vector<96x128xf32>
    %412 = tpu.matmul %411, %409, %cst_212 {dimension_numbers = #tpu.dot_dimension_numbers<[1], [0], [0], [1], [0, 0, 1, 1], [], []>} : vector<96x32xf32>, vector<32x128xf32>, vector<96x128xf32> -> vector<96x128xf32>
    %c4_i32_213 = arith.constant 4 : i32
    %413 = vector.broadcast %c4_i32_213 : i32 to vector<32x128xi32>
    %414 = arith.cmpi slt, %0, %413 : vector<32x128xi32>
    %415 = vector.extract_strided_slice %412 {offsets = [0, 0], sizes = [32, 128], strides = [1, 1]} : vector<96x128xf32> to vector<32x128xf32>
    %c4_i32_214 = arith.constant 4 : i32
    %416 = tpu.dynamic_rotate %415 by %c4_i32_214 dim 1 : vector<32x128xf32>, i32 -> vector<32x128xf32>
    %cst_215 = arith.constant 0.000000e+00 : f32
    %417 = vector.broadcast %cst_215 : f32 to vector<32x128xf32>
    %418 = arith.select %414, %417, %416 : vector<32x128xi1>, vector<32x128xf32>
    %c124_i32_216 = arith.constant 124 : i32
    %419 = vector.broadcast %c124_i32_216 : i32 to vector<32x128xi32>
    %420 = arith.cmpi sge, %0, %419 : vector<32x128xi32>
    %421 = vector.extract_strided_slice %412 {offsets = [64, 0], sizes = [32, 128], strides = [1, 1]} : vector<96x128xf32> to vector<32x128xf32>
    %c124_i32_217 = arith.constant 124 : i32
    %422 = tpu.dynamic_rotate %421 by %c124_i32_217 dim 1 : vector<32x128xf32>, i32 -> vector<32x128xf32>
    %cst_218 = arith.constant 0.000000e+00 : f32
    %423 = vector.broadcast %cst_218 : f32 to vector<32x128xf32>
    %424 = arith.select %420, %423, %422 : vector<32x128xi1>, vector<32x128xf32>
    %425 = vector.extract_strided_slice %412 {offsets = [32, 0], sizes = [32, 128], strides = [1, 1]} : vector<96x128xf32> to vector<32x128xf32>
    %426 = arith.addf %418, %425 : vector<32x128xf32>
    %427 = arith.addf %426, %424 : vector<32x128xf32>
    %c3_219 = arith.constant 3 : index
    %c0_220 = arith.constant 0 : index
    %c0_221 = arith.constant 0 : index
    %428 = vector.load %arg5[%c3_219, %c0_220, %c0_221] : memref<5x32x1xf32, #tpu.memory_space<vmem>>, vector<1x32x1xf32>
    %429 = vector.shape_cast %428 : vector<1x32x1xf32> to vector<32x1xf32>
    %430 = vector.broadcast %429 : vector<32x1xf32> to vector<32x128xf32>
    %431 = arith.addf %427, %430 : vector<32x128xf32>
    %c4_222 = arith.constant 4 : index
    %c0_223 = arith.constant 0 : index
    %c0_224 = arith.constant 0 : index
    %432 = vector.load %arg4[%c4_222, %c0_223, %c0_224] : memref<5x96x32xf32, #tpu.memory_space<vmem>>, vector<1x96x32xf32>
    %433 = vector.shape_cast %432 : vector<1x96x32xf32> to vector<96x32xf32>
    %cst_225 = arith.constant dense<0.000000e+00> : vector<96x128xf32>
    %434 = tpu.matmul %433, %431, %cst_225 {dimension_numbers = #tpu.dot_dimension_numbers<[1], [0], [0], [1], [0, 0, 1, 1], [], []>} : vector<96x32xf32>, vector<32x128xf32>, vector<96x128xf32> -> vector<96x128xf32>
    %c1_i32_226 = arith.constant 1 : i32
    %435 = vector.broadcast %c1_i32_226 : i32 to vector<32x128xi32>
    %436 = arith.cmpi slt, %0, %435 : vector<32x128xi32>
    %437 = vector.extract_strided_slice %434 {offsets = [0, 0], sizes = [32, 128], strides = [1, 1]} : vector<96x128xf32> to vector<32x128xf32>
    %c1_i32_227 = arith.constant 1 : i32
    %438 = tpu.dynamic_rotate %437 by %c1_i32_227 dim 1 : vector<32x128xf32>, i32 -> vector<32x128xf32>
    %cst_228 = arith.constant 0.000000e+00 : f32
    %439 = vector.broadcast %cst_228 : f32 to vector<32x128xf32>
    %440 = arith.select %436, %439, %438 : vector<32x128xi1>, vector<32x128xf32>
    %c127_i32_229 = arith.constant 127 : i32
    %441 = vector.broadcast %c127_i32_229 : i32 to vector<32x128xi32>
    %442 = arith.cmpi sge, %0, %441 : vector<32x128xi32>
    %443 = vector.extract_strided_slice %434 {offsets = [64, 0], sizes = [32, 128], strides = [1, 1]} : vector<96x128xf32> to vector<32x128xf32>
    %c127_i32_230 = arith.constant 127 : i32
    %444 = tpu.dynamic_rotate %443 by %c127_i32_230 dim 1 : vector<32x128xf32>, i32 -> vector<32x128xf32>
    %cst_231 = arith.constant 0.000000e+00 : f32
    %445 = vector.broadcast %cst_231 : f32 to vector<32x128xf32>
    %446 = arith.select %442, %445, %444 : vector<32x128xi1>, vector<32x128xf32>
    %447 = vector.extract_strided_slice %434 {offsets = [32, 0], sizes = [32, 128], strides = [1, 1]} : vector<96x128xf32> to vector<32x128xf32>
    %448 = arith.addf %440, %447 : vector<32x128xf32>
    %449 = arith.addf %448, %446 : vector<32x128xf32>
    %c4_232 = arith.constant 4 : index
    %c0_233 = arith.constant 0 : index
    %c0_234 = arith.constant 0 : index
    %450 = vector.load %arg5[%c4_232, %c0_233, %c0_234] : memref<5x32x1xf32, #tpu.memory_space<vmem>>, vector<1x32x1xf32>
    %451 = vector.shape_cast %450 : vector<1x32x1xf32> to vector<32x1xf32>
    %452 = vector.broadcast %451 : vector<32x1xf32> to vector<32x128xf32>
    %453 = arith.addf %449, %452 : vector<32x128xf32>
    %c0_235 = arith.constant 0 : index
    %c0_236 = arith.constant 0 : index
    %c0_237 = arith.constant 0 : index
    %454 = vector.load %arg4[%c0_235, %c0_236, %c0_237] : memref<5x96x32xf32, #tpu.memory_space<vmem>>, vector<1x96x32xf32>
    %455 = vector.shape_cast %454 : vector<1x96x32xf32> to vector<96x32xf32>
    %cst_238 = arith.constant dense<0.000000e+00> : vector<96x128xf32>
    %456 = tpu.matmul %455, %453, %cst_238 {dimension_numbers = #tpu.dot_dimension_numbers<[1], [0], [0], [1], [0, 0, 1, 1], [], []>} : vector<96x32xf32>, vector<32x128xf32>, vector<96x128xf32> -> vector<96x128xf32>
    %c1_i32_239 = arith.constant 1 : i32
    %457 = vector.broadcast %c1_i32_239 : i32 to vector<32x128xi32>
    %458 = arith.cmpi slt, %0, %457 : vector<32x128xi32>
    %459 = vector.extract_strided_slice %456 {offsets = [0, 0], sizes = [32, 128], strides = [1, 1]} : vector<96x128xf32> to vector<32x128xf32>
    %c1_i32_240 = arith.constant 1 : i32
    %460 = tpu.dynamic_rotate %459 by %c1_i32_240 dim 1 : vector<32x128xf32>, i32 -> vector<32x128xf32>
    %cst_241 = arith.constant 0.000000e+00 : f32
    %461 = vector.broadcast %cst_241 : f32 to vector<32x128xf32>
    %462 = arith.select %458, %461, %460 : vector<32x128xi1>, vector<32x128xf32>
    %c127_i32_242 = arith.constant 127 : i32
    %463 = vector.broadcast %c127_i32_242 : i32 to vector<32x128xi32>
    %464 = arith.cmpi sge, %0, %463 : vector<32x128xi32>
    %465 = vector.extract_strided_slice %456 {offsets = [64, 0], sizes = [32, 128], strides = [1, 1]} : vector<96x128xf32> to vector<32x128xf32>
    %c127_i32_243 = arith.constant 127 : i32
    %466 = tpu.dynamic_rotate %465 by %c127_i32_243 dim 1 : vector<32x128xf32>, i32 -> vector<32x128xf32>
    %cst_244 = arith.constant 0.000000e+00 : f32
    %467 = vector.broadcast %cst_244 : f32 to vector<32x128xf32>
    %468 = arith.select %464, %467, %466 : vector<32x128xi1>, vector<32x128xf32>
    %469 = vector.extract_strided_slice %456 {offsets = [32, 0], sizes = [32, 128], strides = [1, 1]} : vector<96x128xf32> to vector<32x128xf32>
    %470 = arith.addf %462, %469 : vector<32x128xf32>
    %471 = arith.addf %470, %468 : vector<32x128xf32>
    %c0_245 = arith.constant 0 : index
    %c0_246 = arith.constant 0 : index
    %c0_247 = arith.constant 0 : index
    %472 = vector.load %arg5[%c0_245, %c0_246, %c0_247] : memref<5x32x1xf32, #tpu.memory_space<vmem>>, vector<1x32x1xf32>
    %473 = vector.shape_cast %472 : vector<1x32x1xf32> to vector<32x1xf32>
    %474 = vector.broadcast %473 : vector<32x1xf32> to vector<32x128xf32>
    %475 = arith.addf %471, %474 : vector<32x128xf32>
    %cst_248 = arith.constant 0.000000e+00 : f32
    %476 = vector.broadcast %cst_248 : f32 to vector<32x128xf32>
    %477 = arith.subf %476, %475 : vector<32x128xf32>
    %478 = math.exp %477 : vector<32x128xf32>
    %cst_249 = arith.constant 1.000000e+00 : f32
    %479 = vector.broadcast %cst_249 : f32 to vector<32x128xf32>
    %480 = arith.addf %479, %478 : vector<32x128xf32>
    %481 = tpu.reciprocal %480 {approx = true} : vector<32x128xf32> -> vector<32x128xf32>
    %cst_250 = arith.constant dense<0.000000e+00> : vector<32xf32>
    %482 = vector.multi_reduction <add>, %481, %cst_250 [1] : vector<32x128xf32> to vector<32xf32>
    %483 = vector.shape_cast %482 : vector<32xf32> to vector<32x1xf32>
    %cst_251 = arith.constant 1.280000e+02 : f32
    %484 = vector.broadcast %cst_251 : f32 to vector<32x1xf32>
    %485 = arith.divf %483, %484 : vector<32x1xf32>
    %486 = vector.broadcast %485 : vector<32x1xf32> to vector<32x128xf32>
    %487 = arith.subf %481, %486 : vector<32x128xf32>
    %488 = arith.mulf %487, %487 : vector<32x128xf32>
    %cst_252 = arith.constant dense<0.000000e+00> : vector<32xf32>
    %489 = vector.multi_reduction <add>, %488, %cst_252 [1] : vector<32x128xf32> to vector<32xf32>
    %490 = vector.shape_cast %489 : vector<32xf32> to vector<32x1xf32>
    %cst_253 = arith.constant 0.00787401571 : f32
    %491 = vector.broadcast %cst_253 : f32 to vector<32x1xf32>
    %492 = arith.mulf %490, %491 : vector<32x1xf32>
    %493 = math.sqrt %492 : vector<32x1xf32>
    %cst_254 = arith.constant 9.99999997E-7 : f32
    %494 = vector.broadcast %cst_254 : f32 to vector<32x1xf32>
    %495 = arith.addf %493, %494 : vector<32x1xf32>
    %496 = tpu.reciprocal %495 {approx = true} : vector<32x1xf32> -> vector<32x1xf32>
    %c0_255 = arith.constant 0 : index
    %c0_256 = arith.constant 0 : index
    %497 = vector.load %arg6[%c0_255, %c0_256] : memref<1x128xf32, #tpu.memory_space<vmem>>, vector<1x128xf32>
    %498 = vector.broadcast %496 : vector<32x1xf32> to vector<32x128xf32>
    %499 = arith.mulf %487, %498 : vector<32x128xf32>
    %500 = vector.broadcast %497 : vector<1x128xf32> to vector<32x128xf32>
    %501 = arith.mulf %500, %499 : vector<32x128xf32>
    %c0_257 = arith.constant 0 : index
    %c0_258 = arith.constant 0 : index
    %502 = vector.load %arg7[%c0_257, %c0_258] : memref<1x128xf32, #tpu.memory_space<vmem>>, vector<1x128xf32>
    %503 = vector.broadcast %502 : vector<1x128xf32> to vector<32x128xf32>
    %504 = arith.addf %501, %503 : vector<32x128xf32>
    %c1_259 = arith.constant 1 : index
    %c0_260 = arith.constant 0 : index
    %c0_261 = arith.constant 0 : index
    %505 = vector.load %arg4[%c1_259, %c0_260, %c0_261] : memref<5x96x32xf32, #tpu.memory_space<vmem>>, vector<1x96x32xf32>
    %506 = vector.shape_cast %505 : vector<1x96x32xf32> to vector<96x32xf32>
    %cst_262 = arith.constant dense<0.000000e+00> : vector<96x128xf32>
    %507 = tpu.matmul %506, %504, %cst_262 {dimension_numbers = #tpu.dot_dimension_numbers<[1], [0], [0], [1], [0, 0, 1, 1], [], []>} : vector<96x32xf32>, vector<32x128xf32>, vector<96x128xf32> -> vector<96x128xf32>
    %c1_i32_263 = arith.constant 1 : i32
    %508 = vector.broadcast %c1_i32_263 : i32 to vector<32x128xi32>
    %509 = arith.cmpi slt, %0, %508 : vector<32x128xi32>
    %510 = vector.extract_strided_slice %507 {offsets = [0, 0], sizes = [32, 128], strides = [1, 1]} : vector<96x128xf32> to vector<32x128xf32>
    %c1_i32_264 = arith.constant 1 : i32
    %511 = tpu.dynamic_rotate %510 by %c1_i32_264 dim 1 : vector<32x128xf32>, i32 -> vector<32x128xf32>
    %cst_265 = arith.constant 0.000000e+00 : f32
    %512 = vector.broadcast %cst_265 : f32 to vector<32x128xf32>
    %513 = arith.select %509, %512, %511 : vector<32x128xi1>, vector<32x128xf32>
    %c127_i32_266 = arith.constant 127 : i32
    %514 = vector.broadcast %c127_i32_266 : i32 to vector<32x128xi32>
    %515 = arith.cmpi sge, %0, %514 : vector<32x128xi32>
    %516 = vector.extract_strided_slice %507 {offsets = [64, 0], sizes = [32, 128], strides = [1, 1]} : vector<96x128xf32> to vector<32x128xf32>
    %c127_i32_267 = arith.constant 127 : i32
    %517 = tpu.dynamic_rotate %516 by %c127_i32_267 dim 1 : vector<32x128xf32>, i32 -> vector<32x128xf32>
    %cst_268 = arith.constant 0.000000e+00 : f32
    %518 = vector.broadcast %cst_268 : f32 to vector<32x128xf32>
    %519 = arith.select %515, %518, %517 : vector<32x128xi1>, vector<32x128xf32>
    %520 = vector.extract_strided_slice %507 {offsets = [32, 0], sizes = [32, 128], strides = [1, 1]} : vector<96x128xf32> to vector<32x128xf32>
    %521 = arith.addf %513, %520 : vector<32x128xf32>
    %522 = arith.addf %521, %519 : vector<32x128xf32>
    %c1_269 = arith.constant 1 : index
    %c0_270 = arith.constant 0 : index
    %c0_271 = arith.constant 0 : index
    %523 = vector.load %arg5[%c1_269, %c0_270, %c0_271] : memref<5x32x1xf32, #tpu.memory_space<vmem>>, vector<1x32x1xf32>
    %524 = vector.shape_cast %523 : vector<1x32x1xf32> to vector<32x1xf32>
    %525 = vector.broadcast %524 : vector<32x1xf32> to vector<32x128xf32>
    %526 = arith.addf %522, %525 : vector<32x128xf32>
    %c2_272 = arith.constant 2 : index
    %c0_273 = arith.constant 0 : index
    %c0_274 = arith.constant 0 : index
    %527 = vector.load %arg4[%c2_272, %c0_273, %c0_274] : memref<5x96x32xf32, #tpu.memory_space<vmem>>, vector<1x96x32xf32>
    %528 = vector.shape_cast %527 : vector<1x96x32xf32> to vector<96x32xf32>
    %cst_275 = arith.constant dense<0.000000e+00> : vector<96x128xf32>
    %529 = tpu.matmul %528, %526, %cst_275 {dimension_numbers = #tpu.dot_dimension_numbers<[1], [0], [0], [1], [0, 0, 1, 1], [], []>} : vector<96x32xf32>, vector<32x128xf32>, vector<96x128xf32> -> vector<96x128xf32>
    %c2_i32_276 = arith.constant 2 : i32
    %530 = vector.broadcast %c2_i32_276 : i32 to vector<32x128xi32>
    %531 = arith.cmpi slt, %0, %530 : vector<32x128xi32>
    %532 = vector.extract_strided_slice %529 {offsets = [0, 0], sizes = [32, 128], strides = [1, 1]} : vector<96x128xf32> to vector<32x128xf32>
    %c2_i32_277 = arith.constant 2 : i32
    %533 = tpu.dynamic_rotate %532 by %c2_i32_277 dim 1 : vector<32x128xf32>, i32 -> vector<32x128xf32>
    %cst_278 = arith.constant 0.000000e+00 : f32
    %534 = vector.broadcast %cst_278 : f32 to vector<32x128xf32>
    %535 = arith.select %531, %534, %533 : vector<32x128xi1>, vector<32x128xf32>
    %c126_i32_279 = arith.constant 126 : i32
    %536 = vector.broadcast %c126_i32_279 : i32 to vector<32x128xi32>
    %537 = arith.cmpi sge, %0, %536 : vector<32x128xi32>
    %538 = vector.extract_strided_slice %529 {offsets = [64, 0], sizes = [32, 128], strides = [1, 1]} : vector<96x128xf32> to vector<32x128xf32>
    %c126_i32_280 = arith.constant 126 : i32
    %539 = tpu.dynamic_rotate %538 by %c126_i32_280 dim 1 : vector<32x128xf32>, i32 -> vector<32x128xf32>
    %cst_281 = arith.constant 0.000000e+00 : f32
    %540 = vector.broadcast %cst_281 : f32 to vector<32x128xf32>
    %541 = arith.select %537, %540, %539 : vector<32x128xi1>, vector<32x128xf32>
    %542 = vector.extract_strided_slice %529 {offsets = [32, 0], sizes = [32, 128], strides = [1, 1]} : vector<96x128xf32> to vector<32x128xf32>
    %543 = arith.addf %535, %542 : vector<32x128xf32>
    %544 = arith.addf %543, %541 : vector<32x128xf32>
    %c2_282 = arith.constant 2 : index
    %c0_283 = arith.constant 0 : index
    %c0_284 = arith.constant 0 : index
    %545 = vector.load %arg5[%c2_282, %c0_283, %c0_284] : memref<5x32x1xf32, #tpu.memory_space<vmem>>, vector<1x32x1xf32>
    %546 = vector.shape_cast %545 : vector<1x32x1xf32> to vector<32x1xf32>
    %547 = vector.broadcast %546 : vector<32x1xf32> to vector<32x128xf32>
    %548 = arith.addf %544, %547 : vector<32x128xf32>
    %c3_285 = arith.constant 3 : index
    %c0_286 = arith.constant 0 : index
    %c0_287 = arith.constant 0 : index
    %549 = vector.load %arg4[%c3_285, %c0_286, %c0_287] : memref<5x96x32xf32, #tpu.memory_space<vmem>>, vector<1x96x32xf32>
    %550 = vector.shape_cast %549 : vector<1x96x32xf32> to vector<96x32xf32>
    %cst_288 = arith.constant dense<0.000000e+00> : vector<96x128xf32>
    %551 = tpu.matmul %550, %548, %cst_288 {dimension_numbers = #tpu.dot_dimension_numbers<[1], [0], [0], [1], [0, 0, 1, 1], [], []>} : vector<96x32xf32>, vector<32x128xf32>, vector<96x128xf32> -> vector<96x128xf32>
    %c4_i32_289 = arith.constant 4 : i32
    %552 = vector.broadcast %c4_i32_289 : i32 to vector<32x128xi32>
    %553 = arith.cmpi slt, %0, %552 : vector<32x128xi32>
    %554 = vector.extract_strided_slice %551 {offsets = [0, 0], sizes = [32, 128], strides = [1, 1]} : vector<96x128xf32> to vector<32x128xf32>
    %c4_i32_290 = arith.constant 4 : i32
    %555 = tpu.dynamic_rotate %554 by %c4_i32_290 dim 1 : vector<32x128xf32>, i32 -> vector<32x128xf32>
    %cst_291 = arith.constant 0.000000e+00 : f32
    %556 = vector.broadcast %cst_291 : f32 to vector<32x128xf32>
    %557 = arith.select %553, %556, %555 : vector<32x128xi1>, vector<32x128xf32>
    %c124_i32_292 = arith.constant 124 : i32
    %558 = vector.broadcast %c124_i32_292 : i32 to vector<32x128xi32>
    %559 = arith.cmpi sge, %0, %558 : vector<32x128xi32>
    %560 = vector.extract_strided_slice %551 {offsets = [64, 0], sizes = [32, 128], strides = [1, 1]} : vector<96x128xf32> to vector<32x128xf32>
    %c124_i32_293 = arith.constant 124 : i32
    %561 = tpu.dynamic_rotate %560 by %c124_i32_293 dim 1 : vector<32x128xf32>, i32 -> vector<32x128xf32>
    %cst_294 = arith.constant 0.000000e+00 : f32
    %562 = vector.broadcast %cst_294 : f32 to vector<32x128xf32>
    %563 = arith.select %559, %562, %561 : vector<32x128xi1>, vector<32x128xf32>
    %564 = vector.extract_strided_slice %551 {offsets = [32, 0], sizes = [32, 128], strides = [1, 1]} : vector<96x128xf32> to vector<32x128xf32>
    %565 = arith.addf %557, %564 : vector<32x128xf32>
    %566 = arith.addf %565, %563 : vector<32x128xf32>
    %c3_295 = arith.constant 3 : index
    %c0_296 = arith.constant 0 : index
    %c0_297 = arith.constant 0 : index
    %567 = vector.load %arg5[%c3_295, %c0_296, %c0_297] : memref<5x32x1xf32, #tpu.memory_space<vmem>>, vector<1x32x1xf32>
    %568 = vector.shape_cast %567 : vector<1x32x1xf32> to vector<32x1xf32>
    %569 = vector.broadcast %568 : vector<32x1xf32> to vector<32x128xf32>
    %570 = arith.addf %566, %569 : vector<32x128xf32>
    %c4_298 = arith.constant 4 : index
    %c0_299 = arith.constant 0 : index
    %c0_300 = arith.constant 0 : index
    %571 = vector.load %arg4[%c4_298, %c0_299, %c0_300] : memref<5x96x32xf32, #tpu.memory_space<vmem>>, vector<1x96x32xf32>
    %572 = vector.shape_cast %571 : vector<1x96x32xf32> to vector<96x32xf32>
    %cst_301 = arith.constant dense<0.000000e+00> : vector<96x128xf32>
    %573 = tpu.matmul %572, %570, %cst_301 {dimension_numbers = #tpu.dot_dimension_numbers<[1], [0], [0], [1], [0, 0, 1, 1], [], []>} : vector<96x32xf32>, vector<32x128xf32>, vector<96x128xf32> -> vector<96x128xf32>
    %c1_i32_302 = arith.constant 1 : i32
    %574 = vector.broadcast %c1_i32_302 : i32 to vector<32x128xi32>
    %575 = arith.cmpi slt, %0, %574 : vector<32x128xi32>
    %576 = vector.extract_strided_slice %573 {offsets = [0, 0], sizes = [32, 128], strides = [1, 1]} : vector<96x128xf32> to vector<32x128xf32>
    %c1_i32_303 = arith.constant 1 : i32
    %577 = tpu.dynamic_rotate %576 by %c1_i32_303 dim 1 : vector<32x128xf32>, i32 -> vector<32x128xf32>
    %cst_304 = arith.constant 0.000000e+00 : f32
    %578 = vector.broadcast %cst_304 : f32 to vector<32x128xf32>
    %579 = arith.select %575, %578, %577 : vector<32x128xi1>, vector<32x128xf32>
    %c127_i32_305 = arith.constant 127 : i32
    %580 = vector.broadcast %c127_i32_305 : i32 to vector<32x128xi32>
    %581 = arith.cmpi sge, %0, %580 : vector<32x128xi32>
    %582 = vector.extract_strided_slice %573 {offsets = [64, 0], sizes = [32, 128], strides = [1, 1]} : vector<96x128xf32> to vector<32x128xf32>
    %c127_i32_306 = arith.constant 127 : i32
    %583 = tpu.dynamic_rotate %582 by %c127_i32_306 dim 1 : vector<32x128xf32>, i32 -> vector<32x128xf32>
    %cst_307 = arith.constant 0.000000e+00 : f32
    %584 = vector.broadcast %cst_307 : f32 to vector<32x128xf32>
    %585 = arith.select %581, %584, %583 : vector<32x128xi1>, vector<32x128xf32>
    %586 = vector.extract_strided_slice %573 {offsets = [32, 0], sizes = [32, 128], strides = [1, 1]} : vector<96x128xf32> to vector<32x128xf32>
    %587 = arith.addf %579, %586 : vector<32x128xf32>
    %588 = arith.addf %587, %585 : vector<32x128xf32>
    %c4_308 = arith.constant 4 : index
    %c0_309 = arith.constant 0 : index
    %c0_310 = arith.constant 0 : index
    %589 = vector.load %arg5[%c4_308, %c0_309, %c0_310] : memref<5x32x1xf32, #tpu.memory_space<vmem>>, vector<1x32x1xf32>
    %590 = vector.shape_cast %589 : vector<1x32x1xf32> to vector<32x1xf32>
    %591 = vector.broadcast %590 : vector<32x1xf32> to vector<32x128xf32>
    %592 = arith.addf %588, %591 : vector<32x128xf32>
    %c0_311 = arith.constant 0 : index
    %c0_312 = arith.constant 0 : index
    %c0_313 = arith.constant 0 : index
    %593 = vector.load %arg10[%c0_311, %c0_312, %c0_313] : memref<1x32x128xf32, #tpu.memory_space<vmem>>, vector<1x32x128xf32>
    %594 = vector.shape_cast %593 : vector<1x32x128xf32> to vector<32x128xf32>
    %cst_314 = arith.constant 1.000000e+00 : f32
    %595 = vector.broadcast %cst_314 : f32 to vector<32x128xf32>
    %596 = arith.addf %595, %594 : vector<32x128xf32>
    %597 = arith.mulf %592, %596 : vector<32x128xf32>
    %cst_315 = arith.constant 0.000000e+00 : f32
    %598 = vector.broadcast %cst_315 : f32 to vector<32x128xf32>
    %599 = arith.subf %598, %597 : vector<32x128xf32>
    %600 = math.exp %599 : vector<32x128xf32>
    %cst_316 = arith.constant 1.000000e+00 : f32
    %601 = vector.broadcast %cst_316 : f32 to vector<32x128xf32>
    %602 = arith.addf %601, %600 : vector<32x128xf32>
    %603 = tpu.reciprocal %602 {approx = true} : vector<32x128xf32> -> vector<32x128xf32>
    %604 = arith.addf %7, %592 : vector<32x128xf32>
    %605 = arith.mulf %604, %603 : vector<32x128xf32>
    %c0_317 = arith.constant 0 : index
    %c0_318 = arith.constant 0 : index
    %c0_319 = arith.constant 0 : index
    %606 = vector.load %arg11[%c0_317, %c0_318, %c0_319] : memref<1x32x128xf32, #tpu.memory_space<vmem>>, vector<1x32x128xf32>
    %607 = vector.shape_cast %606 : vector<1x32x128xf32> to vector<32x128xf32>
    %608 = vector.shape_cast %605 : vector<32x128xf32> to vector<1x32x128xf32>
    tpu.vector_store %arg11[%c0_317, %c0_318, %c0_319], %608 {strides = array<i32>} : memref<1x32x128xf32, #tpu.memory_space<vmem>>, vector<1x32x128xf32>,
    return
  }
  func.func @transform_0(%arg0: i32) -> (i32, i32, i32) {
    %c0_i32 = arith.constant 0 : i32
    %c0_i32_0 = arith.constant 0 : i32
    %c0_i32_1 = arith.constant 0 : i32
    return %arg0, %c0_i32, %c0_i32_0 : i32, i32, i32
  }
  func.func @transform_1(%arg0: i32) -> (i32, i32) {
    %c0_i32 = arith.constant 0 : i32
    %c0_i32_0 = arith.constant 0 : i32
    %c0_i32_1 = arith.constant 0 : i32
    return %c0_i32, %c0_i32_0 : i32, i32
  }
  func.func @transform_2(%arg0: i32) -> (i32, i32) {
    %c0_i32 = arith.constant 0 : i32
    %c0_i32_0 = arith.constant 0 : i32
    %c0_i32_1 = arith.constant 0 : i32
    return %c0_i32, %c0_i32_0 : i32, i32
  }
  func.func @transform_3(%arg0: i32) -> (i32, i32, i32) {
    %c0_i32 = arith.constant 0 : i32
    %c0_i32_0 = arith.constant 0 : i32
    %c0_i32_1 = arith.constant 0 : i32
    %c0_i32_2 = arith.constant 0 : i32
    return %c0_i32, %c0_i32_0, %c0_i32_1 : i32, i32, i32
  }
  func.func @transform_4(%arg0: i32) -> (i32, i32, i32) {
    %c0_i32 = arith.constant 0 : i32
    %c0_i32_0 = arith.constant 0 : i32
    %c0_i32_1 = arith.constant 0 : i32
    %c0_i32_2 = arith.constant 0 : i32
    return %c0_i32, %c0_i32_0, %c0_i32_1 : i32, i32, i32
  }
  func.func @transform_5(%arg0: i32) -> (i32, i32) {
    %c0_i32 = arith.constant 0 : i32
    %c0_i32_0 = arith.constant 0 : i32
    %c0_i32_1 = arith.constant 0 : i32
    return %c0_i32, %c0_i32_0 : i32, i32
  }
  func.func @transform_6(%arg0: i32) -> (i32, i32) {
    %c0_i32 = arith.constant 0 : i32
    %c0_i32_0 = arith.constant 0 : i32
    %c0_i32_1 = arith.constant 0 : i32
    return %c0_i32, %c0_i32_0 : i32, i32
  }
  func.func @transform_7(%arg0: i32) -> (i32, i32) {
    %c0_i32 = arith.constant 0 : i32
    %c0_i32_0 = arith.constant 0 : i32
    %c0_i32_1 = arith.constant 0 : i32
    return %c0_i32, %c0_i32_0 : i32, i32
  }
  func.func @transform_8(%arg0: i32) -> (i32, i32) {
    %c0_i32 = arith.constant 0 : i32
    %c0_i32_0 = arith.constant 0 : i32
    %c0_i32_1 = arith.constant 0 : i32
    return %c0_i32, %c0_i32_0 : i32, i32
  }
  func.func @transform_9(%arg0: i32) -> (i32, i32, i32) {
    %c0_i32 = arith.constant 0 : i32
    %c0_i32_0 = arith.constant 0 : i32
    %c0_i32_1 = arith.constant 0 : i32
    return %arg0, %c0_i32, %c0_i32_0 : i32, i32, i32
  }
  func.func @transform_10(%arg0: i32) -> (i32, i32, i32) {
    %c0_i32 = arith.constant 0 : i32
    %c0_i32_0 = arith.constant 0 : i32
    %c0_i32_1 = arith.constant 0 : i32
    return %arg0, %c0_i32, %c0_i32_0 : i32, i32, i32
  }
}

</mosaic_0001>

<bundles_post_ra>
// kernel: idcnn_forward.1
= control target key start
LH: loop header
LB: loop body
LE: loop exit
PB: predicated region body
PF: predicated region fallthrough
CT: control target
= control target key end

     0   :  { %s8415_s0 = inlined_call_operand.vmem [shape: f32[2,16,128], index: 0, kind: input, shape index: {}]   ;;  %s8416_s1 = inlined_call_operand.vmem [shape: f32[32,16], index: 1, kind: input, shape index: {}]   ;;  %s8417_s2 = inlined_call_operand.vmem [shape: f32[32,1], index: 2, kind: input, shape index: {}]   ;;  %s8418_s3 = inlined_call_operand.vmem [shape: f32[5,96,32], index: 3, kind: input, shape index: {}]   ;;  %s8419_s4 = inlined_call_operand.vmem [shape: f32[5,32,1], index: 4, kind: input, shape index: {}]   ;;  %s8420_s5 = inlined_call_operand.vmem [shape: f32[1,128], index: 5, kind: input, shape index: {}]   ;;  %s8421_s6 = inlined_call_operand.vmem [shape: f32[1,128], index: 6, kind: input, shape index: {}]   ;;  %s8422_s7 = inlined_call_operand.vmem [shape: f32[1,128], index: 7, kind: input, shape index: {}]   ;;  %s8423_s8 = inlined_call_operand.vmem [shape: f32[1,128], index: 8, kind: input, shape index: {}]   ;;  %s8424_s9 = inlined_call_operand.vmem [shape: f32[2,32,128], index: 9, kind: input, shape index: {}]   ;;  %s8425_s10 = inlined_call_operand.hbm [shape: f32[2,32,128], index: 10, kind: output, shape index: {}]  }
   0x1   :  { %8479 = sst [smem:[#allocation46_spill]] %s8415_s0 }
   0x2   :  { %8480 = sst [smem:[#allocation47_spill]] %s8416_s1 }
   0x3   :  { %8481 = sst [smem:[#allocation48_spill]] %s8417_s2 }
   0x4   :  { %8482 = sst [smem:[#allocation49_spill]] %s8419_s4 }
   0x5   :  { %15 = vsyncpa [#allocation3], 0 }
   0x6   :  { %17 = vsyncpa [#allocation3 + $0x1], 0  ;;  %s6423_s13 = smov 0   ;;  %s6425_s14 = smov 0  }
   0x7   :  { %s6427_s15 = smov 0   ;;  %s6429_s16 = smov 0  }
   0x8 LB: > { %s6444_s17 = sadd.s32 4294967295, %s6356_s16   ;;  %s4764_s18 = sadd.s32 4294967294, %s6356_s16   ;;  %s6356_s16 = sphi %s6429_s16, %s8580_s16   ;;  %s6352_s15 = sphi %s6427_s15, %s8579_s15   ;;  %s6348_s14 = sphi %s6425_s14, %s8578_s14   ;;  %s6344_s13 = sphi %s6423_s13, %s8577_s13  }
   0x9   : > { %s6448_s19 = sadd.s32 1, %s6356_s16   ;;  %s250_s20 = sadd.s32 1, %s6352_s15 }
   0xa   : > { %s247_s21 = ssub.s32 %s6356_s16, %s6448_s19  ;;  %p260_p0 = scmp.ne.s32.totalorder %s6352_s15, %s6348_s14 }
   0xb   : > { %p248_p1 = scmp.eq.s32.totalorder %s247_s21, 0  ;;  %p261_p2 = scmp.eq.s32.totalorder %s6444_s17, 1 }
   0xc   : > { %p266_p3 = scmp.ne.s32.totalorder %s6348_s14, %s6344_s13  ;;  %p267_p4 = scmp.eq.s32.totalorder %s4764_s18, 1 }
   0xd   : > { %s6459_s22 = scalar_select %p248_p1, %s6352_s15, %s250_s20  }
   0xe   : > { %p6461_p5 = por %p261_p2, %p260_p0  ;;  %p6465_p6 = por %p267_p4, %p266_p3 }
   0xf   : > { %p4767_p7 = scmp.ge.s32.totalorder %s6356_s16, 1  ;;  %p325_p8 = scmp.lt.s32.totalorder %s6356_s16, 3 }
  0x11   : > { %p326_p9 = pnand %p4767_p7, %p325_p8 }
  0x13   : > { %329 = sbr.rel (%p326_p9) target bundleno = 8987 (0x231b), region = 60 }
  0x18   : > { %p368_p10 = scmp.lt.s32.totalorder %s6444_s17, 1  ;;  %s8485_s1 = sld [smem:[#allocation47_spill]]  ;;  %vm410_vm0 = vcmask 130048   ;;  %v6358_v1 = vmov 0   ;;  %v6519_v14 = vld [vmem:[%s8418_s3] sm:$0xff]  ;;  %vm520_vm1 = vcmask 261120   ;;  %v378_v54 = vlaneseq }
  0x19   : > { %5998 = vset.pattern.permute.xlu1 %v6358_v1  ;;  %s8486_s2 = sld [smem:[#allocation48_spill]]  ;;  %5997 = vset.pattern.permute.xlu0 %v6358_v1  ;;  %v509_v27 = vld [vmem:[%s8418_s3 + $0x8] sm:$0xff]  ;;  %v510_v28 = vld [vmem:[%s8418_s3 + $0x10] sm:$0xff]  ;;  %v511_v29 = vld [vmem:[%s8418_s3 + $0x18] sm:$0xff]  ;;  %s8428_s26 = smov 127  }
  0x1a   : > { %s6483_s11 = scalar_select %p368_p10, %s6444_s17, 1  ;;  %5437 = vmatprep.mubr.msk.f32.mxu1 %vm520_vm1, %v6519_v14  ;;  %v512_v30 = vld [vmem:[%s8418_s3 + $0x20] sm:$0xff]  ;;  %v513_v31 = vld [vmem:[%s8418_s3 + $0x28] sm:$0xff]  ;;  %v514_v32 = vld [vmem:[%s8418_s3 + $0x30] sm:$0xff]  ;;  %v6600_v57 = vand.u32 127, %v378_v54 }
  0x1b   : > { %s8487_s0 = sld [smem:[#allocation46_spill]]  ;;  %v515_v33 = vld [vmem:[%s8418_s3 + $0x38] sm:$0xff]  ;;  %v516_v34 = vld [vmem:[%s8418_s3 + $0x40] sm:$0xff]  ;;  %v517_v35 = vld [vmem:[%s8418_s3 + $0x48] sm:$0xff]  ;;  %s8426_s12 = smov 2  }
  0x1c   : > { %s5090_s20 = sshll.u32 %s6483_s11, 4  ;;  %s8488_s4 = sld [smem:[#allocation49_spill]]  ;;  %v518_v36 = vld [vmem:[%s8418_s3 + $0x50] sm:$0xff]  ;;  %v519_v37 = vld [vmem:[%s8418_s3 + $0x58] sm:$0xff]  ;;  %vm682_vm2 = vcmp.lt.s32.totalorder %v6600_v57, 1  ;;  %vm695_vm3 = vcmp.ge.s32.totalorder %v6600_v57, 127 }
  0x1d   : > { %s8432_s18 = smov 126   ;;  %vm1268_vm12 = vcmp.lt.s32.totalorder %v6600_v57, 2  ;;  %vm1281_vm13 = vcmp.ge.s32.totalorder %v6600_v57, 126  ;;  %s8430_s21 = smov 4   ;;  %vm1505_vm14 = vcmp.lt.s32.totalorder %v6600_v57, 4  ;;  %vm1518_vm15 = vcmp.ge.s32.totalorder %v6600_v57, 124 }
  0x1e   : > { %v380_v0 = vld [vmem:[%s8485_s1] sm:$0xff]  ;;  %v381_v9 = vld [vmem:[%s8485_s1 + $0x8] sm:$0xff]  ;;  %v382_v11 = vld [vmem:[%s8485_s1 + $0x10] sm:$0xff]  ;;  %s8465_s25 = smov 124   ;;  %s8507_s27 = smov 2  }
  0x1f   : > { %5423 = vmatprep.mubr.msk.f32.mxu0 %vm410_vm0, %v380_v0  ;;  %v389_v2 = vld [vmem:[%s8486_s2 + $0x18] sm:$0xff]  ;;  %v387_v3 = vld [vmem:[%s8486_s2 + $0x8] sm:$0xff]  ;;  %v386_v4 = vld [vmem:[%s8486_s2] sm:$0xff]  ;;  %s8521_s29 = smov 4   ;;  %s8534_s30 = smov 1  }
  0x20   : > { %397 = vperm.xlu1 %5998, %v387_v3   ;;  %407 = vperm.xlu0 %5997, %v389_v2   ;;  %v388_v5 = vld [vmem:[%s8486_s2 + $0x10] sm:$0xff]  ;;  %v383_v13 = vld [vmem:[%s8485_s1 + $0x18] sm:$0xff] }
  0x21   : > { %s372_s28 = scalar_lea.vmem %s8487_s0, %s5090_s20  ;;  %s8451_s20 = smov 1  }
  0x22   : > { %v385_v6 = vld [vmem:[%s372_s28 + $0x8] sm:$0xff]  ;;  %v384_v7 = vld [vmem:[%s372_s28] sm:$0xff]  ;;  %v719_v8 = vld [vmem:[%s8488_s4 + $0x18] sm:$0xff]  ;;  %s8508_s28 = smov 126  }
  0x23   : > { %5419 = vmatprep.subr.mxu0 %v385_v6  ;;  %v718_v10 = vld [vmem:[%s8488_s4 + $0x10] sm:$0xff]  ;;  %v717_v12 = vld [vmem:[%s8488_s4 + $0x8] sm:$0xff]  ;;  %v716_v50 = vld [vmem:[%s8488_s4] sm:$0xff] }
  0x24   : > { %392 = vperm.xlu1 %5998, %v386_v4   ;;  %402 = vperm.xlu0 %5997, %v388_v5  }
  0x25   : > { %5420 = vmatpush3.msra.mxu0 %v385_v6 }
  0x26   : > { %5421 = vmatprep.subr.mxu0 %v384_v7 }
  0x27   : > { %5422 = vmatpush3.msra.mxu0 %v384_v7 }
  0x28   : > { %737 = vperm.xlu1 %5998, %v719_v8   ;;  %5424 = vmatmul.mubr.msk.f32.vlgmr.msra.gmra.mxu0 %vm410_vm0, %v381_v9 }
  0x29   : > { %732 = vperm.xlu0 %5997, %v718_v10   ;;  %5426 = vmatprep.mubr.msk.f32.mxu0 %vm410_vm0, %v382_v11 }
  0x2c   : > { %727 = vperm.xlu1 %5998, %v717_v12   ;;  %5427 = vmatmul.mubr.msk.f32.gmra.mxu0 %vm410_vm0, %v383_v13 }
  0x9b   : > { %v408_v15 = vpop.permute.xlu0 %407  ;;  %v398_v18 = vpop.permute.xlu1 %397 }
  0x9f   : > { %v403_v21 = vpop.permute.xlu0 %402  ;;  %v393_v25 = vpop.permute.xlu1 %392 }
  0xa3   : > { %v6596_v53 = vpop.permute.xlu1 %737 }
  0xa4   : > { %v6594_v51 = vpop.permute.xlu0 %732 }
  0xa7   : > { %v6598_v56 = vpop.permute.xlu1 %727 }
  0xe8   : > { %v5425_v16 = vpop.f32.mrf.mxu0 }
  0xe9   : > { %v6529_v24 = vadd.f32 %v5425_v16, %v398_v18 }
  0xea   : > { %v489_v17 = vpop.f32.mrf.mxu0 }
  0xeb   : > { %8491 = vst [vmem:[#allocation7_spill] sm:$0xff] %v6529_v24  ;;  %v6533_v26 = vadd.f32 %v489_v17, %v393_v25 }
  0xec   : > { %v5428_v19 = vpop.f32.mrf.mxu0 }
  0xed   : > { %v6523_v20 = vadd.f32 %v5428_v19, %v408_v15  ;;  %8492 = vst [vmem:[#allocation8_spill] sm:$0xff] %v6533_v26 }
  0xee   : > { %v499_v22 = vpop.f32.mrf.mxu0 }
  0xef   : > { %8489 = vst [vmem:[#allocation5_spill] sm:$0xff] %v6523_v20  ;;  %v6525_v23 = vadd.f32 %v499_v22, %v403_v21  ;;  %5429 = vmatprep.subr.mxu1 %v6523_v20 }
  0xf0   : > { %5430 = vmatpush3.msra.mxu1 %v6523_v20 }
  0xf1   : > { %8490 = vst [vmem:[#allocation6_spill] sm:$0xff] %v6525_v23  ;;  %5431 = vmatprep.subr.mxu1 %v6525_v23 }
  0xf2   : > { %5432 = vmatpush3.msra.mxu1 %v6525_v23 }
  0xf3   : > { %5433 = vmatprep.subr.mxu1 %v6529_v24 }
  0xf4   : > { %5434 = vmatpush3.msra.mxu1 %v6529_v24 }
  0xf5   : > { %5435 = vmatprep.subr.mxu1 %v6533_v26 }
  0xf6   : > { %5436 = vmatpush3.msra.mxu1 %v6533_v26 }
  0xf7   : > { %5438 = vmatmul.mubr.msk.f32.vlgmr.msra.gmra.mxu1 %vm520_vm1, %v509_v27 }
  0xf8   : > { %5440 = vmatprep.mubr.msk.f32.mxu1 %vm520_vm1, %v510_v28 }
  0xfb   : > { %5441 = vmatmul.mubr.msk.f32.gmra.mxu1 %vm520_vm1, %v511_v29 }
  0xfc   : > { %5443 = vmatprep.mubr.msk.f32.mxu1 %vm520_vm1, %v512_v30 }
  0xff   : > { %5444 = vmatmul.mubr.msk.f32.gmra.mxu1 %vm520_vm1, %v513_v31 }
 0x100   : > { %5446 = vmatprep.mubr.msk.f32.mxu1 %vm520_vm1, %v514_v32 }
 0x103   : > { %5447 = vmatmul.mubr.msk.f32.gmra.mxu1 %vm520_vm1, %v515_v33 }
 0x104   : > { %5449 = vmatprep.mubr.msk.f32.mxu1 %vm520_vm1, %v516_v34 }
 0x107   : > { %5450 = vmatmul.mubr.msk.f32.gmra.mxu1 %vm520_vm1, %v517_v35 }
 0x108   : > { %5452 = vmatprep.mubr.msk.f32.mxu1 %vm520_vm1, %v518_v36 }
 0x10b   : > { %5453 = vmatmul.mubr.msk.f32.gmra.mxu1 %vm520_vm1, %v519_v37 }
 0x1b7   : > { %v5439_v38 = vpop.f32.mrf.mxu1 }
 0x1b8   : > { %685 = vrot.lane.b32.xlu1 %v5439_v38, %s8451_s20 }
 0x1b9   : > { %v623_v39 = vpop.f32.mrf.mxu1 }
 0x1ba   : > { %683 = vrot.lane.b32.xlu0 %v623_v39, %s8451_s20 }
 0x1bb   : > { %v5442_v40 = vpop.f32.mrf.mxu1 }
 0x1bd   : > { %v633_v41 = vpop.f32.mrf.mxu1 }
 0x1be   : > { %689 = vrot.lane.b32.xlu0 %v5442_v40, %s8451_s20 }
 0x1bf   : > { %v5445_v42 = vpop.f32.mrf.mxu1 }
 0x1c1   : > { %v643_v43 = vpop.f32.mrf.mxu1 }
 0x1c2   : > { %687 = vrot.lane.b32.xlu0 %v633_v41, %s8451_s20 }
 0x1c3   : > { %v5448_v44 = vpop.f32.mrf.mxu1 }
 0x1c5   : > { %v653_v45 = vpop.f32.mrf.mxu1 }
 0x1c7   : > { %v5451_v46 = vpop.f32.mrf.mxu1 }
 0x1c9   : > { %v663_v47 = vpop.f32.mrf.mxu1 }
 0x1cb   : > { %v5454_v48 = vpop.f32.mrf.mxu1 }
 0x1cc   : > { %702 = vrot.lane.b32.xlu1 %v5454_v48, %s8428_s26 }
 0x1cd   : > { %v673_v49 = vpop.f32.mrf.mxu1 }
 0x1ce   : > { %700 = vrot.lane.b32.xlu0 %v673_v49, %s8428_s26 }
 0x1d0   : > { %698 = vrot.lane.b32.xlu1 %v5451_v46, %s8428_s26 }
 0x1d2   : > { %722 = vperm.xlu0 %5997, %v716_v50  }
 0x1d4   : > { %696 = vrot.lane.b32.xlu1 %v663_v47, %s8428_s26 }
 0x22a   : > { %v686_v58 = vpop.permute.xlu1 %685 }
 0x22b   : > { %v692_v0 = vsel %vm682_vm2, 0.0, %v686_v58 }
 0x22c   : > { %v684_v52 = vpop.permute.xlu0 %683  ;;  %v709_v6 = vadd.f32 %v5445_v42, %v692_v0 }
 0x22d   : > { %v691_v19 = vsel %vm682_vm2, 0.0, %v684_v52 }
 0x22e   : > { %v708_v27 = vadd.f32 %v691_v19, %v643_v43 }
 0x230   : > { %v690_v55 = vpop.permute.xlu0 %689 }
 0x231   : > { %v694_v60 = vsel %vm682_vm2, 0.0, %v690_v55 }
 0x232   : > { %v711_v62 = vadd.f32 %v5448_v44, %v694_v60 }
 0x234   : > { %v688_v59 = vpop.permute.xlu0 %687 }
 0x235   : > { %v693_v61 = vsel %vm682_vm2, 0.0, %v688_v59 }
 0x236   : > { %v710_v2 = vadd.f32 %v693_v61, %v653_v45 }
 0x23e   : > { %v703_v63 = vpop.permute.xlu1 %702 }
 0x23f   : > { %v707_v1 = vsel %vm695_vm3, 0.0, %v703_v63 }
 0x240   : > { %v715_v3 = vadd.f32 %v711_v62, %v707_v1  ;;  %v701_v4 = vpop.permute.xlu0 %700 }
 0x241   : > { %v706_v5 = vsel %vm695_vm3, 0.0, %v701_v4  ;;  %v4817_v4 = vld [vmem:[%s8488_s4 + $0x30] sm:$0xff] }
 0x242   : > { %v743_v7 = vadd.f32 %v6596_v53, %v715_v3  ;;  %v714_v8 = vadd.f32 %v710_v2, %v706_v5  ;;  %v699_v9 = vpop.permute.xlu1 %698  ;;  %v4816_v2 = vld [vmem:[%s8488_s4 + $0x28] sm:$0xff]  ;;  %v4818_v3 = vld [vmem:[%s8488_s4 + $0x38] sm:$0xff]  ;;  %v6654_v5 = vld [vmem:[%s8418_s3 + $0x60] sm:$0xff] }
 0x243   : > { %v705_v10 = vsel %vm695_vm3, 0.0, %v699_v9  ;;  %5463 = vmatprep.mubr.msk.f32.mxu0 %vm520_vm1, %v6654_v5 }
 0x244   : > { %v747_v11 = vsub.f32 0.0, %v743_v7  ;;  %v742_v12 = vadd.f32 %v6594_v51, %v714_v8  ;;  %v713_v13 = vadd.f32 %v709_v6, %v705_v10 }
 0x246   : > { %v754_v15 = vmul.f32 1.442695, %v747_v11  ;;  %v746_v16 = vsub.f32 0.0, %v742_v12  ;;  %v741_v17 = vadd.f32 %v6598_v56, %v713_v13  ;;  %v697_v18 = vpop.permute.xlu1 %696 }
 0x247   : > { %v704_v25 = vsel %vm695_vm3, 0.0, %v697_v18 }
 0x248   : > { %5999 = vpow2.f32 %v754_v15  ;;  %v752_v21 = vmul.f32 1.442695, %v746_v16  ;;  %v745_v22 = vsub.f32 0.0, %v741_v17  ;;  %v712_v29 = vadd.f32 %v708_v27, %v704_v25 }
 0x24a   : > { %6001 = vpow2.f32 %v752_v21  ;;  %v750_v28 = vmul.f32 1.442695, %v745_v22 }
 0x24c   : > { %6003 = vpow2.f32 %v750_v28 }
 0x24d   : > { %v6623_v30 = vpop.permute.xlu0 %722 }
 0x24e   : > { %v740_v31 = vadd.f32 %v6623_v30, %v712_v29 }
 0x250   : > { %v744_v32 = vsub.f32 0.0, %v740_v31 }
 0x252   : > { %v748_v33 = vmul.f32 1.442695, %v744_v32 }
 0x254   : > { %6005 = vpow2.f32 %v748_v33 }
 0x255   : > { %v6000_v34 = vpop.eup %5999 }
 0x256   : > { %v759_v35 = vadd.f32 1.0, %v6000_v34 }
 0x257   : > { %v6002_v36 = vpop.eup %6001 }
 0x258   : > { %6007 = vrcp.f32 %v759_v35  ;;  %v758_v37 = vadd.f32 1.0, %v6002_v36 }
 0x259   : > { %v6004_v38 = vpop.eup %6003 }
 0x25a   : > { %6009 = vrcp.f32 %v758_v37  ;;  %v757_v39 = vadd.f32 1.0, %v6004_v38 }
 0x25c   : > { %6011 = vrcp.f32 %v757_v39 }
 0x261   : > { %v6006_v40 = vpop.eup %6005 }
 0x262   : > { %v756_v41 = vadd.f32 1.0, %v6006_v40 }
 0x264   : > { %6013 = vrcp.f32 %v756_v41 }
 0x265   : > { %v6008_v42 = vpop.eup %6007 }
 0x266   : > { %770 = vadd.xlane.f32.xlu0 %v6008_v42 }
 0x267   : > { %v6010_v43 = vpop.eup %6009 }
 0x268   : > { %768 = vadd.xlane.f32.xlu1 %v6010_v43 }
 0x269   : > { %v6012_v44 = vpop.eup %6011 }
 0x26a   : > { %766 = vadd.xlane.f32.xlu0 %v6012_v44 }
 0x271   : > { %v6014_v45 = vpop.eup %6013 }
 0x272   : > { %764 = vadd.xlane.f32.xlu0 %v6014_v45 }
 0x2ef   : > { %v771_v46 = vpop.xlane.xlu0 %770 }
 0x2f0   : > { %v776_v47 = vmul.f32 0.0078125, %v771_v46 }
 0x2f1   : > { %v769_v48 = vpop.xlane.xlu1 %768 }
 0x2f2   : > { %v775_v49 = vmul.f32 0.0078125, %v769_v48  ;;  %v6626_v50 = vsub.f32 %v6008_v42, %v776_v47  ;;  %v4790_v47 = vld [vmem:[%s8421_s6] ss:$0 sm:$0xff] }
 0x2f3   : > { %v767_v52 = vpop.xlane.xlu0 %766 }
 0x2f4   : > { %v774_v54 = vmul.f32 0.0078125, %v767_v52  ;;  %v784_v55 = vmul.f32 %v6626_v50, %v6626_v50  ;;  %v6630_v58 = vsub.f32 %v6010_v43, %v775_v49 }
 0x2f6   : > { %791 = vadd.xlane.f32.xlu1 %v784_v55  ;;  %v783_v59 = vmul.f32 %v6630_v58, %v6630_v58  ;;  %v6634_v60 = vsub.f32 %v6012_v44, %v774_v54 }
 0x2f8   : > { %789 = vadd.xlane.f32.xlu0 %v783_v59  ;;  %v782_v61 = vmul.f32 %v6634_v60, %v6634_v60 }
 0x2fa   : > { %787 = vadd.xlane.f32.xlu1 %v782_v61 }
 0x2fb   : > { %v765_v62 = vpop.xlane.xlu0 %764 }
 0x2fc   : > { %v773_v63 = vmul.f32 0.0078125, %v765_v62 }
 0x2fe   : > { %v6638_v0 = vsub.f32 %v6014_v45, %v773_v63  ;;  %v4789_v45 = vld [vmem:[%s8420_s5] ss:$0 sm:$0xff] }
 0x300   : > { %v781_v1 = vmul.f32 %v6638_v0, %v6638_v0 }
 0x302   : > { %785 = vadd.xlane.f32.xlu0 %v781_v1 }
 0x30b   : > { %1077 = vperm.xlu1 %5998, %v4816_v2  }
 0x318   : > { %1087 = vperm.xlu0 %5997, %v4818_v3  }
 0x31c   : > { %1082 = vperm.xlu0 %5997, %v4817_v4  }
 0x37f   : > { %v792_v6 = vpop.xlane.xlu1 %791 }
 0x380   : > { %v796_v7 = vmul.f32 0.007874016, %v792_v6  ;;  %v4795_v6 = vld [vmem:[%s8418_s3 + $0x80] sm:$0xff] }
 0x381   : > { %v790_v8 = vpop.xlane.xlu0 %789 }
 0x382   : > { %6015 = vrsqrt.f32 %v796_v7  ;;  %v795_v9 = vmul.f32 0.007874016, %v790_v8  ;;  %vm820_vm4 = vcmp.eq.f32.partialorder %v796_v7, inf  ;;  %v823_v17 = vand.u32 2147483648, %v796_v7  ;;  %v4797_v8 = vld [vmem:[%s8418_s3 + $0x90] sm:$0xff] }
 0x383   : > { %v788_v10 = vpop.xlane.xlu1 %787  ;;  %vm822_vm5 = vcmp.eq.f32.partialorder %v796_v7, 0.0 }
 0x384   : > { %v794_v11 = vmul.f32 0.007874016, %v788_v10  ;;  %6017 = vrsqrt.f32 %v795_v9  ;;  %vm813_vm6 = vcmp.eq.f32.partialorder %v795_v9, inf  ;;  %v816_v28 = vand.u32 2147483648, %v795_v9  ;;  %v4799_v10 = vld [vmem:[%s8418_s3 + $0xa0] sm:$0xff] }
 0x385   : > { %vm815_vm7 = vcmp.eq.f32.partialorder %v795_v9, 0.0 }
 0x386   : > { %6019 = vrsqrt.f32 %v794_v11  ;;  %vm806_vm8 = vcmp.eq.f32.partialorder %v794_v11, inf  ;;  %v809_v32 = vand.u32 2147483648, %v794_v11  ;;  %vm808_vm9 = vcmp.eq.f32.partialorder %v794_v11, 0.0 }
 0x38b   : > { %v786_v12 = vpop.xlane.xlu0 %785 }
 0x38c   : > { %v793_v13 = vmul.f32 0.007874016, %v786_v12  ;;  %v4801_v12 = vld [vmem:[%s8418_s3 + $0xb0] sm:$0xff] }
 0x38e   : > { %6021 = vrsqrt.f32 %v793_v13  ;;  %vm799_vm10 = vcmp.eq.f32.partialorder %v793_v13, inf  ;;  %v802_v40 = vand.u32 2147483648, %v793_v13  ;;  %vm801_vm11 = vcmp.eq.f32.partialorder %v793_v13, 0.0 }
 0x38f   : > { %v6016_v15 = vpop.eup %6015 }
 0x390   : > { %v819_v16 = vmul.f32 %v6016_v15, %v796_v7 }
 0x391   : > { %v6018_v18 = vpop.eup %6017 }
 0x392   : > { %v821_v19 = vsel %vm820_vm4, %v796_v7, %v819_v16  ;;  %v812_v25 = vmul.f32 %v6018_v18, %v795_v9  ;;  %v4796_v7 = vld [vmem:[%s8418_s3 + $0x88] sm:$0xff] }
 0x393   : > { %v6020_v21 = vpop.eup %6019  ;;  %v824_v22 = vsel %vm822_vm5, %v823_v17, %v821_v19 }
 0x394   : > { %v828_v27 = vadd.f32 1e-06, %v824_v22  ;;  %v805_v29 = vmul.f32 %v6020_v21, %v794_v11  ;;  %v814_v31 = vsel %vm813_vm6, %v795_v9, %v812_v25  ;;  %v4798_v9 = vld [vmem:[%s8418_s3 + $0x98] sm:$0xff] }
 0x395   : > { %v817_v33 = vsel %vm815_vm7, %v816_v28, %v814_v31 }
 0x396   : > { %v807_v34 = vsel %vm806_vm8, %v794_v11, %v805_v29  ;;  %6023 = vrcp.f32 %v828_v27  ;;  %v827_v35 = vadd.f32 1e-06, %v817_v33  ;;  %v4800_v11 = vld [vmem:[%s8418_s3 + $0xa8] sm:$0xff]  ;;  %v6725_v33 = vld [vmem:[%s8418_s3 + $0xc0] sm:$0xff] }
 0x397   : > { %v810_v36 = vsel %vm808_vm9, %v809_v32, %v807_v34  ;;  %v4815_v32 = vld [vmem:[%s8488_s4 + $0x20] sm:$0xff]  ;;  %5489 = vmatprep.mubr.msk.f32.mxu1 %vm520_vm1, %v6725_v33  ;;  %v4845_v34 = vld [vmem:[%s8488_s4 + $0x50] sm:$0xff] }
 0x398   : > { %v826_v37 = vadd.f32 1e-06, %v810_v36  ;;  %6025 = vrcp.f32 %v827_v35  ;;  %v4846_v35 = vld [vmem:[%s8488_s4 + $0x58] sm:$0xff]  ;;  %v4844_v36 = vld [vmem:[%s8488_s4 + $0x48] sm:$0xff] }
 0x39a   : > { %6027 = vrcp.f32 %v826_v37  ;;  %v6739_v37 = vpop.permute.xlu1 %1077 }
 0x39b   : > { %v6022_v38 = vpop.eup %6021 }
 0x39c   : > { %v798_v39 = vmul.f32 %v6022_v38, %v793_v13 }
 0x39e   : > { %v800_v41 = vsel %vm799_vm10, %v793_v13, %v798_v39  ;;  %v4802_v13 = vld [vmem:[%s8418_s3 + $0xb8] sm:$0xff]  ;;  %v6741_v39 = vpop.permute.xlu0 %1087 }
 0x39f   : > { %v803_v42 = vsel %vm801_vm11, %v802_v40, %v800_v41 }
 0x3a0   : > { %v825_v43 = vadd.f32 1e-06, %v803_v42 }
 0x3a2   : > { %6029 = vrcp.f32 %v825_v43  ;;  %v6743_v41 = vpop.permute.xlu0 %1082 }
 0x3a3   : > { %v6024_v44 = vpop.eup %6023 }
 0x3a4   : > { %v837_v46 = vmul.f32 %v6024_v44, %v6626_v50 }
 0x3a5   : > { %v6026_v48 = vpop.eup %6025 }
 0x3a6   : > { %v847_v49 = vmul.f32 %v4789_v45, %v837_v46  ;;  %v836_v54 = vmul.f32 %v6026_v48, %v6630_v58  ;;  %v4792_v58 = vld [vmem:[%s8418_s3 + $0x68] sm:$0xff] }
 0x3a7   : > { %v6028_v52 = vpop.eup %6027 }
 0x3a8   : > { %v858_v55 = vadd.f32 %v4790_v47, %v847_v49  ;;  %v835_v59 = vmul.f32 %v6028_v52, %v6634_v60  ;;  %v846_v61 = vmul.f32 %v4789_v45, %v836_v54  ;;  %v4793_v60 = vld [vmem:[%s8418_s3 + $0x70] sm:$0xff] }
 0x3aa   : > { %5455 = vmatprep.subr.mxu0 %v858_v55  ;;  %v845_v62 = vmul.f32 %v4789_v45, %v835_v59  ;;  %v857_v63 = vadd.f32 %v4790_v47, %v846_v61 }
 0x3ab   : > { %5456 = vmatpush3.msra.mxu0 %v858_v55 }
 0x3ac   : > { %v856_v1 = vadd.f32 %v4790_v47, %v845_v62  ;;  %5457 = vmatprep.subr.mxu0 %v857_v63 }
 0x3ad   : > { %5458 = vmatpush3.msra.mxu0 %v857_v63 }
 0x3ae   : > { %5459 = vmatprep.subr.mxu0 %v856_v1 }
 0x3af   : > { %v6030_v50 = vpop.eup %6029  ;;  %5460 = vmatpush3.msra.mxu0 %v856_v1 }
 0x3b0   : > { %v834_v2 = vmul.f32 %v6030_v50, %v6638_v0  ;;  %v4794_v0 = vld [vmem:[%s8418_s3 + $0x78] sm:$0xff] }
 0x3b2   : > { %v844_v3 = vmul.f32 %v4789_v45, %v834_v2 }
 0x3b4   : > { %v855_v4 = vadd.f32 %v4790_v47, %v844_v3 }
 0x3b6   : > { %5461 = vmatprep.subr.mxu0 %v855_v4 }
 0x3b7   : > { %5462 = vmatpush3.msra.mxu0 %v855_v4 }
 0x3b8   : > { %5464 = vmatmul.mubr.msk.f32.vlgmr.msra.gmra.mxu0 %vm520_vm1, %v4792_v58 }
 0x3b9   : > { %5466 = vmatprep.mubr.msk.f32.mxu0 %vm520_vm1, %v4793_v60 }
 0x3bc   : > { %5467 = vmatmul.mubr.msk.f32.gmra.mxu0 %vm520_vm1, %v4794_v0 }
 0x3bd   : > { %5469 = vmatprep.mubr.msk.f32.mxu0 %vm520_vm1, %v4795_v6 }
 0x3c0   : > { %5470 = vmatmul.mubr.msk.f32.gmra.mxu0 %vm520_vm1, %v4796_v7 }
 0x3c1   : > { %5472 = vmatprep.mubr.msk.f32.mxu0 %vm520_vm1, %v4797_v8 }
 0x3c4   : > { %5473 = vmatmul.mubr.msk.f32.gmra.mxu0 %vm520_vm1, %v4798_v9 }
 0x3c5   : > { %5475 = vmatprep.mubr.msk.f32.mxu0 %vm520_vm1, %v4799_v10  ;;  %v4820_v10 = vld [vmem:[%s8418_s3 + $0xc8] sm:$0xff] }
 0x3c8   : > { %5476 = vmatmul.mubr.msk.f32.gmra.mxu0 %vm520_vm1, %v4800_v11  ;;  %v4821_v11 = vld [vmem:[%s8418_s3 + $0xd0] sm:$0xff] }
 0x3c9   : > { %5478 = vmatprep.mubr.msk.f32.mxu0 %vm520_vm1, %v4801_v12  ;;  %v4822_v12 = vld [vmem:[%s8418_s3 + $0xd8] sm:$0xff] }
 0x3cc   : > { %5479 = vmatmul.mubr.msk.f32.gmra.mxu0 %vm520_vm1, %v4802_v13  ;;  %v4823_v13 = vld [vmem:[%s8418_s3 + $0xe0] sm:$0xff] }
 0x478   : > { %v5465_v15 = vpop.f32.mrf.mxu0 }
 0x479   : > { %1035 = vrot.lane.b32.xlu1 %v5465_v15, %s8451_s20  ;;  %v4824_v15 = vld [vmem:[%s8418_s3 + $0xe8] sm:$0xff] }
 0x47a   : > { %v974_v16 = vpop.f32.mrf.mxu0 }
 0x47b   : > { %1033 = vrot.lane.b32.xlu0 %v974_v16, %s8451_s20  ;;  %v4825_v16 = vld [vmem:[%s8418_s3 + $0xf0] sm:$0xff] }
 0x47c   : > { %v5468_v17 = vpop.f32.mrf.mxu0 }
 0x47d   : > { %1039 = vrot.lane.b32.xlu1 %v5468_v17, %s8451_s20  ;;  %v4826_v17 = vld [vmem:[%s8418_s3 + $0xf8] sm:$0xff] }
 0x47e   : > { %v984_v18 = vpop.f32.mrf.mxu0 }
 0x480   : > { %v5471_v19 = vpop.f32.mrf.mxu0 }
 0x481   : > { %1037 = vrot.lane.b32.xlu1 %v984_v18, %s8451_s20  ;;  %v4827_v18 = vld [vmem:[%s8418_s3 + $0x100] sm:$0xff] }
 0x482   : > { %v994_v21 = vpop.f32.mrf.mxu0 }
 0x484   : > { %v5474_v22 = vpop.f32.mrf.mxu0 }
 0x486   : > { %v1004_v25 = vpop.f32.mrf.mxu0 }
 0x488   : > { %v5477_v27 = vpop.f32.mrf.mxu0 }
 0x48a   : > { %v1014_v28 = vpop.f32.mrf.mxu0 }
 0x48c   : > { %v5480_v29 = vpop.f32.mrf.mxu0 }
 0x48d   : > { %1051 = vrot.lane.b32.xlu1 %v5480_v29, %s8428_s26 }
 0x48e   : > { %v1024_v31 = vpop.f32.mrf.mxu0 }
 0x48f   : > { %1049 = vrot.lane.b32.xlu0 %v1024_v31, %s8428_s26 }
 0x491   : > { %1047 = vrot.lane.b32.xlu1 %v5477_v27, %s8428_s26 }
 0x493   : > { %1072 = vperm.xlu0 %5997, %v4815_v32  }
 0x495   : > { %1045 = vrot.lane.b32.xlu1 %v1014_v28, %s8428_s26  ;;  %s8493_s26 = smov 127  }
 0x497   : > { %1319 = vperm.xlu0 %5997, %v4845_v34  }
 0x499   : > { %1324 = vperm.xlu1 %5998, %v4846_v35  }
 0x49d   : > { %1314 = vperm.xlu1 %5998, %v4844_v36  }
 0x4eb   : > { %v1036_v38 = vpop.permute.xlu1 %1035 }
 0x4ec   : > { %v1042_v48 = vsel %vm682_vm2, 0.0, %v1036_v38 }
 0x4ed   : > { %v1034_v44 = vpop.permute.xlu0 %1033  ;;  %v1058_v61 = vadd.f32 %v5471_v19, %v1042_v48  ;;  %v4828_v19 = vld [vmem:[%s8418_s3 + $0x108] sm:$0xff] }
 0x4ee   : > { %v1041_v60 = vsel %vm682_vm2, 0.0, %v1034_v44  ;;  %v4847_v44 = vld [vmem:[%s8418_s3 + $0x120] sm:$0xff] }
 0x4ef   : > { %v1040_v40 = vpop.permute.xlu1 %1039  ;;  %v1057_v6 = vadd.f32 %v1041_v60, %v994_v21  ;;  %v4829_v21 = vld [vmem:[%s8418_s3 + $0x110] sm:$0xff]  ;;  %5515 = vmatprep.mubr.msk.f32.mxu0 %vm520_vm1, %v4847_v44 }
 0x4f0   : > { %v1044_v43 = vsel %vm682_vm2, 0.0, %v1040_v40 }
 0x4f1   : > { %v1060_v46 = vadd.f32 %v5474_v22, %v1044_v43  ;;  %v4830_v22 = vld [vmem:[%s8418_s3 + $0x118] sm:$0xff]  ;;  %v4843_v43 = vld [vmem:[%s8488_s4 + $0x40] sm:$0xff] }
 0x4f3   : > { %v1038_v42 = vpop.permute.xlu1 %1037 }
 0x4f4   : > { %v1043_v45 = vsel %vm682_vm2, 0.0, %v1038_v42 }
 0x4f5   : > { %v1059_v52 = vadd.f32 %v1043_v45, %v1004_v25  ;;  %v4873_v45 = vld [vmem:[%s8488_s4 + $0x70] sm:$0xff] }
 0x4ff   : > { %v1052_v47 = vpop.permute.xlu1 %1051 }
 0x500   : > { %v1056_v49 = vsel %vm695_vm3, 0.0, %v1052_v47  ;;  %v4872_v47 = vld [vmem:[%s8488_s4 + $0x68] sm:$0xff] }
 0x501   : > { %v1064_v54 = vadd.f32 %v1060_v46, %v1056_v49  ;;  %v1050_v55 = vpop.permute.xlu0 %1049  ;;  %v4874_v46 = vld [vmem:[%s8488_s4 + $0x78] sm:$0xff] }
 0x502   : > { %v1055_v59 = vsel %vm695_vm3, 0.0, %v1050_v55 }
 0x503   : > { %v1063_v62 = vadd.f32 %v1059_v52, %v1055_v59  ;;  %v1048_v63 = vpop.permute.xlu1 %1047  ;;  %v1093_v1 = vadd.f32 %v6741_v39, %v1064_v54 }
 0x504   : > { %v1054_v50 = vsel %vm695_vm3, 0.0, %v1048_v63 }
 0x505   : > { %v1062_v2 = vadd.f32 %v1058_v61, %v1054_v50  ;;  %5481 = vmatprep.subr.mxu1 %v1093_v1  ;;  %v1092_v3 = vadd.f32 %v6743_v41, %v1063_v62 }
 0x506   : > { %5482 = vmatpush3.msra.mxu1 %v1093_v1 }
 0x507   : > { %v1046_v4 = vpop.permute.xlu1 %1045  ;;  %5483 = vmatprep.subr.mxu1 %v1092_v3  ;;  %v1091_v58 = vadd.f32 %v6739_v37, %v1062_v2 }
 0x508   : > { %5484 = vmatpush3.msra.mxu1 %v1092_v3  ;;  %v1053_v0 = vsel %vm695_vm3, 0.0, %v1046_v4 }
 0x509   : > { %5485 = vmatprep.subr.mxu1 %v1091_v58  ;;  %v1061_v7 = vadd.f32 %v1057_v6, %v1053_v0 }
 0x50a   : > { %5486 = vmatpush3.msra.mxu1 %v1091_v58 }
 0x50e   : > { %v6764_v8 = vpop.permute.xlu0 %1072 }
 0x50f   : > { %v1090_v9 = vadd.f32 %v6764_v8, %v1061_v7 }
 0x511   : > { %5487 = vmatprep.subr.mxu1 %v1090_v9 }
 0x512   : > { %5488 = vmatpush3.msra.mxu1 %v1090_v9  ;;  %v6835_v48 = vpop.permute.xlu0 %1319 }
 0x513   : > { %5490 = vmatmul.mubr.msk.f32.vlgmr.msra.gmra.mxu1 %vm520_vm1, %v4820_v10 }
 0x514   : > { %5492 = vmatprep.mubr.msk.f32.mxu1 %vm520_vm1, %v4821_v11  ;;  %v6837_v52 = vpop.permute.xlu1 %1324 }
 0x517   : > { %5493 = vmatmul.mubr.msk.f32.gmra.mxu1 %vm520_vm1, %v4822_v12 }
 0x518   : > { %5495 = vmatprep.mubr.msk.f32.mxu1 %vm520_vm1, %v4823_v13  ;;  %v6839_v55 = vpop.permute.xlu1 %1314 }
 0x51b   : > { %5496 = vmatmul.mubr.msk.f32.gmra.mxu1 %vm520_vm1, %v4824_v15 }
 0x51c   : > { %5498 = vmatprep.mubr.msk.f32.mxu1 %vm520_vm1, %v4825_v16 }
 0x51f   : > { %5499 = vmatmul.mubr.msk.f32.gmra.mxu1 %vm520_vm1, %v4826_v17 }
 0x520   : > { %5501 = vmatprep.mubr.msk.f32.mxu1 %vm520_vm1, %v4827_v18 }
 0x523   : > { %5502 = vmatmul.mubr.msk.f32.gmra.mxu1 %vm520_vm1, %v4828_v19 }
 0x524   : > { %5504 = vmatprep.mubr.msk.f32.mxu1 %vm520_vm1, %v4829_v21 }
 0x527   : > { %5505 = vmatmul.mubr.msk.f32.gmra.mxu1 %vm520_vm1, %v4830_v22 }
 0x5d3   : > { %v5491_v25 = vpop.f32.mrf.mxu1 }
 0x5d4   : > { %1271 = vrot.lane.b32.xlu1 %v5491_v25, %s8426_s12 }
 0x5d5   : > { %v1209_v27 = vpop.f32.mrf.mxu1 }
 0x5d6   : > { %1269 = vrot.lane.b32.xlu0 %v1209_v27, %s8426_s12  ;;  %v4848_v27 = vld [vmem:[%s8418_s3 + $0x128] sm:$0xff] }
 0x5d7   : > { %v5494_v28 = vpop.f32.mrf.mxu1 }
 0x5d9   : > { %v1219_v29 = vpop.f32.mrf.mxu1 }
 0x5da   : > { %1275 = vrot.lane.b32.xlu0 %v5494_v28, %s8426_s12  ;;  %v4849_v28 = vld [vmem:[%s8418_s3 + $0x130] sm:$0xff] }
 0x5db   : > { %v5497_v31 = vpop.f32.mrf.mxu1 }
 0x5dd   : > { %v1229_v32 = vpop.f32.mrf.mxu1 }
 0x5de   : > { %1273 = vrot.lane.b32.xlu0 %v1219_v29, %s8426_s12  ;;  %v4850_v29 = vld [vmem:[%s8418_s3 + $0x138] sm:$0xff]  ;;  %s5092_s12 = sshll.u32 %s6444_s17, 9 }
 0x5df   : > { %v5500_v34 = vpop.f32.mrf.mxu1  ;;  %s8371_s2 = scalar_lea.hbm %s8425_s10, %s5092_s12 }
 0x5e1   : > { %v1239_v35 = vpop.f32.mrf.mxu1 }
 0x5e3   : > { %v5503_v36 = vpop.f32.mrf.mxu1 }
 0x5e5   : > { %v1249_v38 = vpop.f32.mrf.mxu1 }
 0x5e7   : > { %v5506_v40 = vpop.f32.mrf.mxu1 }
 0x5e8   : > { %1288 = vrot.lane.b32.xlu1 %v5506_v40, %s8432_s18  ;;  %v4857_v40 = vld [vmem:[%s8418_s3 + $0x170] sm:$0xff] }
 0x5e9   : > { %v1259_v42 = vpop.f32.mrf.mxu1 }
 0x5ea   : > { %1286 = vrot.lane.b32.xlu0 %v1259_v42, %s8432_s18  ;;  %v4858_v42 = vld [vmem:[%s8418_s3 + $0x178] sm:$0xff] }
 0x5ec   : > { %1284 = vrot.lane.b32.xlu1 %v5503_v36, %s8432_s18  ;;  %v4855_v36 = vld [vmem:[%s8418_s3 + $0x160] sm:$0xff] }
 0x5ee   : > { %1309 = vperm.xlu0 %5997, %v4843_v43  }
 0x5f0   : > { %1282 = vrot.lane.b32.xlu1 %v1249_v38, %s8432_s18  ;;  %v4856_v38 = vld [vmem:[%s8418_s3 + $0x168] sm:$0xff] }
 0x5f2   : > { %1556 = vperm.xlu0 %5997, %v4873_v45  }
 0x5f4   : > { %1561 = vperm.xlu1 %5998, %v4874_v46  }
 0x5f8   : > { %1551 = vperm.xlu1 %5998, %v4872_v47  }
 0x646   : > { %v1272_v59 = vpop.permute.xlu1 %1271 }
 0x647   : > { %v1278_v2 = vsel %vm1268_vm12, 0.0, %v1272_v59 }
 0x648   : > { %v1270_v49 = vpop.permute.xlu0 %1269  ;;  %v1295_v6 = vadd.f32 %v5497_v31, %v1278_v2  ;;  %v4851_v31 = vld [vmem:[%s8418_s3 + $0x140] sm:$0xff]  ;;  %v4901_v2 = vld [vmem:[%s8488_s4 + $0x90] sm:$0xff] }
 0x649   : > { %v1277_v17 = vsel %vm1268_vm12, 0.0, %v1270_v49 }
 0x64a   : > { %v1294_v19 = vadd.f32 %v1277_v17, %v1229_v32  ;;  %v4852_v32 = vld [vmem:[%s8418_s3 + $0x148] sm:$0xff] }
 0x64c   : > { %v1276_v54 = vpop.permute.xlu0 %1275 }
 0x64d   : > { %v1280_v62 = vsel %vm1268_vm12, 0.0, %v1276_v54 }
 0x64e   : > { %v1297_v1 = vadd.f32 %v5500_v34, %v1280_v62  ;;  %v4853_v34 = vld [vmem:[%s8418_s3 + $0x150] sm:$0xff] }
 0x650   : > { %v1274_v61 = vpop.permute.xlu0 %1273 }
 0x651   : > { %v1279_v63 = vsel %vm1268_vm12, 0.0, %v1274_v61 }
 0x652   : > { %v1296_v4 = vadd.f32 %v1279_v63, %v1239_v35  ;;  %v4854_v35 = vld [vmem:[%s8418_s3 + $0x158] sm:$0xff] }
 0x65a   : > { %v1289_v50 = vpop.permute.xlu1 %1288 }
 0x65b   : > { %v1293_v3 = vsel %vm1281_vm13, 0.0, %v1289_v50  ;;  %v4875_v50 = vld [vmem:[%s8418_s3 + $0x180] sm:$0xff] }
 0x65c   : > { %v1301_v58 = vadd.f32 %v1297_v1, %v1293_v3  ;;  %v1287_v60 = vpop.permute.xlu0 %1286  ;;  %v4871_v1 = vld [vmem:[%s8488_s4 + $0x60] sm:$0xff]  ;;  %5541 = vmatprep.mubr.msk.f32.mxu1 %vm520_vm1, %v4875_v50  ;;  %v4902_v3 = vld [vmem:[%s8488_s4 + $0x98] sm:$0xff]  ;;  %v4885_v50 = vld [vmem:[%s8418_s3 + $0x1d0] sm:$0xff] }
 0x65d   : > { %v1292_v0 = vsel %vm1281_vm13, 0.0, %v1287_v60 }
 0x65e   : > { %v1300_v7 = vadd.f32 %v1296_v4, %v1292_v0  ;;  %v1285_v9 = vpop.permute.xlu1 %1284  ;;  %v1330_v10 = vadd.f32 %v6837_v52, %v1301_v58  ;;  %v4900_v4 = vld [vmem:[%s8488_s4 + $0x88] sm:$0xff] }
 0x65f   : > { %v1291_v11 = vsel %vm1281_vm13, 0.0, %v1285_v9 }
 0x660   : > { %v1299_v12 = vadd.f32 %v1295_v6, %v1291_v11  ;;  %5507 = vmatprep.subr.mxu0 %v1330_v10  ;;  %v1329_v13 = vadd.f32 %v6835_v48, %v1300_v7 }
 0x661   : > { %5508 = vmatpush3.msra.mxu0 %v1330_v10 }
 0x662   : > { %v1283_v15 = vpop.permute.xlu1 %1282  ;;  %5509 = vmatprep.subr.mxu0 %v1329_v13  ;;  %v1328_v16 = vadd.f32 %v6839_v55, %v1299_v12 }
 0x663   : > { %5510 = vmatpush3.msra.mxu0 %v1329_v13  ;;  %v1290_v18 = vsel %vm1281_vm13, 0.0, %v1283_v15 }
 0x664   : > { %5511 = vmatprep.subr.mxu0 %v1328_v16  ;;  %v1298_v21 = vadd.f32 %v1294_v19, %v1290_v18 }
 0x665   : > { %5512 = vmatpush3.msra.mxu0 %v1328_v16 }
 0x669   : > { %v6862_v22 = vpop.permute.xlu0 %1309 }
 0x66a   : > { %v1327_v25 = vadd.f32 %v6862_v22, %v1298_v21 }
 0x66c   : > { %5513 = vmatprep.subr.mxu0 %v1327_v25 }
 0x66d   : > { %5514 = vmatpush3.msra.mxu0 %v1327_v25  ;;  %v6935_v58 = vpop.permute.xlu0 %1556 }
 0x66e   : > { %5516 = vmatmul.mubr.msk.f32.vlgmr.msra.gmra.mxu0 %vm520_vm1, %v4848_v27 }
 0x66f   : > { %5518 = vmatprep.mubr.msk.f32.mxu0 %vm520_vm1, %v4849_v28  ;;  %v6937_v0 = vpop.permute.xlu1 %1561 }
 0x672   : > { %5519 = vmatmul.mubr.msk.f32.gmra.mxu0 %vm520_vm1, %v4850_v29 }
 0x673   : > { %5521 = vmatprep.mubr.msk.f32.mxu0 %vm520_vm1, %v4851_v31  ;;  %v6939_v7 = vpop.permute.xlu1 %1551 }
 0x676   : > { %5522 = vmatmul.mubr.msk.f32.gmra.mxu0 %vm520_vm1, %v4852_v32 }
 0x677   : > { %5524 = vmatprep.mubr.msk.f32.mxu0 %vm520_vm1, %v4853_v34 }
 0x67a   : > { %5525 = vmatmul.mubr.msk.f32.gmra.mxu0 %vm520_vm1, %v4854_v35 }
 0x67b   : > { %5527 = vmatprep.mubr.msk.f32.mxu0 %vm520_vm1, %v4855_v36 }
 0x67e   : > { %5528 = vmatmul.mubr.msk.f32.gmra.mxu0 %vm520_vm1, %v4856_v38 }
 0x67f   : > { %5530 = vmatprep.mubr.msk.f32.mxu0 %vm520_vm1, %v4857_v40 }
 0x682   : > { %5531 = vmatmul.mubr.msk.f32.gmra.mxu0 %vm520_vm1, %v4858_v42 }
 0x683   : > { %5567 = vmatprep.mubr.msk.f32.mxu0 %vm520_vm1, %v6519_v14 }
 0x72e   : > { %v5517_v43 = vpop.f32.mrf.mxu0 }
 0x72f   : > { %1508 = vrot.lane.b32.xlu1 %v5517_v43, %s8430_s21 }
 0x730   : > { %v1446_v44 = vpop.f32.mrf.mxu0 }
 0x731   : > { %1506 = vrot.lane.b32.xlu0 %v1446_v44, %s8430_s21 }
 0x732   : > { %v5520_v45 = vpop.f32.mrf.mxu0 }
 0x734   : > { %v1456_v46 = vpop.f32.mrf.mxu0 }
 0x735   : > { %1512 = vrot.lane.b32.xlu0 %v5520_v45, %s8430_s21 }
 0x736   : > { %v5523_v47 = vpop.f32.mrf.mxu0 }
 0x738   : > { %v1466_v49 = vpop.f32.mrf.mxu0 }
 0x739   : > { %1510 = vrot.lane.b32.xlu0 %v1456_v46, %s8430_s21 }
 0x73a   : > { %v5526_v54 = vpop.f32.mrf.mxu0 }
 0x73c   : > { %v1476_v59 = vpop.f32.mrf.mxu0 }
 0x73e   : > { %v5529_v61 = vpop.f32.mrf.mxu0 }
 0x740   : > { %v1486_v62 = vpop.f32.mrf.mxu0 }
 0x742   : > { %v5532_v14 = vpop.f32.mrf.mxu0 }
 0x743   : > { %1525 = vrot.lane.b32.xlu1 %v5532_v14, %s8465_s25  ;;  %v4882_v14 = vld [vmem:[%s8418_s3 + $0x1b8] sm:$0xff] }
 0x744   : > { %v1496_v63 = vpop.f32.mrf.mxu0 }
 0x745   : > { %1523 = vrot.lane.b32.xlu0 %v1496_v63, %s8465_s25  ;;  %v4883_v63 = vld [vmem:[%s8418_s3 + $0x1c0] sm:$0xff] }
 0x747   : > { %1521 = vrot.lane.b32.xlu1 %v5529_v61, %s8465_s25  ;;  %v4880_v61 = vld [vmem:[%s8418_s3 + $0x1a8] sm:$0xff] }
 0x749   : > { %1546 = vperm.xlu0 %5997, %v4871_v1   ;;  %v4884_v1 = vld [vmem:[%s8418_s3 + $0x1c8] sm:$0xff] }
 0x74b   : > { %1519 = vrot.lane.b32.xlu1 %v1486_v62, %s8465_s25  ;;  %v4881_v62 = vld [vmem:[%s8418_s3 + $0x1b0] sm:$0xff] }
 0x74d   : > { %1791 = vperm.xlu0 %5997, %v4901_v2   ;;  %v4886_v2 = vld [vmem:[%s8418_s3 + $0x1d8] sm:$0xff] }
 0x74f   : > { %1796 = vperm.xlu1 %5998, %v4902_v3  }
 0x753   : > { %1786 = vperm.xlu1 %5998, %v4900_v4  }
 0x7a1   : > { %v1509_v9 = vpop.permute.xlu1 %1508 }
 0x7a2   : > { %v1515_v16 = vsel %vm1505_vm14, 0.0, %v1509_v9 }
 0x7a3   : > { %v1507_v60 = vpop.permute.xlu0 %1506  ;;  %v1532_v27 = vadd.f32 %v5523_v47, %v1515_v16  ;;  %v4876_v47 = vld [vmem:[%s8418_s3 + $0x188] sm:$0xff] }
 0x7a4   : > { %v1514_v40 = vsel %vm1505_vm14, 0.0, %v1507_v60 }
 0x7a5   : > { %v1531_v43 = vadd.f32 %v1514_v40, %v1466_v49  ;;  %v4878_v49 = vld [vmem:[%s8418_s3 + $0x198] sm:$0xff] }
 0x7a7   : > { %v1513_v6 = vpop.permute.xlu0 %1512 }
 0x7a8   : > { %v1517_v11 = vsel %vm1505_vm14, 0.0, %v1513_v6 }
 0x7a9   : > { %v1534_v13 = vadd.f32 %v5526_v54, %v1517_v11  ;;  %v4877_v54 = vld [vmem:[%s8418_s3 + $0x190] sm:$0xff] }
 0x7ab   : > { %v1511_v10 = vpop.permute.xlu0 %1510 }
 0x7ac   : > { %v1516_v12 = vsel %vm1505_vm14, 0.0, %v1511_v10 }
 0x7ad   : > { %v1533_v18 = vadd.f32 %v1516_v12, %v1476_v59  ;;  %v4879_v59 = vld [vmem:[%s8418_s3 + $0x1a0] sm:$0xff] }
 0x7b5   : > { %v1526_v15 = vpop.permute.xlu1 %1525 }
 0x7b6   : > { %v1530_v17 = vsel %vm1518_vm15, 0.0, %v1526_v15 }
 0x7b7   : > { %v1538_v19 = vadd.f32 %v1534_v13, %v1530_v17  ;;  %v1524_v21 = vpop.permute.xlu0 %1523  ;;  %v4899_v17 = vld [vmem:[%s8488_s4 + $0x80] sm:$0xff] }
 0x7b8   : > { %v1529_v25 = vsel %vm1518_vm15, 0.0, %v1524_v21 }
 0x7b9   : > { %v1537_v28 = vadd.f32 %v1533_v18, %v1529_v25  ;;  %v1522_v29 = vpop.permute.xlu1 %1521  ;;  %v1567_v31 = vadd.f32 %v6937_v0, %v1538_v19 }
 0x7ba   : > { %v1528_v32 = vsel %vm1518_vm15, 0.0, %v1522_v29 }
 0x7bb   : > { %v1536_v34 = vadd.f32 %v1532_v27, %v1528_v32  ;;  %5533 = vmatprep.subr.mxu1 %v1567_v31  ;;  %v1566_v35 = vadd.f32 %v6935_v58, %v1537_v28 }
 0x7bc   : > { %5534 = vmatpush3.msra.mxu1 %v1567_v31 }
 0x7bd   : > { %v1520_v36 = vpop.permute.xlu1 %1519  ;;  %5535 = vmatprep.subr.mxu1 %v1566_v35  ;;  %v1565_v38 = vadd.f32 %v6939_v7, %v1536_v34 }
 0x7be   : > { %5536 = vmatpush3.msra.mxu1 %v1566_v35  ;;  %v1527_v42 = vsel %vm1518_vm15, 0.0, %v1520_v36 }
 0x7bf   : > { %5537 = vmatprep.subr.mxu1 %v1565_v38  ;;  %v1535_v44 = vadd.f32 %v1531_v43, %v1527_v42 }
 0x7c0   : > { %5538 = vmatpush3.msra.mxu1 %v1565_v38 }
 0x7c4   : > { %v6962_v45 = vpop.permute.xlu0 %1546 }
 0x7c5   : > { %v1564_v46 = vadd.f32 %v6962_v45, %v1535_v44 }
 0x7c7   : > { %5539 = vmatprep.subr.mxu1 %v1564_v46 }
 0x7c8   : > { %5540 = vmatpush3.msra.mxu1 %v1564_v46  ;;  %v7022_v18 = vpop.permute.xlu0 %1791 }
 0x7c9   : > { %5542 = vmatmul.mubr.msk.f32.vlgmr.msra.gmra.mxu1 %vm520_vm1, %v4876_v47 }
 0x7ca   : > { %5544 = vmatprep.mubr.msk.f32.mxu1 %vm520_vm1, %v4877_v54  ;;  %v7024_v21 = vpop.permute.xlu1 %1796 }
 0x7cd   : > { %5545 = vmatmul.mubr.msk.f32.gmra.mxu1 %vm520_vm1, %v4878_v49 }
 0x7ce   : > { %5547 = vmatprep.mubr.msk.f32.mxu1 %vm520_vm1, %v4879_v59  ;;  %v7026_v27 = vpop.permute.xlu1 %1786 }
 0x7d1   : > { %5548 = vmatmul.mubr.msk.f32.gmra.mxu1 %vm520_vm1, %v4880_v61 }
 0x7d2   : > { %5550 = vmatprep.mubr.msk.f32.mxu1 %vm520_vm1, %v4881_v62 }
 0x7d5   : > { %5551 = vmatmul.mubr.msk.f32.gmra.mxu1 %vm520_vm1, %v4882_v14 }
 0x7d6   : > { %5553 = vmatprep.mubr.msk.f32.mxu1 %vm520_vm1, %v4883_v63 }
 0x7d9   : > { %5554 = vmatmul.mubr.msk.f32.gmra.mxu1 %vm520_vm1, %v4884_v1 }
 0x7da   : > { %5556 = vmatprep.mubr.msk.f32.mxu1 %vm520_vm1, %v4885_v50 }
 0x7dd   : > { %5557 = vmatmul.mubr.msk.f32.gmra.mxu1 %vm520_vm1, %v4886_v2 }
 0x7de   : > { %5593 = vmatprep.mubr.msk.f32.mxu1 %vm520_vm1, %v6654_v5 }
 0x889   : > { %v5543_v3 = vpop.f32.mrf.mxu1 }
 0x88a   : > { %1744 = vrot.lane.b32.xlu1 %v5543_v3, %s8451_s20 }
 0x88b   : > { %v1683_v4 = vpop.f32.mrf.mxu1 }
 0x88c   : > { %1742 = vrot.lane.b32.xlu0 %v1683_v4, %s8451_s20 }
 0x88d   : > { %v5546_v60 = vpop.f32.mrf.mxu1 }
 0x88f   : > { %v1693_v6 = vpop.f32.mrf.mxu1 }
 0x890   : > { %1748 = vrot.lane.b32.xlu0 %v5546_v60, %s8451_s20 }
 0x891   : > { %v5549_v9 = vpop.f32.mrf.mxu1 }
 0x893   : > { %v1703_v10 = vpop.f32.mrf.mxu1 }
 0x894   : > { %1746 = vrot.lane.b32.xlu0 %v1693_v6, %s8451_s20 }
 0x895   : > { %v5552_v11 = vpop.f32.mrf.mxu1 }
 0x897   : > { %v1713_v12 = vpop.f32.mrf.mxu1 }
 0x899   : > { %v5555_v13 = vpop.f32.mrf.mxu1 }
 0x89b   : > { %v1723_v15 = vpop.f32.mrf.mxu1 }
 0x89d   : > { %v5558_v16 = vpop.f32.mrf.mxu1 }
 0x89e   : > { %1760 = vrot.lane.b32.xlu1 %v5558_v16, %s8493_s26 }
 0x89f   : > { %v1733_v5 = vpop.f32.mrf.mxu1 }
 0x8a0   : > { %1758 = vrot.lane.b32.xlu0 %v1733_v5, %s8493_s26 }
 0x8a2   : > { %1756 = vrot.lane.b32.xlu1 %v5555_v13, %s8493_s26 }
 0x8a4   : > { %1781 = vperm.xlu0 %5997, %v4899_v17  }
 0x8a6   : > { %1754 = vrot.lane.b32.xlu1 %v1723_v15, %s8493_s26 }
 0x8fc   : > { %v1745_v28 = vpop.permute.xlu1 %1744 }
 0x8fd   : > { %v1751_v36 = vsel %vm682_vm2, 0.0, %v1745_v28 }
 0x8fe   : > { %v1743_v19 = vpop.permute.xlu0 %1742  ;;  %v1767_v46 = vadd.f32 %v5549_v9, %v1751_v36 }
 0x8ff   : > { %v1750_v3 = vsel %vm682_vm2, 0.0, %v1743_v19 }
 0x900   : > { %v1766_v9 = vadd.f32 %v1750_v3, %v1703_v10 }
 0x902   : > { %v1749_v25 = vpop.permute.xlu0 %1748 }
 0x903   : > { %v1753_v31 = vsel %vm682_vm2, 0.0, %v1749_v25 }
 0x904   : > { %v1769_v34 = vadd.f32 %v5552_v11, %v1753_v31 }
 0x906   : > { %v1747_v29 = vpop.permute.xlu0 %1746 }
 0x907   : > { %v1752_v32 = vsel %vm682_vm2, 0.0, %v1747_v29 }
 0x908   : > { %v1768_v40 = vadd.f32 %v1752_v32, %v1713_v12 }
 0x910   : > { %v1761_v35 = vpop.permute.xlu1 %1760 }
 0x911   : > { %v1765_v38 = vsel %vm695_vm3, 0.0, %v1761_v35 }
 0x912   : > { %v1773_v42 = vadd.f32 %v1769_v34, %v1765_v38  ;;  %v1759_v43 = vpop.permute.xlu0 %1758 }
 0x913   : > { %v1764_v44 = vsel %vm695_vm3, 0.0, %v1759_v43 }
 0x914   : > { %v1802_v47 = vadd.f32 %v7024_v21, %v1773_v42  ;;  %v1772_v54 = vadd.f32 %v1768_v40, %v1764_v44  ;;  %v1757_v49 = vpop.permute.xlu1 %1756 }
 0x915   : > { %v1763_v59 = vsel %vm695_vm3, 0.0, %v1757_v49 }
 0x916   : > { %v1806_v61 = vsub.f32 0.0, %v1802_v47  ;;  %v1801_v62 = vadd.f32 %v7022_v18, %v1772_v54  ;;  %v1771_v14 = vadd.f32 %v1767_v46, %v1763_v59 }
 0x918   : > { %v1813_v63 = vmul.f32 1.442695, %v1806_v61  ;;  %v1805_v1 = vsub.f32 0.0, %v1801_v62  ;;  %v1800_v50 = vadd.f32 %v7026_v27, %v1771_v14  ;;  %v1755_v2 = vpop.permute.xlu1 %1754 }
 0x919   : > { %v1762_v6 = vsel %vm695_vm3, 0.0, %v1755_v2 }
 0x91a   : > { %6031 = vpow2.f32 %v1813_v63  ;;  %v1811_v4 = vmul.f32 1.442695, %v1805_v1  ;;  %v1804_v60 = vsub.f32 0.0, %v1800_v50  ;;  %v1770_v12 = vadd.f32 %v1766_v9, %v1762_v6 }
 0x91c   : > { %6033 = vpow2.f32 %v1811_v4  ;;  %v1809_v11 = vmul.f32 1.442695, %v1804_v60 }
 0x91e   : > { %6035 = vpow2.f32 %v1809_v11 }
 0x91f   : > { %v7047_v13 = vpop.permute.xlu0 %1781 }
 0x920   : > { %v1799_v15 = vadd.f32 %v7047_v13, %v1770_v12 }
 0x922   : > { %v1803_v16 = vsub.f32 0.0, %v1799_v15 }
 0x924   : > { %v1807_v5 = vmul.f32 1.442695, %v1803_v16 }
 0x926   : > { %6037 = vpow2.f32 %v1807_v5 }
 0x927   : > { %v6032_v17 = vpop.eup %6031 }
 0x928   : > { %v1818_v19 = vadd.f32 1.0, %v6032_v17 }
 0x929   : > { %v6034_v25 = vpop.eup %6033 }
 0x92a   : > { %6039 = vrcp.f32 %v1818_v19  ;;  %v1817_v28 = vadd.f32 1.0, %v6034_v25 }
 0x92b   : > { %v6036_v29 = vpop.eup %6035 }
 0x92c   : > { %6041 = vrcp.f32 %v1817_v28  ;;  %v1816_v31 = vadd.f32 1.0, %v6036_v29 }
 0x92e   : > { %6043 = vrcp.f32 %v1816_v31 }
 0x933   : > { %v6038_v10 = vpop.eup %6037 }
 0x934   : > { %v1815_v32 = vadd.f32 1.0, %v6038_v10 }
 0x936   : > { %6045 = vrcp.f32 %v1815_v32 }
 0x937   : > { %v6040_v34 = vpop.eup %6039 }
 0x938   : > { %1829 = vadd.xlane.f32.xlu0 %v6040_v34 }
 0x939   : > { %v6042_v35 = vpop.eup %6041 }
 0x93a   : > { %1827 = vadd.xlane.f32.xlu1 %v6042_v35 }
 0x93b   : > { %v6044_v36 = vpop.eup %6043 }
 0x93c   : > { %1825 = vadd.xlane.f32.xlu0 %v6044_v36 }
 0x943   : > { %v6046_v38 = vpop.eup %6045 }
 0x944   : > { %1823 = vadd.xlane.f32.xlu0 %v6046_v38 }
 0x9c1   : > { %v1830_v40 = vpop.xlane.xlu0 %1829 }
 0x9c2   : > { %v1834_v42 = vmul.f32 0.0078125, %v1830_v40 }
 0x9c3   : > { %v1828_v43 = vpop.xlane.xlu1 %1827 }
 0x9c4   : > { %v1833_v44 = vmul.f32 0.0078125, %v1828_v43  ;;  %v7050_v46 = vsub.f32 %v6040_v34, %v1834_v42 }
 0x9c5   : > { %v1826_v47 = vpop.xlane.xlu0 %1825 }
 0x9c6   : > { %v1832_v54 = vmul.f32 0.0078125, %v1826_v47  ;;  %v1842_v49 = vmul.f32 %v7050_v46, %v7050_v46  ;;  %v7054_v59 = vsub.f32 %v6042_v35, %v1833_v44 }
 0x9c8   : > { %1849 = vadd.xlane.f32.xlu1 %v1842_v49  ;;  %v1841_v61 = vmul.f32 %v7054_v59, %v7054_v59  ;;  %v7058_v62 = vsub.f32 %v6044_v36, %v1832_v54 }
 0x9ca   : > { %1847 = vadd.xlane.f32.xlu0 %v1841_v61  ;;  %v1840_v14 = vmul.f32 %v7058_v62, %v7058_v62 }
 0x9cc   : > { %1845 = vadd.xlane.f32.xlu1 %v1840_v14 }
 0x9cd   : > { %v1824_v63 = vpop.xlane.xlu0 %1823 }
 0x9ce   : > { %v1831_v1 = vmul.f32 0.0078125, %v1824_v63 }
 0x9d0   : > { %v7062_v50 = vsub.f32 %v6046_v38, %v1831_v1 }
 0x9d2   : > { %v1839_v2 = vmul.f32 %v7062_v50, %v7062_v50 }
 0x9d4   : > { %1843 = vadd.xlane.f32.xlu0 %v1839_v2  ;;  %v4903_v2 = vld [vmem:[%s8422_s7] ss:$0 sm:$0xff] }
 0xa51   : > { %v1850_v3 = vpop.xlane.xlu1 %1849 }
 0xa52   : > { %v1854_v4 = vmul.f32 0.007874016, %v1850_v3 }
 0xa53   : > { %v1848_v60 = vpop.xlane.xlu0 %1847 }
 0xa54   : > { %6047 = vrsqrt.f32 %v1854_v4  ;;  %v1853_v6 = vmul.f32 0.007874016, %v1848_v60  ;;  %vm1878_vm0 = vcmp.eq.f32.partialorder %v1854_v4, inf  ;;  %v1881_v17 = vand.u32 2147483648, %v1854_v4 }
 0xa55   : > { %v1846_v9 = vpop.xlane.xlu1 %1845  ;;  %vm1880_vm4 = vcmp.eq.f32.partialorder %v1854_v4, 0.0 }
 0xa56   : > { %v1852_v11 = vmul.f32 0.007874016, %v1846_v9  ;;  %6049 = vrsqrt.f32 %v1853_v6  ;;  %vm1871_vm5 = vcmp.eq.f32.partialorder %v1853_v6, inf  ;;  %v1874_v32 = vand.u32 2147483648, %v1853_v6 }
 0xa57   : > { %vm1873_vm6 = vcmp.eq.f32.partialorder %v1853_v6, 0.0 }
 0xa58   : > { %6051 = vrsqrt.f32 %v1852_v11  ;;  %vm1864_vm7 = vcmp.eq.f32.partialorder %v1852_v11, inf  ;;  %v1867_v36 = vand.u32 2147483648, %v1852_v11  ;;  %vm1866_vm8 = vcmp.eq.f32.partialorder %v1852_v11, 0.0 }
 0xa5d   : > { %v1844_v12 = vpop.xlane.xlu0 %1843 }
 0xa5e   : > { %v1851_v15 = vmul.f32 0.007874016, %v1844_v12 }
 0xa60   : > { %6053 = vrsqrt.f32 %v1851_v15  ;;  %vm1857_vm9 = vcmp.eq.f32.partialorder %v1851_v15, inf  ;;  %v1860_v49 = vand.u32 2147483648, %v1851_v15  ;;  %vm1859_vm10 = vcmp.eq.f32.partialorder %v1851_v15, 0.0 }
 0xa61   : > { %v6048_v16 = vpop.eup %6047 }
 0xa62   : > { %v1877_v5 = vmul.f32 %v6048_v16, %v1854_v4 }
 0xa63   : > { %v6050_v19 = vpop.eup %6049 }
 0xa64   : > { %v1879_v25 = vsel %vm1878_vm0, %v1854_v4, %v1877_v5  ;;  %v1870_v31 = vmul.f32 %v6050_v19, %v1853_v6  ;;  %v4904_v4 = vld [vmem:[%s8423_s8] ss:$0 sm:$0xff] }
 0xa65   : > { %v6052_v28 = vpop.eup %6051  ;;  %v1882_v29 = vsel %vm1880_vm4, %v1881_v17, %v1879_v25 }
 0xa66   : > { %v1886_v10 = vadd.f32 1e-06, %v1882_v29  ;;  %v1863_v34 = vmul.f32 %v6052_v28, %v1852_v11  ;;  %v1872_v35 = vsel %vm1871_vm5, %v1853_v6, %v1870_v31  ;;  %v7100_v31 = vld [vmem:[%s8418_s3 + $0x20] sm:$0xff] }
 0xa67   : > { %v1875_v38 = vsel %vm1873_vm6, %v1874_v32, %v1872_v35  ;;  %v7114_v32 = vld [vmem:[%s8418_s3 + $0x30] sm:$0xff]  ;;  %v7128_v35 = vld [vmem:[%s8418_s3 + $0x40] sm:$0xff] }
 0xa68   : > { %v1865_v40 = vsel %vm1864_vm7, %v1852_v11, %v1863_v34  ;;  %6055 = vrcp.f32 %v1886_v10  ;;  %v1885_v42 = vadd.f32 1e-06, %v1875_v38  ;;  %v7107_v10 = vld [vmem:[%s8418_s3 + $0x28] sm:$0xff]  ;;  %v7121_v34 = vld [vmem:[%s8418_s3 + $0x38] sm:$0xff]  ;;  %v7142_v38 = vld [vmem:[%s8418_s3 + $0x50] sm:$0xff] }
 0xa69   : > { %v1868_v43 = vsel %vm1866_vm8, %v1867_v36, %v1865_v40  ;;  %v7135_v36 = vld [vmem:[%s8418_s3 + $0x48] sm:$0xff]  ;;  %v7149_v40 = vld [vmem:[%s8418_s3 + $0x58] sm:$0xff] }
 0xa6a   : > { %v1884_v44 = vadd.f32 1e-06, %v1868_v43  ;;  %6057 = vrcp.f32 %v1885_v42 }
 0xa6c   : > { %6059 = vrcp.f32 %v1884_v44 }
 0xa6d   : > { %v6054_v47 = vpop.eup %6053 }
 0xa6e   : > { %v1856_v54 = vmul.f32 %v6054_v47, %v1851_v15 }
 0xa70   : > { %v1858_v61 = vsel %vm1857_vm9, %v1851_v15, %v1856_v54 }
 0xa71   : > { %v1861_v14 = vsel %vm1859_vm10, %v1860_v49, %v1858_v61 }
 0xa72   : > { %v1883_v63 = vadd.f32 1e-06, %v1861_v14 }
 0xa74   : > { %6061 = vrcp.f32 %v1883_v63 }
 0xa75   : > { %v6056_v1 = vpop.eup %6055 }
 0xa76   : > { %v1895_v3 = vmul.f32 %v6056_v1, %v7050_v46 }
 0xa77   : > { %v6058_v60 = vpop.eup %6057 }
 0xa78   : > { %v1905_v6 = vmul.f32 %v4903_v2, %v1895_v3  ;;  %v1894_v11 = vmul.f32 %v6058_v60, %v7054_v59  ;;  %v7079_v59 = vld [vmem:[%s8418_s3 + $0x8] sm:$0xff] }
 0xa79   : > { %v6060_v9 = vpop.eup %6059 }
 0xa7a   : > { %v1916_v12 = vadd.f32 %v4904_v4, %v1905_v6  ;;  %v1893_v15 = vmul.f32 %v6060_v9, %v7058_v62  ;;  %v1904_v16 = vmul.f32 %v4903_v2, %v1894_v11  ;;  %v7086_v62 = vld [vmem:[%s8418_s3 + $0x10] sm:$0xff] }
 0xa7c   : > { %5559 = vmatprep.subr.mxu0 %v1916_v12  ;;  %v1903_v5 = vmul.f32 %v4903_v2, %v1893_v15  ;;  %v1915_v17 = vadd.f32 %v4904_v4, %v1904_v16 }
 0xa7d   : > { %5560 = vmatpush3.msra.mxu0 %v1916_v12 }
 0xa7e   : > { %v1914_v19 = vadd.f32 %v4904_v4, %v1903_v5  ;;  %5561 = vmatprep.subr.mxu0 %v1915_v17 }
 0xa7f   : > { %5562 = vmatpush3.msra.mxu0 %v1915_v17 }
 0xa80   : > { %5563 = vmatprep.subr.mxu0 %v1914_v19 }
 0xa81   : > { %v6062_v46 = vpop.eup %6061  ;;  %5564 = vmatpush3.msra.mxu0 %v1914_v19 }
 0xa82   : > { %v1892_v25 = vmul.f32 %v6062_v46, %v7062_v50  ;;  %v7093_v50 = vld [vmem:[%s8418_s3 + $0x18] sm:$0xff] }
 0xa84   : > { %v1902_v28 = vmul.f32 %v4903_v2, %v1892_v25 }
 0xa86   : > { %v1913_v29 = vadd.f32 %v4904_v4, %v1902_v28 }
 0xa88   : > { %5565 = vmatprep.subr.mxu0 %v1913_v29 }
 0xa89   : > { %5566 = vmatpush3.msra.mxu0 %v1913_v29 }
 0xa8a   : > { %5568 = vmatmul.mubr.msk.f32.vlgmr.msra.gmra.mxu0 %vm520_vm1, %v7079_v59 }
 0xa8b   : > { %5570 = vmatprep.mubr.msk.f32.mxu0 %vm520_vm1, %v7086_v62 }
 0xa8e   : > { %5571 = vmatmul.mubr.msk.f32.gmra.mxu0 %vm520_vm1, %v7093_v50 }
 0xa8f   : > { %5573 = vmatprep.mubr.msk.f32.mxu0 %vm520_vm1, %v7100_v31 }
 0xa92   : > { %5574 = vmatmul.mubr.msk.f32.gmra.mxu0 %vm520_vm1, %v7107_v10 }
 0xa93   : > { %5576 = vmatprep.mubr.msk.f32.mxu0 %vm520_vm1, %v7114_v32 }
 0xa96   : > { %5577 = vmatmul.mubr.msk.f32.gmra.mxu0 %vm520_vm1, %v7121_v34 }
 0xa97   : > { %5579 = vmatprep.mubr.msk.f32.mxu0 %vm520_vm1, %v7128_v35 }
 0xa9a   : > { %5580 = vmatmul.mubr.msk.f32.gmra.mxu0 %vm520_vm1, %v7135_v36 }
 0xa9b   : > { %5582 = vmatprep.mubr.msk.f32.mxu0 %vm520_vm1, %v7142_v38 }
 0xa9e   : > { %5583 = vmatmul.mubr.msk.f32.gmra.mxu0 %vm520_vm1, %v7149_v40 }
 0xa9f   : > { %5619 = vmatprep.mubr.msk.f32.mxu0 %vm520_vm1, %v6725_v33 }
 0xb4a   : > { %v5569_v42 = vpop.f32.mrf.mxu0 }
 0xb4b   : > { %2044 = vrot.lane.b32.xlu1 %v5569_v42, %s8451_s20 }
 0xb4c   : > { %v1983_v43 = vpop.f32.mrf.mxu0 }
 0xb4e   : > { %v5572_v44 = vpop.f32.mrf.mxu0 }
 0xb4f   : > { %2048 = vrot.lane.b32.xlu1 %v5572_v44, %s8451_s20 }
 0xb50   : > { %v1993_v47 = vpop.f32.mrf.mxu0 }
 0xb51   : > { %2046 = vrot.lane.b32.xlu0 %v1993_v47, %s8451_s20 }
 0xb52   : > { %v5575_v54 = vpop.f32.mrf.mxu0 }
 0xb54   : > { %v2003_v49 = vpop.f32.mrf.mxu0 }
 0xb56   : > { %v5578_v61 = vpop.f32.mrf.mxu0 }
 0xb58   : > { %v2013_v14 = vpop.f32.mrf.mxu0 }
 0xb5a   : > { %v5581_v63 = vpop.f32.mrf.mxu0 }
 0xb5c   : > { %v2023_v1 = vpop.f32.mrf.mxu0 }
 0xb5e   : > { %v5584_v2 = vpop.f32.mrf.mxu0 }
 0xb5f   : > { %2060 = vrot.lane.b32.xlu1 %v5584_v2, %s8493_s26 }
 0xb60   : > { %v2033_v33 = vpop.f32.mrf.mxu0 }
 0xb61   : > { %2058 = vrot.lane.b32.xlu0 %v2033_v33, %s8493_s26 }
 0xb63   : > { %2042 = vrot.lane.b32.xlu1 %v1983_v43, %s8451_s20 }
 0xb65   : > { %2056 = vrot.lane.b32.xlu0 %v5581_v63, %s8493_s26 }
 0xb67   : > { %2054 = vrot.lane.b32.xlu1 %v2023_v1, %s8493_s26 }
 0xbbd   : > { %v2045_v3 = vpop.permute.xlu1 %2044 }
 0xbbe   : > { %v2051_v19 = vsel %vm682_vm2, 0.0, %v2045_v3 }
 0xbbf   : > { %v2067_v43 = vadd.f32 %v5575_v54, %v2051_v19 }
 0xbc1   : > { %v2049_v4 = vpop.permute.xlu1 %2048 }
 0xbc2   : > { %v2053_v6 = vsel %vm682_vm2, 0.0, %v2049_v4 }
 0xbc3   : > { %v2047_v60 = vpop.permute.xlu0 %2046  ;;  %v2069_v11 = vadd.f32 %v5578_v61, %v2053_v6 }
 0xbc4   : > { %v2052_v9 = vsel %vm682_vm2, 0.0, %v2047_v60 }
 0xbc5   : > { %v2068_v16 = vadd.f32 %v2052_v9, %v2013_v14 }
 0xbd1   : > { %v2061_v12 = vpop.permute.xlu1 %2060 }
 0xbd2   : > { %v2065_v15 = vsel %vm695_vm3, 0.0, %v2061_v12 }
 0xbd3   : > { %v2073_v5 = vadd.f32 %v2069_v11, %v2065_v15  ;;  %v2059_v17 = vpop.permute.xlu0 %2058 }
 0xbd4   : > { %v2064_v46 = vsel %vm695_vm3, 0.0, %v2059_v17 }
 0xbd5   : > { %v2077_v25 = vadd.f32 %v2073_v5, %v6596_v53  ;;  %v2072_v28 = vadd.f32 %v2068_v16, %v2064_v46  ;;  %v2043_v29 = vpop.permute.xlu1 %2042 }
 0xbd6   : > { %v2050_v42 = vsel %vm682_vm2, 0.0, %v2043_v29 }
 0xbd7   : > { %v2081_v44 = vsub.f32 0.0, %v2077_v25  ;;  %v2076_v47 = vadd.f32 %v2072_v28, %v6594_v51  ;;  %v2057_v61 = vpop.permute.xlu0 %2056  ;;  %v2066_v2 = vadd.f32 %v2050_v42, %v2003_v49 }
 0xbd8   : > { %v2063_v14 = vsel %vm695_vm3, 0.0, %v2057_v61 }
 0xbd9   : > { %v2088_v63 = vmul.f32 1.442695, %v2081_v44  ;;  %v2080_v1 = vsub.f32 0.0, %v2076_v47  ;;  %v2071_v33 = vadd.f32 %v2067_v43, %v2063_v14  ;;  %v2055_v3 = vpop.permute.xlu1 %2054 }
 0xbda   : > { %v2062_v4 = vsel %vm695_vm3, 0.0, %v2055_v3 }
 0xbdb   : > { %6063 = vpow2.f32 %v2088_v63  ;;  %v2086_v60 = vmul.f32 1.442695, %v2080_v1  ;;  %v2075_v6 = vadd.f32 %v2071_v33, %v6598_v56  ;;  %v2070_v54 = vadd.f32 %v2066_v2, %v2062_v4 }
 0xbdd   : > { %6065 = vpow2.f32 %v2086_v60  ;;  %v2079_v9 = vsub.f32 0.0, %v2075_v6  ;;  %v2074_v11 = vadd.f32 %v2070_v54, %v6623_v30 }
 0xbdf   : > { %v2084_v12 = vmul.f32 1.442695, %v2079_v9  ;;  %v2078_v15 = vsub.f32 0.0, %v2074_v11 }
 0xbe1   : > { %6067 = vpow2.f32 %v2084_v12  ;;  %v2082_v16 = vmul.f32 1.442695, %v2078_v15 }
 0xbe3   : > { %6069 = vpow2.f32 %v2082_v16 }
 0xbe8   : > { %v6064_v49 = vpop.eup %6063 }
 0xbe9   : > { %v2093_v5 = vadd.f32 1.0, %v6064_v49 }
 0xbea   : > { %v6066_v17 = vpop.eup %6065 }
 0xbeb   : > { %6071 = vrcp.f32 %v2093_v5  ;;  %v2092_v19 = vadd.f32 1.0, %v6066_v17 }
 0xbed   : > { %6073 = vrcp.f32 %v2092_v19 }
 0xbee   : > { %v6068_v46 = vpop.eup %6067 }
 0xbef   : > { %v2091_v25 = vadd.f32 1.0, %v6068_v46 }
 0xbf0   : > { %v6070_v28 = vpop.eup %6069 }
 0xbf1   : > { %6075 = vrcp.f32 %v2091_v25  ;;  %v2090_v29 = vadd.f32 1.0, %v6070_v28 }
 0xbf3   : > { %6077 = vrcp.f32 %v2090_v29 }
 0xbf8   : > { %v6072_v42 = vpop.eup %6071 }
 0xbf9   : > { %2104 = vadd.xlane.f32.xlu0 %v6072_v42 }
 0xbfa   : > { %v6074_v43 = vpop.eup %6073 }
 0xbfb   : > { %2102 = vadd.xlane.f32.xlu1 %v6074_v43 }
 0xbfe   : > { %v6076_v44 = vpop.eup %6075 }
 0xbff   : > { %2100 = vadd.xlane.f32.xlu0 %v6076_v44 }
 0xc00   : > { %v6078_v47 = vpop.eup %6077 }
 0xc03   : > { %2098 = vadd.xlane.f32.xlu0 %v6078_v47 }
 0xc82   : > { %v2105_v61 = vpop.xlane.xlu0 %2104 }
 0xc83   : > { %v2109_v14 = vmul.f32 0.0078125, %v2105_v61 }
 0xc84   : > { %v2103_v63 = vpop.xlane.xlu1 %2102 }
 0xc85   : > { %v2108_v1 = vmul.f32 0.0078125, %v2103_v63  ;;  %v7183_v2 = vsub.f32 %v6072_v42, %v2109_v14 }
 0xc87   : > { %v2117_v33 = vmul.f32 %v7183_v2, %v7183_v2  ;;  %v7187_v3 = vsub.f32 %v6074_v43, %v2108_v1 }
 0xc88   : > { %v2101_v4 = vpop.xlane.xlu0 %2100 }
 0xc89   : > { %v2107_v60 = vmul.f32 0.0078125, %v2101_v4  ;;  %2124 = vadd.xlane.f32.xlu1 %v2117_v33  ;;  %v2116_v6 = vmul.f32 %v7187_v3, %v7187_v3 }
 0xc8b   : > { %2122 = vadd.xlane.f32.xlu0 %v2116_v6  ;;  %v7191_v54 = vsub.f32 %v6076_v44, %v2107_v60 }
 0xc8c   : > { %v2099_v9 = vpop.xlane.xlu0 %2098 }
 0xc8d   : > { %v2106_v11 = vmul.f32 0.0078125, %v2099_v9  ;;  %v2115_v12 = vmul.f32 %v7191_v54, %v7191_v54 }
 0xc8f   : > { %2120 = vadd.xlane.f32.xlu1 %v2115_v12  ;;  %v7195_v15 = vsub.f32 %v6078_v47, %v2106_v11 }
 0xc91   : > { %v2114_v16 = vmul.f32 %v7195_v15, %v7195_v15 }
 0xc93   : > { %2118 = vadd.xlane.f32.xlu0 %v2114_v16 }
 0xd12   : > { %v2125_v49 = vpop.xlane.xlu1 %2124 }
 0xd13   : > { %v2129_v5 = vmul.f32 0.007874016, %v2125_v49 }
 0xd14   : > { %v2123_v17 = vpop.xlane.xlu0 %2122 }
 0xd15   : > { %6079 = vrsqrt.f32 %v2129_v5  ;;  %v2128_v19 = vmul.f32 0.007874016, %v2123_v17  ;;  %vm2153_vm11 = vcmp.eq.f32.partialorder %v2129_v5, inf  ;;  %v2156_v44 = vand.u32 2147483648, %v2129_v5 }
 0xd16   : > { %vm2155_vm0 = vcmp.eq.f32.partialorder %v2129_v5, 0.0 }
 0xd17   : > { %6081 = vrsqrt.f32 %v2128_v19  ;;  %vm2146_vm4 = vcmp.eq.f32.partialorder %v2128_v19, inf  ;;  %v2149_v33 = vand.u32 2147483648, %v2128_v19  ;;  %vm2148_vm5 = vcmp.eq.f32.partialorder %v2128_v19, 0.0 }
 0xd18   : > { %v2121_v46 = vpop.xlane.xlu1 %2120 }
 0xd19   : > { %v2127_v25 = vmul.f32 0.007874016, %v2121_v46 }
 0xd1b   : > { %6083 = vrsqrt.f32 %v2127_v25  ;;  %vm2139_vm6 = vcmp.eq.f32.partialorder %v2127_v25, inf  ;;  %v2142_v12 = vand.u32 2147483648, %v2127_v25  ;;  %vm2141_vm7 = vcmp.eq.f32.partialorder %v2127_v25, 0.0 }
 0xd1c   : > { %v2119_v28 = vpop.xlane.xlu0 %2118 }
 0xd1d   : > { %v2126_v29 = vmul.f32 0.007874016, %v2119_v28 }
 0xd1f   : > { %6085 = vrsqrt.f32 %v2126_v29  ;;  %vm2132_vm8 = vcmp.eq.f32.partialorder %v2126_v29, inf  ;;  %v2135_v28 = vand.u32 2147483648, %v2126_v29  ;;  %vm2134_vm9 = vcmp.eq.f32.partialorder %v2126_v29, 0.0 }
 0xd22   : > { %v6080_v42 = vpop.eup %6079 }
 0xd23   : > { %v2152_v43 = vmul.f32 %v6080_v42, %v2129_v5 }
 0xd24   : > { %v6082_v47 = vpop.eup %6081 }
 0xd25   : > { %v2154_v61 = vsel %vm2153_vm11, %v2129_v5, %v2152_v43  ;;  %v2145_v63 = vmul.f32 %v6082_v47, %v2128_v19 }
 0xd26   : > { %v2157_v14 = vsel %vm2155_vm0, %v2156_v44, %v2154_v61 }
 0xd27   : > { %v2161_v1 = vadd.f32 1e-06, %v2157_v14  ;;  %v2147_v60 = vsel %vm2146_vm4, %v2128_v19, %v2145_v63 }
 0xd28   : > { %v6084_v4 = vpop.eup %6083  ;;  %v2150_v6 = vsel %vm2148_vm5, %v2149_v33, %v2147_v60 }
 0xd29   : > { %v2138_v9 = vmul.f32 %v6084_v4, %v2127_v25  ;;  %6087 = vrcp.f32 %v2161_v1  ;;  %v2160_v11 = vadd.f32 1e-06, %v2150_v6 }
 0xd2b   : > { %v2140_v16 = vsel %vm2139_vm6, %v2127_v25, %v2138_v9  ;;  %6089 = vrcp.f32 %v2160_v11  ;;  %v7203_v25 = vld [vmem:[%s8420_s5] ss:$0 sm:$0xff] }
 0xd2c   : > { %v6086_v49 = vpop.eup %6085  ;;  %v2143_v17 = vsel %vm2141_vm7, %v2142_v12, %v2140_v16 }
 0xd2d   : > { %v2159_v5 = vadd.f32 1e-06, %v2143_v17  ;;  %v2131_v46 = vmul.f32 %v6086_v49, %v2126_v29  ;;  %v7238_v49 = vld [vmem:[%s8418_s3 + $0x78] sm:$0xff]  ;;  %v7245_v17 = vld [vmem:[%s8418_s3 + $0x80] sm:$0xff] }
 0xd2f   : > { %v2133_v42 = vsel %vm2132_vm8, %v2126_v29, %v2131_v46  ;;  %6091 = vrcp.f32 %v2159_v5  ;;  %v7210_v29 = vld [vmem:[%s8421_s6] ss:$0 sm:$0xff]  ;;  %v7252_v5 = vld [vmem:[%s8418_s3 + $0x88] sm:$0xff]  ;;  %v7259_v46 = vld [vmem:[%s8418_s3 + $0x90] sm:$0xff] }
 0xd30   : > { %v2136_v43 = vsel %vm2134_vm9, %v2135_v28, %v2133_v42  ;;  %v7266_v28 = vld [vmem:[%s8418_s3 + $0x98] sm:$0xff]  ;;  %v7273_v42 = vld [vmem:[%s8418_s3 + $0xa0] sm:$0xff] }
 0xd31   : > { %v2158_v19 = vadd.f32 1e-06, %v2136_v43  ;;  %v7280_v43 = vld [vmem:[%s8418_s3 + $0xa8] sm:$0xff] }
 0xd33   : > { %6093 = vrcp.f32 %v2158_v19  ;;  %v7287_v19 = vld [vmem:[%s8418_s3 + $0xb0] sm:$0xff] }
 0xd36   : > { %v6088_v44 = vpop.eup %6087 }
 0xd37   : > { %v2169_v47 = vmul.f32 %v6088_v44, %v7183_v2  ;;  %v7294_v44 = vld [vmem:[%s8418_s3 + $0xb8] sm:$0xff] }
 0xd38   : > { %v6090_v61 = vpop.eup %6089 }
 0xd39   : > { %v2173_v14 = vmul.f32 %v7203_v25, %v2169_v47  ;;  %v2168_v63 = vmul.f32 %v6090_v61, %v7187_v3  ;;  %v7301_v47 = vld [vmem:[%s8418_s3 + $0x120] sm:$0xff] }
 0xd3a   : > { %8494 = vst [vmem:[#allocation9_spill] sm:$0xff] %v7301_v47 }
 0xd3b   : > { %v2177_v1 = vadd.f32 %v7210_v29, %v2173_v14  ;;  %v2172_v2 = vmul.f32 %v7203_v25, %v2168_v63 }
 0xd3c   : > { %v6092_v33 = vpop.eup %6091 }
 0xd3d   : > { %5585 = vmatprep.subr.mxu1 %v2177_v1  ;;  %v2167_v4 = vmul.f32 %v6092_v33, %v7191_v54  ;;  %v2176_v60 = vadd.f32 %v7210_v29, %v2172_v2  ;;  %v7224_v54 = vld [vmem:[%s8418_s3 + $0x68] sm:$0xff] }
 0xd3e   : > { %5586 = vmatpush3.msra.mxu1 %v2177_v1 }
 0xd3f   : > { %v2171_v6 = vmul.f32 %v7203_v25, %v2167_v4  ;;  %5587 = vmatprep.subr.mxu1 %v2176_v60 }
 0xd40   : > { %v6094_v9 = vpop.eup %6093  ;;  %5588 = vmatpush3.msra.mxu1 %v2176_v60 }
 0xd41   : > { %v2175_v3 = vadd.f32 %v7210_v29, %v2171_v6  ;;  %v2166_v11 = vmul.f32 %v6094_v9, %v7195_v15  ;;  %v7231_v15 = vld [vmem:[%s8418_s3 + $0x70] sm:$0xff] }
 0xd43   : > { %5589 = vmatprep.subr.mxu1 %v2175_v3  ;;  %v2170_v12 = vmul.f32 %v7203_v25, %v2166_v11 }
 0xd44   : > { %5590 = vmatpush3.msra.mxu1 %v2175_v3 }
 0xd45   : > { %v2174_v16 = vadd.f32 %v7210_v29, %v2170_v12 }
 0xd47   : > { %5591 = vmatprep.subr.mxu1 %v2174_v16 }
 0xd48   : > { %5592 = vmatpush3.msra.mxu1 %v2174_v16 }
 0xd49   : > { %5594 = vmatmul.mubr.msk.f32.vlgmr.msra.gmra.mxu1 %vm520_vm1, %v7224_v54 }
 0xd4a   : > { %5596 = vmatprep.mubr.msk.f32.mxu1 %vm520_vm1, %v7231_v15 }
 0xd4d   : > { %5597 = vmatmul.mubr.msk.f32.gmra.mxu1 %vm520_vm1, %v7238_v49 }
 0xd4e   : > { %5599 = vmatprep.mubr.msk.f32.mxu1 %vm520_vm1, %v7245_v17 }
 0xd51   : > { %5600 = vmatmul.mubr.msk.f32.gmra.mxu1 %vm520_vm1, %v7252_v5 }
 0xd52   : > { %5602 = vmatprep.mubr.msk.f32.mxu1 %vm520_vm1, %v7259_v46 }
 0xd55   : > { %5603 = vmatmul.mubr.msk.f32.gmra.mxu1 %vm520_vm1, %v7266_v28 }
 0xd56   : > { %5605 = vmatprep.mubr.msk.f32.mxu1 %vm520_vm1, %v7273_v42 }
 0xd59   : > { %5606 = vmatmul.mubr.msk.f32.gmra.mxu1 %vm520_vm1, %v7280_v43 }
 0xd5a   : > { %5608 = vmatprep.mubr.msk.f32.mxu1 %vm520_vm1, %v7287_v19 }
 0xd5d   : > { %5609 = vmatmul.mubr.msk.f32.gmra.mxu1 %vm520_vm1, %v7294_v44 }
 0xd5e   : > { %5645 = vmatprep.mubr.msk.f32.mxu1 %vm520_vm1, %v7301_v47 }
 0xe09   : > { %v5595_v61 = vpop.f32.mrf.mxu1 }
 0xe0a   : > { %2305 = vrot.lane.b32.xlu1 %v5595_v61, %s8451_s20 }
 0xe0b   : > { %v2244_v14 = vpop.f32.mrf.mxu1 }
 0xe0d   : > { %v5598_v63 = vpop.f32.mrf.mxu1 }
 0xe0e   : > { %2309 = vrot.lane.b32.xlu1 %v5598_v63, %s8451_s20 }
 0xe0f   : > { %v2254_v1 = vpop.f32.mrf.mxu1 }
 0xe10   : > { %2307 = vrot.lane.b32.xlu0 %v2254_v1, %s8451_s20 }
 0xe11   : > { %v5601_v33 = vpop.f32.mrf.mxu1 }
 0xe13   : > { %v2264_v2 = vpop.f32.mrf.mxu1 }
 0xe15   : > { %v5604_v4 = vpop.f32.mrf.mxu1 }
 0xe17   : > { %v2274_v60 = vpop.f32.mrf.mxu1 }
 0xe19   : > { %v5607_v6 = vpop.f32.mrf.mxu1 }
 0xe1b   : > { %v2284_v9 = vpop.f32.mrf.mxu1 }
 0xe1d   : > { %v5610_v3 = vpop.f32.mrf.mxu1 }
 0xe1e   : > { %2321 = vrot.lane.b32.xlu1 %v5610_v3, %s8493_s26 }
 0xe1f   : > { %v2294_v11 = vpop.f32.mrf.mxu1 }
 0xe20   : > { %2319 = vrot.lane.b32.xlu0 %v2294_v11, %s8493_s26 }
 0xe22   : > { %2303 = vrot.lane.b32.xlu1 %v2244_v14, %s8451_s20  ;;  %s8560_s20 = smov 124  }
 0xe24   : > { %2317 = vrot.lane.b32.xlu0 %v5607_v6, %s8493_s26 }
 0xe26   : > { %2315 = vrot.lane.b32.xlu1 %v2284_v9, %s8493_s26 }
 0xe7c   : > { %v2306_v12 = vpop.permute.xlu1 %2305 }
 0xe7d   : > { %v2312_v6 = vsel %vm682_vm2, 0.0, %v2306_v12 }
 0xe80   : > { %v2310_v16 = vpop.permute.xlu1 %2309 }
 0xe81   : > { %v2314_v63 = vsel %vm682_vm2, 0.0, %v2310_v16 }
 0xe82   : > { %v2308_v61 = vpop.permute.xlu0 %2307  ;;  %v2330_v23 = vadd.f32 %v5604_v4, %v2314_v63 }
 0xe83   : > { %v2313_v1 = vsel %vm682_vm2, 0.0, %v2308_v61  ;;  %v2328_v61 = vadd.f32 %v5601_v33, %v2312_v6  ;;  %v7364_v6 = vld [vmem:[%s8418_s3 + $0xe8] sm:$0xff] }
 0xe84   : > { %v2329_v20 = vadd.f32 %v2313_v1, %v2274_v60  ;;  %8499 = vst [vmem:[#allocation14_spill] sm:$0xff] %v7364_v6 }
 0xe90   : > { %v2322_v3 = vpop.permute.xlu1 %2321 }
 0xe91   : > { %v2326_v11 = vsel %vm695_vm3, 0.0, %v2322_v3 }
 0xe92   : > { %v2334_v14 = vadd.f32 %v2330_v23, %v2326_v11  ;;  %v2320_v26 = vpop.permute.xlu0 %2319  ;;  %v7350_v11 = vld [vmem:[%s8418_s3 + $0xd8] sm:$0xff] }
 0xe93   : > { %v2325_v9 = vsel %vm695_vm3, 0.0, %v2320_v26  ;;  %8497 = vst [vmem:[#allocation12_spill] sm:$0xff] %v7350_v11 }
 0xe94   : > { %v2333_v24 = vadd.f32 %v2329_v20, %v2325_v9  ;;  %v2304_v47 = vpop.permute.xlu1 %2303  ;;  %v2338_v16 = vadd.f32 %v2334_v14, %v6741_v39  ;;  %v7357_v14 = vld [vmem:[%s8418_s3 + $0xe0] sm:$0xff]  ;;  %v7371_v9 = vld [vmem:[%s8418_s3 + $0xf0] sm:$0xff] }
 0xe95   : > { %v2311_v4 = vsel %vm682_vm2, 0.0, %v2304_v47  ;;  %8498 = vst [vmem:[#allocation13_spill] sm:$0xff] %v7357_v14  ;;  %8500 = vst [vmem:[#allocation15_spill] sm:$0xff] %v7371_v9 }
 0xe96   : > { %5611 = vmatprep.subr.mxu0 %v2338_v16  ;;  %v2318_v63 = vpop.permute.xlu0 %2317  ;;  %v2337_v60 = vadd.f32 %v2333_v24, %v6743_v41  ;;  %v2327_v12 = vadd.f32 %v2311_v4, %v2264_v2  ;;  %v7336_v24 = vld [vmem:[%s8418_s3 + $0xc8] sm:$0xff]  ;;  %v7343_v2 = vld [vmem:[%s8418_s3 + $0xd0] sm:$0xff]  ;;  %v7385_v4 = vld [vmem:[%s8418_s3 + $0x100] sm:$0xff] }
 0xe97   : > { %v2324_v23 = vsel %vm695_vm3, 0.0, %v2318_v63  ;;  %5612 = vmatpush3.msra.mxu0 %v2338_v16  ;;  %8495 = vst [vmem:[#allocation10_spill] sm:$0xff] %v7336_v24  ;;  %8496 = vst [vmem:[#allocation11_spill] sm:$0xff] %v7343_v2  ;;  %v7378_v16 = vld [vmem:[%s8418_s3 + $0xf8] sm:$0xff]  ;;  %v7399_v63 = vld [vmem:[%s8418_s3 + $0x110] sm:$0xff] }
 0xe98   : > { %v2332_v1 = vadd.f32 %v2328_v61, %v2324_v23  ;;  %v2316_v3 = vpop.permute.xlu1 %2315  ;;  %5613 = vmatprep.subr.mxu0 %v2337_v60  ;;  %8501 = vst [vmem:[#allocation16_spill] sm:$0xff] %v7378_v16  ;;  %8502 = vst [vmem:[#allocation17_spill] sm:$0xff] %v7385_v4  ;;  %v7392_v61 = vld [vmem:[%s8418_s3 + $0x108] sm:$0xff]  ;;  %v7413_v23 = vld [vmem:[%s8418_s3 + $0x180] sm:$0xff] }
 0xe99   : > { %v2323_v20 = vsel %vm695_vm3, 0.0, %v2316_v3  ;;  %5614 = vmatpush3.msra.mxu0 %v2337_v60  ;;  %8503 = vst [vmem:[#allocation18_spill] sm:$0xff] %v7392_v61  ;;  %8504 = vst [vmem:[#allocation19_spill] sm:$0xff] %v7399_v63  ;;  %v7406_v60 = vld [vmem:[%s8418_s3 + $0x118] sm:$0xff] }
 0xe9a   : > { %v2331_v26 = vadd.f32 %v2327_v12, %v2323_v20  ;;  %v2336_v47 = vadd.f32 %v2332_v1, %v6739_v37  ;;  %8505 = vst [vmem:[#allocation20_spill] sm:$0xff] %v7406_v60  ;;  %8506 = vst [vmem:[#allocation21_spill] sm:$0xff] %v7413_v23 }
 0xe9c   : > { %5615 = vmatprep.subr.mxu0 %v2336_v47  ;;  %v2335_v33 = vadd.f32 %v2331_v26, %v6764_v8 }
 0xe9d   : > { %5616 = vmatpush3.msra.mxu0 %v2336_v47 }
 0xe9e   : > { %5617 = vmatprep.subr.mxu0 %v2335_v33 }
 0xe9f   : > { %5618 = vmatpush3.msra.mxu0 %v2335_v33 }
 0xea0   : > { %5620 = vmatmul.mubr.msk.f32.vlgmr.msra.gmra.mxu0 %vm520_vm1, %v7336_v24 }
 0xea1   : > { %5622 = vmatprep.mubr.msk.f32.mxu0 %vm520_vm1, %v7343_v2 }
 0xea4   : > { %5623 = vmatmul.mubr.msk.f32.gmra.mxu0 %vm520_vm1, %v7350_v11 }
 0xea5   : > { %5625 = vmatprep.mubr.msk.f32.mxu0 %vm520_vm1, %v7357_v14 }
 0xea8   : > { %5626 = vmatmul.mubr.msk.f32.gmra.mxu0 %vm520_vm1, %v7364_v6 }
 0xea9   : > { %5628 = vmatprep.mubr.msk.f32.mxu0 %vm520_vm1, %v7371_v9 }
 0xeac   : > { %5629 = vmatmul.mubr.msk.f32.gmra.mxu0 %vm520_vm1, %v7378_v16 }
 0xead   : > { %5631 = vmatprep.mubr.msk.f32.mxu0 %vm520_vm1, %v7385_v4 }
 0xeb0   : > { %5632 = vmatmul.mubr.msk.f32.gmra.mxu0 %vm520_vm1, %v7392_v61 }
 0xeb1   : > { %5634 = vmatprep.mubr.msk.f32.mxu0 %vm520_vm1, %v7399_v63 }
 0xeb4   : > { %5635 = vmatmul.mubr.msk.f32.gmra.mxu0 %vm520_vm1, %v7406_v60 }
 0xeb5   : > { %5671 = vmatprep.mubr.msk.f32.mxu0 %vm520_vm1, %v7413_v23 }
 0xf60   : > { %v5621_v12 = vpop.f32.mrf.mxu0 }
 0xf61   : > { %2466 = vrot.lane.b32.xlu1 %v5621_v12, %s8507_s27 }
 0xf62   : > { %v2405_v1 = vpop.f32.mrf.mxu0 }
 0xf64   : > { %v5624_v3 = vpop.f32.mrf.mxu0 }
 0xf65   : > { %2470 = vrot.lane.b32.xlu0 %v5624_v3, %s8507_s27 }
 0xf66   : > { %v2415_v20 = vpop.f32.mrf.mxu0 }
 0xf67   : > { %2468 = vrot.lane.b32.xlu1 %v2415_v20, %s8507_s27 }
 0xf68   : > { %v5627_v26 = vpop.f32.mrf.mxu0 }
 0xf6a   : > { %v2425_v47 = vpop.f32.mrf.mxu0 }
 0xf6b   : > { %2464 = vrot.lane.b32.xlu1 %v2405_v1, %s8507_s27 }
 0xf6c   : > { %v5630_v33 = vpop.f32.mrf.mxu0 }
 0xf6e   : > { %v2435_v60 = vpop.f32.mrf.mxu0 }
 0xf70   : > { %v5633_v63 = vpop.f32.mrf.mxu0 }
 0xf72   : > { %v2445_v61 = vpop.f32.mrf.mxu0 }
 0xf73   : > { %2476 = vrot.lane.b32.xlu1 %v2445_v61, %s8508_s28 }
 0xf74   : > { %v5636_v23 = vpop.f32.mrf.mxu0 }
 0xf75   : > { %2482 = vrot.lane.b32.xlu0 %v5636_v23, %s8508_s28 }
 0xf76   : > { %v2455_v12 = vpop.f32.mrf.mxu0 }
 0xf79   : > { %2480 = vrot.lane.b32.xlu0 %v2455_v12, %s8508_s28 }
 0xf7d   : > { %2478 = vrot.lane.b32.xlu0 %v5633_v63, %s8508_s28 }
 0xfd3   : > { %v2467_v3 = vpop.permute.xlu1 %2466 }
 0xfd4   : > { %v2473_v24 = vsel %vm1268_vm12, 0.0, %v2467_v3 }
 0xfd7   : > { %v2471_v20 = vpop.permute.xlu0 %2470 }
 0xfd8   : > { %v2475_v1 = vsel %vm1268_vm12, 0.0, %v2471_v20 }
 0xfd9   : > { %v2469_v4 = vpop.permute.xlu1 %2468  ;;  %v2491_v16 = vadd.f32 %v5630_v33, %v2475_v1 }
 0xfda   : > { %v2474_v61 = vsel %vm1268_vm12, 0.0, %v2469_v4 }
 0xfdb   : > { %v2490_v11 = vadd.f32 %v2474_v61, %v2435_v60 }
 0xfdd   : > { %v2465_v9 = vpop.permute.xlu1 %2464 }
 0xfde   : > { %v2472_v33 = vsel %vm1268_vm12, 0.0, %v2465_v9  ;;  %v7455_v9 = vld [vmem:[%s8418_s3 + $0x130] sm:$0xff] }
 0xfdf   : > { %v2488_v4 = vadd.f32 %v2472_v33, %v2425_v47  ;;  %8510 = vst [vmem:[#allocation23_spill] sm:$0xff] %v7455_v9  ;;  %v7469_v47 = vld [vmem:[%s8418_s3 + $0x140] sm:$0xff]  ;;  %v7490_v33 = vld [vmem:[%s8418_s3 + $0x158] sm:$0xff] }
 0xfe0   : > { %8512 = vst [vmem:[#allocation25_spill] sm:$0xff] %v7469_v47  ;;  %8515 = vst [vmem:[#allocation28_spill] sm:$0xff] %v7490_v33 }
 0xfe5   : > { %v2477_v12 = vpop.permute.xlu1 %2476 }
 0xfe7   : > { %v2483_v6 = vpop.permute.xlu0 %2482 }
 0xfe8   : > { %v2487_v23 = vsel %vm1281_vm13, 0.0, %v2483_v6  ;;  %v2484_v6 = vsel %vm1281_vm13, 0.0, %v2477_v12  ;;  %v7476_v12 = vld [vmem:[%s8418_s3 + $0x148] sm:$0xff] }
 0xfe9   : > { %v2495_v14 = vadd.f32 %v2491_v16, %v2487_v23  ;;  %v2489_v16 = vadd.f32 %v5627_v26, %v2473_v24  ;;  %v2492_v61 = vadd.f32 %v2488_v4, %v2484_v6  ;;  %v7448_v24 = vld [vmem:[%s8418_s3 + $0x128] sm:$0xff]  ;;  %v7462_v26 = vld [vmem:[%s8418_s3 + $0x138] sm:$0xff]  ;;  %8513 = vst [vmem:[#allocation26_spill] sm:$0xff] %v7476_v12  ;;  %v7511_v6 = vld [vmem:[%s8418_s3 + $0x170] sm:$0xff] }
 0xfea   : > { %8509 = vst [vmem:[#allocation22_spill] sm:$0xff] %v7448_v24  ;;  %8511 = vst [vmem:[#allocation24_spill] sm:$0xff] %v7462_v26  ;;  %v7525_v4 = vld [vmem:[%s8418_s3] sm:$0xff] }
 0xfeb   : > { %v2481_v2 = vpop.permute.xlu0 %2480  ;;  %v2499_v63 = vadd.f32 %v2495_v14, %v6837_v52  ;;  %8518 = vst [vmem:[#allocation31_spill] sm:$0xff] %v7511_v6  ;;  %8520 = vst [vmem:[#allocation33_spill] sm:$0xff] %v7525_v4 }
 0xfec   : > { %v2486_v20 = vsel %vm1281_vm13, 0.0, %v2481_v2 }
 0xfed   : > { %v2494_v1 = vadd.f32 %v2490_v11, %v2486_v20  ;;  %5637 = vmatprep.subr.mxu1 %v2499_v63  ;;  %v2496_v11 = vadd.f32 %v2492_v61, %v6862_v22  ;;  %v7497_v20 = vld [vmem:[%s8418_s3 + $0x160] sm:$0xff] }
 0xfee   : > { %5638 = vmatpush3.msra.mxu1 %v2499_v63  ;;  %v7483_v63 = vld [vmem:[%s8418_s3 + $0x150] sm:$0xff]  ;;  %8516 = vst [vmem:[#allocation29_spill] sm:$0xff] %v7497_v20 }
 0xfef   : > { %v2479_v60 = vpop.permute.xlu0 %2478  ;;  %v2498_v14 = vadd.f32 %v2494_v1, %v6835_v48  ;;  %8514 = vst [vmem:[#allocation27_spill] sm:$0xff] %v7483_v63  ;;  %v7504_v1 = vld [vmem:[%s8418_s3 + $0x168] sm:$0xff] }
 0xff0   : > { %v2485_v3 = vsel %vm1281_vm13, 0.0, %v2479_v60  ;;  %8517 = vst [vmem:[#allocation30_spill] sm:$0xff] %v7504_v1 }
 0xff1   : > { %v2493_v23 = vadd.f32 %v2489_v16, %v2485_v3  ;;  %5639 = vmatprep.subr.mxu1 %v2498_v14  ;;  %v7518_v16 = vld [vmem:[%s8418_s3 + $0x178] sm:$0xff] }
 0xff2   : > { %5640 = vmatpush3.msra.mxu1 %v2498_v14  ;;  %8519 = vst [vmem:[#allocation32_spill] sm:$0xff] %v7518_v16 }
 0xff3   : > { %v2497_v2 = vadd.f32 %v2493_v23, %v6839_v55 }
 0xff5   : > { %5641 = vmatprep.subr.mxu1 %v2497_v2 }
 0xff6   : > { %5642 = vmatpush3.msra.mxu1 %v2497_v2 }
 0xff7   : > { %5643 = vmatprep.subr.mxu1 %v2496_v11 }
 0xff8   : > { %5644 = vmatpush3.msra.mxu1 %v2496_v11 }
 0xff9   : > { %5646 = vmatmul.mubr.msk.f32.vlgmr.msra.gmra.mxu1 %vm520_vm1, %v7448_v24 }
 0xffa   : > { %5648 = vmatprep.mubr.msk.f32.mxu1 %vm520_vm1, %v7455_v9 }
 0xffd   : > { %5649 = vmatmul.mubr.msk.f32.gmra.mxu1 %vm520_vm1, %v7462_v26 }
 0xffe   : > { %5651 = vmatprep.mubr.msk.f32.mxu1 %vm520_vm1, %v7469_v47 }
0x1001   : > { %5652 = vmatmul.mubr.msk.f32.gmra.mxu1 %vm520_vm1, %v7476_v12 }
0x1002   : > { %5654 = vmatprep.mubr.msk.f32.mxu1 %vm520_vm1, %v7483_v63 }
0x1005   : > { %5655 = vmatmul.mubr.msk.f32.gmra.mxu1 %vm520_vm1, %v7490_v33 }
0x1006   : > { %5657 = vmatprep.mubr.msk.f32.mxu1 %vm520_vm1, %v7497_v20 }
0x1009   : > { %5658 = vmatmul.mubr.msk.f32.gmra.mxu1 %vm520_vm1, %v7504_v1 }
0x100a   : > { %5660 = vmatprep.mubr.msk.f32.mxu1 %vm520_vm1, %v7511_v6 }
0x100d   : > { %5661 = vmatmul.mubr.msk.f32.gmra.mxu1 %vm520_vm1, %v7518_v16 }
0x100e   : > { %5697 = vmatprep.mubr.msk.f32.mxu1 %vm520_vm1, %v7525_v4 }
0x10b9   : > { %v5647_v60 = vpop.f32.mrf.mxu1 }
0x10ba   : > { %2627 = vrot.lane.b32.xlu1 %v5647_v60, %s8521_s29 }
0x10bb   : > { %v2566_v14 = vpop.f32.mrf.mxu1 }
0x10bd   : > { %v5650_v3 = vpop.f32.mrf.mxu1 }
0x10be   : > { %2631 = vrot.lane.b32.xlu0 %v5650_v3, %s8521_s29 }
0x10bf   : > { %v2576_v61 = vpop.f32.mrf.mxu1 }
0x10c0   : > { %2629 = vrot.lane.b32.xlu1 %v2576_v61, %s8521_s29 }
0x10c1   : > { %v5653_v23 = vpop.f32.mrf.mxu1 }
0x10c3   : > { %v2586_v2 = vpop.f32.mrf.mxu1 }
0x10c4   : > { %2625 = vrot.lane.b32.xlu1 %v2566_v14, %s8521_s29 }
0x10c5   : > { %v5656_v11 = vpop.f32.mrf.mxu1 }
0x10c7   : > { %v2596_v16 = vpop.f32.mrf.mxu1 }
0x10c9   : > { %v5659_v6 = vpop.f32.mrf.mxu1 }
0x10cb   : > { %v2606_v1 = vpop.f32.mrf.mxu1 }
0x10cc   : > { %2637 = vrot.lane.b32.xlu1 %v2606_v1, %s8465_s25 }
0x10cd   : > { %v5662_v4 = vpop.f32.mrf.mxu1 }
0x10ce   : > { %2643 = vrot.lane.b32.xlu0 %v5662_v4, %s8465_s25 }
0x10cf   : > { %v2616_v60 = vpop.f32.mrf.mxu1 }
0x10d2   : > { %2641 = vrot.lane.b32.xlu0 %v2616_v60, %s8465_s25 }
0x10d6   : > { %2639 = vrot.lane.b32.xlu0 %v5659_v6, %s8465_s25  ;;  %s6365_s25 = smov [#allocation2]  }
0x10d7   : > { %s6300_s21 = sshll.u32 %s6365_s25, 4  ;;  %s6301_s21 = int_to_ptr.vmem [resolvable:$false] %s6300_s21 }
0x112c   : > { %v2628_v3 = vpop.permute.xlu1 %2627 }
0x112d   : > { %v2634_v24 = vsel %vm1505_vm14, 0.0, %v2628_v3 }
0x1130   : > { %v2632_v61 = vpop.permute.xlu0 %2631 }
0x1131   : > { %v2636_v14 = vsel %vm1505_vm14, 0.0, %v2632_v61 }
0x1132   : > { %v2630_v20 = vpop.permute.xlu1 %2629  ;;  %v2652_v33 = vadd.f32 %v5656_v11, %v2636_v14 }
0x1133   : > { %v2635_v1 = vsel %vm1505_vm14, 0.0, %v2630_v20 }
0x1134   : > { %v2651_v26 = vadd.f32 %v2635_v1, %v2596_v16 }
0x1136   : > { %v2626_v63 = vpop.permute.xlu1 %2625 }
0x1137   : > { %v2633_v11 = vsel %vm1505_vm14, 0.0, %v2626_v63  ;;  %v7567_v63 = vld [vmem:[%s8418_s3 + $0x190] sm:$0xff] }
0x1138   : > { %v2649_v20 = vadd.f32 %v2633_v11, %v2586_v2  ;;  %8523 = vst [vmem:[#allocation35_spill] sm:$0xff] %v7567_v63  ;;  %v7581_v2 = vld [vmem:[%s8418_s3 + $0x1a0] sm:$0xff]  ;;  %v7602_v11 = vld [vmem:[%s8418_s3 + $0x1b8] sm:$0xff] }
0x1139   : > { %8525 = vst [vmem:[#allocation37_spill] sm:$0xff] %v7581_v2  ;;  %8528 = vst [vmem:[#allocation40_spill] sm:$0xff] %v7602_v11 }
0x113e   : > { %v2638_v60 = vpop.permute.xlu1 %2637 }
0x1140   : > { %v2644_v12 = vpop.permute.xlu0 %2643 }
0x1141   : > { %v2648_v4 = vsel %vm1518_vm15, 0.0, %v2644_v12  ;;  %v2645_v12 = vsel %vm1518_vm15, 0.0, %v2638_v60  ;;  %v7588_v60 = vld [vmem:[%s8418_s3 + $0x1a8] sm:$0xff] }
0x1142   : > { %v2656_v47 = vadd.f32 %v2652_v33, %v2648_v4  ;;  %v2650_v33 = vadd.f32 %v5653_v23, %v2634_v24  ;;  %v2653_v1 = vadd.f32 %v2649_v20, %v2645_v12  ;;  %v7560_v24 = vld [vmem:[%s8418_s3 + $0x188] sm:$0xff]  ;;  %v7574_v23 = vld [vmem:[%s8418_s3 + $0x198] sm:$0xff]  ;;  %8526 = vst [vmem:[#allocation38_spill] sm:$0xff] %v7588_v60  ;;  %v7623_v12 = vld [vmem:[%s8418_s3 + $0x1d0] sm:$0xff] }
0x1143   : > { %8522 = vst [vmem:[#allocation34_spill] sm:$0xff] %v7560_v24  ;;  %8524 = vst [vmem:[#allocation36_spill] sm:$0xff] %v7574_v23  ;;  %v7637_v20 = vld [vmem:[%s8418_s3 + $0x60] sm:$0xff] }
0x1144   : > { %v2642_v9 = vpop.permute.xlu0 %2641  ;;  %v2660_v6 = vadd.f32 %v2656_v47, %v6937_v0  ;;  %8531 = vst [vmem:[#allocation43_spill] sm:$0xff] %v7623_v12  ;;  %8533 = vst [vmem:[#allocation45_spill] sm:$0xff] %v7637_v20 }
0x1145   : > { %v2647_v61 = vsel %vm1518_vm15, 0.0, %v2642_v9 }
0x1146   : > { %v2655_v14 = vadd.f32 %v2651_v26, %v2647_v61  ;;  %5663 = vmatprep.subr.mxu0 %v2660_v6  ;;  %v2657_v26 = vadd.f32 %v2653_v1, %v6962_v45  ;;  %v7609_v61 = vld [vmem:[%s8418_s3 + $0x1c0] sm:$0xff] }
0x1147   : > { %5664 = vmatpush3.msra.mxu0 %v2660_v6  ;;  %v7595_v6 = vld [vmem:[%s8418_s3 + $0x1b0] sm:$0xff]  ;;  %8529 = vst [vmem:[#allocation41_spill] sm:$0xff] %v7609_v61 }
0x1148   : > { %v2640_v16 = vpop.permute.xlu0 %2639  ;;  %v2659_v47 = vadd.f32 %v2655_v14, %v6935_v58  ;;  %8527 = vst [vmem:[#allocation39_spill] sm:$0xff] %v7595_v6  ;;  %v7616_v14 = vld [vmem:[%s8418_s3 + $0x1c8] sm:$0xff] }
0x1149   : > { %v2646_v3 = vsel %vm1518_vm15, 0.0, %v2640_v16  ;;  %8530 = vst [vmem:[#allocation42_spill] sm:$0xff] %v7616_v14 }
0x114a   : > { %v2654_v4 = vadd.f32 %v2650_v33, %v2646_v3  ;;  %5665 = vmatprep.subr.mxu0 %v2659_v47  ;;  %v7630_v33 = vld [vmem:[%s8418_s3 + $0x1d8] sm:$0xff] }
0x114b   : > { %5666 = vmatpush3.msra.mxu0 %v2659_v47  ;;  %8532 = vst [vmem:[#allocation44_spill] sm:$0xff] %v7630_v33 }
0x114c   : > { %v2658_v9 = vadd.f32 %v2654_v4, %v6939_v7 }
0x114e   : > { %5667 = vmatprep.subr.mxu0 %v2658_v9 }
0x114f   : > { %5668 = vmatpush3.msra.mxu0 %v2658_v9 }
0x1150   : > { %5669 = vmatprep.subr.mxu0 %v2657_v26 }
0x1151   : > { %5670 = vmatpush3.msra.mxu0 %v2657_v26 }
0x1152   : > { %5672 = vmatmul.mubr.msk.f32.vlgmr.msra.gmra.mxu0 %vm520_vm1, %v7560_v24 }
0x1153   : > { %5674 = vmatprep.mubr.msk.f32.mxu0 %vm520_vm1, %v7567_v63 }
0x1156   : > { %5675 = vmatmul.mubr.msk.f32.gmra.mxu0 %vm520_vm1, %v7574_v23 }
0x1157   : > { %5677 = vmatprep.mubr.msk.f32.mxu0 %vm520_vm1, %v7581_v2 }
0x115a   : > { %5678 = vmatmul.mubr.msk.f32.gmra.mxu0 %vm520_vm1, %v7588_v60 }
0x115b   : > { %5680 = vmatprep.mubr.msk.f32.mxu0 %vm520_vm1, %v7595_v6 }
0x115e   : > { %5681 = vmatmul.mubr.msk.f32.gmra.mxu0 %vm520_vm1, %v7602_v11 }
0x115f   : > { %5683 = vmatprep.mubr.msk.f32.mxu0 %vm520_vm1, %v7609_v61 }
0x1162   : > { %5684 = vmatmul.mubr.msk.f32.gmra.mxu0 %vm520_vm1, %v7616_v14 }
0x1163   : > { %5686 = vmatprep.mubr.msk.f32.mxu0 %vm520_vm1, %v7623_v12 }
0x1166   : > { %5687 = vmatmul.mubr.msk.f32.gmra.mxu0 %vm520_vm1, %v7630_v33 }
0x1167   : > { %5723 = vmatprep.mubr.msk.f32.mxu0 %vm520_vm1, %v7637_v20 }
0x1212   : > { %v5673_v16 = vpop.f32.mrf.mxu0 }
0x1213   : > { %2788 = vrot.lane.b32.xlu1 %v5673_v16, %s8534_s30 }
0x1214   : > { %v2727_v47 = vpop.f32.mrf.mxu0 }
0x1216   : > { %v5676_v3 = vpop.f32.mrf.mxu0 }
0x1217   : > { %2792 = vrot.lane.b32.xlu0 %v5676_v3, %s8534_s30 }
0x1218   : > { %v2737_v1 = vpop.f32.mrf.mxu0 }
0x1219   : > { %2790 = vrot.lane.b32.xlu1 %v2737_v1, %s8534_s30 }
0x121a   : > { %v5679_v4 = vpop.f32.mrf.mxu0 }
0x121c   : > { %v2747_v9 = vpop.f32.mrf.mxu0 }
0x121d   : > { %2786 = vrot.lane.b32.xlu1 %v2727_v47, %s8534_s30 }
0x121e   : > { %v5682_v26 = vpop.f32.mrf.mxu0 }
0x1220   : > { %v2757_v33 = vpop.f32.mrf.mxu0 }
0x1222   : > { %v5685_v12 = vpop.f32.mrf.mxu0 }
0x1224   : > { %v2767_v14 = vpop.f32.mrf.mxu0 }
0x1225   : > { %2798 = vrot.lane.b32.xlu1 %v2767_v14, %s8493_s26 }
0x1226   : > { %v5688_v20 = vpop.f32.mrf.mxu0 }
0x1227   : > { %2804 = vrot.lane.b32.xlu0 %v5688_v20, %s8493_s26 }
0x1228   : > { %v2777_v16 = vpop.f32.mrf.mxu0 }
0x122b   : > { %2802 = vrot.lane.b32.xlu0 %v2777_v16, %s8493_s26 }
0x122f   : > { %2800 = vrot.lane.b32.xlu0 %v5685_v12, %s8493_s26 }
0x1285   : > { %v2789_v3 = vpop.permute.xlu1 %2788 }
0x1286   : > { %v2795_v24 = vsel %vm682_vm2, 0.0, %v2789_v3 }
0x1289   : > { %v2793_v1 = vpop.permute.xlu0 %2792 }
0x128a   : > { %v2797_v47 = vsel %vm682_vm2, 0.0, %v2793_v1 }
0x128b   : > { %v2791_v61 = vpop.permute.xlu1 %2790  ;;  %v2813_v11 = vadd.f32 %v5682_v26, %v2797_v47 }
0x128c   : > { %v2796_v14 = vsel %vm682_vm2, 0.0, %v2791_v61 }
0x128d   : > { %v2812_v23 = vadd.f32 %v2796_v14, %v2757_v33 }
0x128f   : > { %v2787_v6 = vpop.permute.xlu1 %2786 }
0x1290   : > { %v2794_v26 = vsel %vm682_vm2, 0.0, %v2787_v6 }
0x1291   : > { %v2810_v61 = vadd.f32 %v2794_v26, %v2747_v9 }
0x1297   : > { %v2799_v16 = vpop.permute.xlu1 %2798 }
0x1299   : > { %v2805_v60 = vpop.permute.xlu0 %2804 }
0x129a   : > { %v2809_v20 = vsel %vm695_vm3, 0.0, %v2805_v60  ;;  %v2806_v60 = vsel %vm695_vm3, 0.0, %v2799_v16 }
0x129b   : > { %v2817_v2 = vadd.f32 %v2813_v11, %v2809_v20  ;;  %v2811_v11 = vadd.f32 %v5679_v4, %v2795_v24  ;;  %v2814_v14 = vadd.f32 %v2810_v61, %v2806_v60 }
0x129d   : > { %v2803_v63 = vpop.permute.xlu0 %2802  ;;  %v2821_v12 = vadd.f32 %v2817_v2, %v7024_v21 }
0x129e   : > { %v2808_v1 = vsel %vm695_vm3, 0.0, %v2803_v63 }
0x129f   : > { %v2816_v47 = vadd.f32 %v2812_v23, %v2808_v1  ;;  %5689 = vmatprep.subr.mxu1 %v2821_v12  ;;  %v2818_v23 = vadd.f32 %v2814_v14, %v7047_v13 }
0x12a0   : > { %5690 = vmatpush3.msra.mxu1 %v2821_v12 }
0x12a1   : > { %v2801_v33 = vpop.permute.xlu0 %2800  ;;  %v2820_v2 = vadd.f32 %v2816_v47, %v7022_v18 }
0x12a2   : > { %v2807_v3 = vsel %vm695_vm3, 0.0, %v2801_v33 }
0x12a3   : > { %v2815_v20 = vadd.f32 %v2811_v11, %v2807_v3  ;;  %5691 = vmatprep.subr.mxu1 %v2820_v2 }
0x12a4   : > { %5692 = vmatpush3.msra.mxu1 %v2820_v2 }
0x12a5   : > { %v2819_v63 = vadd.f32 %v2815_v20, %v7026_v27 }
0x12a7   : > { %5693 = vmatprep.subr.mxu1 %v2819_v63 }
0x12a8   : > { %5694 = vmatpush3.msra.mxu1 %v2819_v63 }
0x12a9   : > { %5695 = vmatprep.subr.mxu1 %v2818_v23 }
0x12aa   : > { %5696 = vmatpush3.msra.mxu1 %v2818_v23 }
0x12ab   : > { %5698 = vmatmul.mubr.msk.f32.vlgmr.msra.gmra.mxu1 %vm520_vm1, %v7079_v59  ;;  %v7694_v59 = vld [vmem:[%s8418_s3 + $0xc0] sm:$0xff] }
0x12ac   : > { %5700 = vmatprep.mubr.msk.f32.mxu1 %vm520_vm1, %v7086_v62 }
0x12af   : > { %5701 = vmatmul.mubr.msk.f32.gmra.mxu1 %vm520_vm1, %v7093_v50 }
0x12b0   : > { %5703 = vmatprep.mubr.msk.f32.mxu1 %vm520_vm1, %v7100_v31 }
0x12b3   : > { %5704 = vmatmul.mubr.msk.f32.gmra.mxu1 %vm520_vm1, %v7107_v10 }
0x12b4   : > { %5706 = vmatprep.mubr.msk.f32.mxu1 %vm520_vm1, %v7114_v32 }
0x12b7   : > { %5707 = vmatmul.mubr.msk.f32.gmra.mxu1 %vm520_vm1, %v7121_v34 }
0x12b8   : > { %5709 = vmatprep.mubr.msk.f32.mxu1 %vm520_vm1, %v7128_v35 }
0x12bb   : > { %5710 = vmatmul.mubr.msk.f32.gmra.mxu1 %vm520_vm1, %v7135_v36 }
0x12bc   : > { %5712 = vmatprep.mubr.msk.f32.mxu1 %vm520_vm1, %v7142_v38 }
0x12bf   : > { %5713 = vmatmul.mubr.msk.f32.gmra.mxu1 %vm520_vm1, %v7149_v40 }
0x12c0   : > { %5749 = vmatprep.mubr.msk.f32.mxu1 %vm520_vm1, %v7694_v59 }
0x136b   : > { %v5699_v62 = vpop.f32.mrf.mxu1 }
0x136c   : > { %2949 = vrot.lane.b32.xlu1 %v5699_v62, %s8534_s30 }
0x136d   : > { %v2888_v50 = vpop.f32.mrf.mxu1 }
0x136f   : > { %v5702_v31 = vpop.f32.mrf.mxu1 }
0x1370   : > { %2953 = vrot.lane.b32.xlu0 %v5702_v31, %s8534_s30 }
0x1371   : > { %v2898_v10 = vpop.f32.mrf.mxu1 }
0x1372   : > { %2951 = vrot.lane.b32.xlu1 %v2898_v10, %s8534_s30 }
0x1373   : > { %v5705_v32 = vpop.f32.mrf.mxu1 }
0x1375   : > { %v2908_v34 = vpop.f32.mrf.mxu1 }
0x1376   : > { %2947 = vrot.lane.b32.xlu1 %v2888_v50, %s8534_s30 }
0x1377   : > { %v5708_v35 = vpop.f32.mrf.mxu1 }
0x1379   : > { %v2918_v36 = vpop.f32.mrf.mxu1 }
0x137b   : > { %v5711_v38 = vpop.f32.mrf.mxu1 }
0x137d   : > { %v2928_v40 = vpop.f32.mrf.mxu1 }
0x137e   : > { %2959 = vrot.lane.b32.xlu1 %v2928_v40, %s8493_s26 }
0x137f   : > { %v5714_v24 = vpop.f32.mrf.mxu1 }
0x1380   : > { %2965 = vrot.lane.b32.xlu0 %v5714_v24, %s8493_s26 }
0x1381   : > { %v2938_v6 = vpop.f32.mrf.mxu1 }
0x1384   : > { %2963 = vrot.lane.b32.xlu0 %v2938_v6, %s8493_s26 }
0x1388   : > { %2961 = vrot.lane.b32.xlu0 %v5711_v38, %s8493_s26 }
0x13de   : > { %v2950_v4 = vpop.permute.xlu1 %2949 }
0x13df   : > { %v2956_v50 = vsel %vm682_vm2, 0.0, %v2950_v4 }
0x13e0   : > { %v2972_v38 = vadd.f32 %v5705_v32, %v2956_v50 }
0x13e2   : > { %v2954_v12 = vpop.permute.xlu0 %2953 }
0x13e3   : > { %v2958_v1 = vsel %vm682_vm2, 0.0, %v2954_v12 }
0x13e4   : > { %v2952_v9 = vpop.permute.xlu1 %2951  ;;  %v2974_v61 = vadd.f32 %v5708_v35, %v2958_v1 }
0x13e5   : > { %v2957_v2 = vsel %vm682_vm2, 0.0, %v2952_v9 }
0x13e6   : > { %v2973_v63 = vadd.f32 %v2957_v2, %v2918_v36 }
0x13e8   : > { %v2948_v16 = vpop.permute.xlu1 %2947 }
0x13e9   : > { %v2955_v26 = vsel %vm682_vm2, 0.0, %v2948_v16 }
0x13ea   : > { %v2971_v60 = vadd.f32 %v2955_v26, %v2908_v34 }
0x13f0   : > { %v2960_v47 = vpop.permute.xlu1 %2959 }
0x13f1   : > { %v2967_v11 = vsel %vm695_vm3, 0.0, %v2960_v47 }
0x13f2   : > { %v2966_v33 = vpop.permute.xlu0 %2965  ;;  %v2975_v3 = vadd.f32 %v2971_v60, %v2967_v11 }
0x13f3   : > { %v2970_v14 = vsel %vm695_vm3, 0.0, %v2966_v33 }
0x13f4   : > { %v2978_v20 = vadd.f32 %v2974_v61, %v2970_v14  ;;  %v2979_v31 = vadd.f32 %v2975_v3, %v6623_v30 }
0x13f6   : > { %v2982_v23 = vadd.f32 %v2978_v20, %v6596_v53  ;;  %v2964_v62 = vpop.permute.xlu0 %2963  ;;  %v2983_v9 = vsub.f32 0.0, %v2979_v31 }
0x13f7   : > { %v2969_v10 = vsel %vm695_vm3, 0.0, %v2964_v62 }
0x13f8   : > { %v2986_v34 = vsub.f32 0.0, %v2982_v23  ;;  %v2977_v35 = vadd.f32 %v2973_v63, %v2969_v10  ;;  %v2987_v1 = vmul.f32 1.442695, %v2983_v9 }
0x13fa   : > { %v2993_v40 = vmul.f32 1.442695, %v2986_v34  ;;  %v2981_v24 = vadd.f32 %v2977_v35, %v6594_v51  ;;  %v2962_v6 = vpop.permute.xlu0 %2961 }
0x13fb   : > { %v2968_v36 = vsel %vm695_vm3, 0.0, %v2962_v6 }
0x13fc   : > { %6095 = vpow2.f32 %v2993_v40  ;;  %v2985_v16 = vsub.f32 0.0, %v2981_v24  ;;  %v2976_v12 = vadd.f32 %v2972_v38, %v2968_v36 }
0x13fe   : > { %v2991_v4 = vmul.f32 1.442695, %v2985_v16  ;;  %v2980_v26 = vadd.f32 %v2976_v12, %v6598_v56 }
0x1400   : > { %6097 = vpow2.f32 %v2991_v4  ;;  %v2984_v47 = vsub.f32 0.0, %v2980_v26 }
0x1401   : > { %6099 = vpow2.f32 %v2987_v1 }
0x1402   : > { %v2989_v60 = vmul.f32 1.442695, %v2984_v47 }
0x1404   : > { %6101 = vpow2.f32 %v2989_v60 }
0x1409   : > { %v6096_v32 = vpop.eup %6095 }
0x140a   : > { %v2998_v11 = vadd.f32 1.0, %v6096_v32 }
0x140c   : > { %6103 = vrcp.f32 %v2998_v11 }
0x140d   : > { %v6098_v61 = vpop.eup %6097 }
0x140e   : > { %v2997_v33 = vadd.f32 1.0, %v6098_v61  ;;  %v6100_v2 = vpop.eup %6099 }
0x140f   : > { %v2995_v20 = vadd.f32 1.0, %v6100_v2 }
0x1410   : > { %6105 = vrcp.f32 %v2997_v33 }
0x1411   : > { %v6102_v3 = vpop.eup %6101 }
0x1412   : > { %v2996_v14 = vadd.f32 1.0, %v6102_v3 }
0x1414   : > { %6107 = vrcp.f32 %v2996_v14 }
0x1415   : > { %6109 = vrcp.f32 %v2995_v20 }
0x1419   : > { %v6104_v63 = vpop.eup %6103 }
0x141a   : > { %3009 = vadd.xlane.f32.xlu0 %v6104_v63 }
0x141d   : > { %v6106_v23 = vpop.eup %6105 }
0x141e   : > { %3007 = vadd.xlane.f32.xlu1 %v6106_v23 }
0x1421   : > { %v6108_v62 = vpop.eup %6107 }
0x1422   : > { %3005 = vadd.xlane.f32.xlu0 %v6108_v62  ;;  %v6110_v50 = vpop.eup %6109 }
0x1426   : > { %3003 = vadd.xlane.f32.xlu0 %v6110_v50 }
0x14a3   : > { %v3010_v31 = vpop.xlane.xlu0 %3009 }
0x14a4   : > { %v3014_v10 = vmul.f32 0.0078125, %v3010_v31 }
0x14a6   : > { %v7726_v34 = vsub.f32 %v6104_v63, %v3014_v10 }
0x14a7   : > { %v3008_v35 = vpop.xlane.xlu1 %3007 }
0x14a8   : > { %v3013_v38 = vmul.f32 0.0078125, %v3008_v35  ;;  %v3022_v40 = vmul.f32 %v7726_v34, %v7726_v34 }
0x14aa   : > { %v7730_v24 = vsub.f32 %v6106_v23, %v3013_v38  ;;  %3029 = vadd.xlane.f32.xlu1 %v3022_v40 }
0x14ab   : > { %v3006_v6 = vpop.xlane.xlu0 %3005 }
0x14ac   : > { %v3012_v9 = vmul.f32 0.0078125, %v3006_v6  ;;  %v3021_v36 = vmul.f32 %v7730_v24, %v7730_v24 }
0x14ae   : > { %v7734_v16 = vsub.f32 %v6108_v62, %v3012_v9  ;;  %3027 = vadd.xlane.f32.xlu0 %v3021_v36 }
0x14af   : > { %v3004_v12 = vpop.xlane.xlu0 %3003 }
0x14b0   : > { %v3011_v4 = vmul.f32 0.0078125, %v3004_v12  ;;  %v3020_v26 = vmul.f32 %v7734_v16, %v7734_v16 }
0x14b2   : > { %v7738_v1 = vsub.f32 %v6110_v50, %v3011_v4  ;;  %3025 = vadd.xlane.f32.xlu1 %v3020_v26 }
0x14b4   : > { %v3019_v47 = vmul.f32 %v7738_v1, %v7738_v1 }
0x14b6   : > { %3023 = vadd.xlane.f32.xlu0 %v3019_v47 }
0x1533   : > { %v3030_v60 = vpop.xlane.xlu1 %3029 }
0x1534   : > { %v3034_v32 = vmul.f32 0.007874016, %v3030_v60 }
0x1536   : > { %6111 = vrsqrt.f32 %v3034_v32  ;;  %vm3058_vm10 = vcmp.eq.f32.partialorder %v3034_v32, inf  ;;  %v3061_v23 = vand.u32 2147483648, %v3034_v32  ;;  %vm3060_vm11 = vcmp.eq.f32.partialorder %v3034_v32, 0.0 }
0x1537   : > { %v3028_v11 = vpop.xlane.xlu0 %3027 }
0x1538   : > { %v3033_v61 = vmul.f32 0.007874016, %v3028_v11 }
0x153a   : > { %6113 = vrsqrt.f32 %v3033_v61  ;;  %vm3051_vm0 = vcmp.eq.f32.partialorder %v3033_v61, inf  ;;  %v3054_v38 = vand.u32 2147483648, %v3033_v61  ;;  %vm3053_vm4 = vcmp.eq.f32.partialorder %v3033_v61, 0.0 }
0x153b   : > { %v3026_v33 = vpop.xlane.xlu1 %3025 }
0x153c   : > { %v3032_v2 = vmul.f32 0.007874016, %v3026_v33 }
0x153e   : > { %6115 = vrsqrt.f32 %v3032_v2  ;;  %vm3044_vm5 = vcmp.eq.f32.partialorder %v3032_v2, inf  ;;  %v3047_v4 = vand.u32 2147483648, %v3032_v2  ;;  %vm3046_vm6 = vcmp.eq.f32.partialorder %v3032_v2, 0.0 }
0x153f   : > { %v3024_v3 = vpop.xlane.xlu0 %3023 }
0x1540   : > { %v3031_v14 = vmul.f32 0.007874016, %v3024_v3 }
0x1542   : > { %6117 = vrsqrt.f32 %v3031_v14  ;;  %vm3037_vm7 = vcmp.eq.f32.partialorder %v3031_v14, inf  ;;  %v3040_v33 = vand.u32 2147483648, %v3031_v14  ;;  %vm3039_vm8 = vcmp.eq.f32.partialorder %v3031_v14, 0.0 }
0x1543   : > { %v6112_v20 = vpop.eup %6111 }
0x1544   : > { %v3057_v63 = vmul.f32 %v6112_v20, %v3034_v32 }
0x1546   : > { %v3059_v62 = vsel %vm3058_vm10, %v3034_v32, %v3057_v63 }
0x1547   : > { %v6114_v50 = vpop.eup %6113  ;;  %v3062_v31 = vsel %vm3060_vm11, %v3061_v23, %v3059_v62 }
0x1548   : > { %v3066_v10 = vadd.f32 1e-06, %v3062_v31  ;;  %v3050_v35 = vmul.f32 %v6114_v50, %v3033_v61 }
0x154a   : > { %6119 = vrcp.f32 %v3066_v10  ;;  %v3052_v40 = vsel %vm3051_vm0, %v3033_v61, %v3050_v35 }
0x154b   : > { %v6116_v6 = vpop.eup %6115  ;;  %v3055_v9 = vsel %vm3053_vm4, %v3054_v38, %v3052_v40 }
0x154c   : > { %v3065_v36 = vadd.f32 1e-06, %v3055_v9  ;;  %v3043_v12 = vmul.f32 %v6116_v6, %v3032_v2 }
0x154e   : > { %6121 = vrcp.f32 %v3065_v36  ;;  %v3045_v26 = vsel %vm3044_vm5, %v3032_v2, %v3043_v12 }
0x154f   : > { %v6118_v47 = vpop.eup %6117  ;;  %v3048_v60 = vsel %vm3046_vm6, %v3047_v4, %v3045_v26 }
0x1550   : > { %v3064_v32 = vadd.f32 1e-06, %v3048_v60  ;;  %v3036_v11 = vmul.f32 %v6118_v47, %v3031_v14 }
0x1552   : > { %6123 = vrcp.f32 %v3064_v32  ;;  %v3038_v3 = vsel %vm3037_vm7, %v3031_v14, %v3036_v11 }
0x1553   : > { %v3041_v20 = vsel %vm3039_vm8, %v3040_v33, %v3038_v3 }
0x1554   : > { %v3063_v61 = vadd.f32 1e-06, %v3041_v20 }
0x1556   : > { %6125 = vrcp.f32 %v3063_v61 }
0x1557   : > { %v6120_v63 = vpop.eup %6119 }
0x1558   : > { %v3074_v23 = vmul.f32 %v6120_v63, %v7726_v34 }
0x155a   : > { %v3078_v62 = vmul.f32 %v7203_v25, %v3074_v23 }
0x155b   : > { %v6122_v50 = vpop.eup %6121 }
0x155c   : > { %v3082_v2 = vadd.f32 %v7210_v29, %v3078_v62  ;;  %v3073_v31 = vmul.f32 %v6122_v50, %v7730_v24 }
0x155e   : > { %5715 = vmatprep.subr.mxu0 %v3082_v2  ;;  %v3077_v10 = vmul.f32 %v7203_v25, %v3073_v31 }
0x155f   : > { %v6124_v35 = vpop.eup %6123  ;;  %5716 = vmatpush3.msra.mxu0 %v3082_v2 }
0x1560   : > { %v3081_v14 = vadd.f32 %v7210_v29, %v3077_v10  ;;  %v3072_v38 = vmul.f32 %v6124_v35, %v7734_v16 }
0x1562   : > { %5717 = vmatprep.subr.mxu0 %v3081_v14  ;;  %v3076_v40 = vmul.f32 %v7203_v25, %v3072_v38 }
0x1563   : > { %v6126_v34 = vpop.eup %6125  ;;  %5718 = vmatpush3.msra.mxu0 %v3081_v14 }
0x1564   : > { %v3080_v6 = vadd.f32 %v7210_v29, %v3076_v40  ;;  %v3071_v9 = vmul.f32 %v6126_v34, %v7738_v1 }
0x1566   : > { %5719 = vmatprep.subr.mxu0 %v3080_v6  ;;  %v3075_v24 = vmul.f32 %v7203_v25, %v3071_v9  ;;  %v8535_v25 = vld [vmem:[#allocation9_spill] sm:$0xff] }
0x1567   : > { %5720 = vmatpush3.msra.mxu0 %v3080_v6 }
0x1568   : > { %v3079_v36 = vadd.f32 %v7210_v29, %v3075_v24 }
0x156a   : > { %5721 = vmatprep.subr.mxu0 %v3079_v36 }
0x156b   : > { %5722 = vmatpush3.msra.mxu0 %v3079_v36  ;;  %v8536_v36 = vld [vmem:[#allocation10_spill] sm:$0xff] }
0x156c   : > { %5724 = vmatmul.mubr.msk.f32.vlgmr.msra.gmra.mxu0 %vm520_vm1, %v7224_v54 }
0x156d   : > { %5726 = vmatprep.mubr.msk.f32.mxu0 %vm520_vm1, %v7231_v15 }
0x1570   : > { %5727 = vmatmul.mubr.msk.f32.gmra.mxu0 %vm520_vm1, %v7238_v49 }
0x1571   : > { %5729 = vmatprep.mubr.msk.f32.mxu0 %vm520_vm1, %v7245_v17 }
0x1574   : > { %5730 = vmatmul.mubr.msk.f32.gmra.mxu0 %vm520_vm1, %v7252_v5 }
0x1575   : > { %5732 = vmatprep.mubr.msk.f32.mxu0 %vm520_vm1, %v7259_v46 }
0x1578   : > { %5733 = vmatmul.mubr.msk.f32.gmra.mxu0 %vm520_vm1, %v7266_v28 }
0x1579   : > { %5735 = vmatprep.mubr.msk.f32.mxu0 %vm520_vm1, %v7273_v42 }
0x157c   : > { %5736 = vmatmul.mubr.msk.f32.gmra.mxu0 %vm520_vm1, %v7280_v43 }
0x157d   : > { %5738 = vmatprep.mubr.msk.f32.mxu0 %vm520_vm1, %v7287_v19 }
0x1580   : > { %5739 = vmatmul.mubr.msk.f32.gmra.mxu0 %vm520_vm1, %v7294_v44 }
0x1581   : > { %5775 = vmatprep.mubr.msk.f32.mxu0 %vm520_vm1, %v8535_v25  ;;  %v8537_v25 = vld [vmem:[#allocation11_spill] sm:$0xff] }
0x162c   : > { %v5725_v29 = vpop.f32.mrf.mxu0 }
0x162d   : > { %3210 = vrot.lane.b32.xlu1 %v5725_v29, %s8534_s30  ;;  %v8538_v29 = vld [vmem:[#allocation12_spill] sm:$0xff] }
0x162e   : > { %v3149_v54 = vpop.f32.mrf.mxu0 }
0x1630   : > { %v5728_v15 = vpop.f32.mrf.mxu0 }
0x1631   : > { %3214 = vrot.lane.b32.xlu1 %v5728_v15, %s8534_s30  ;;  %v8540_v15 = vld [vmem:[#allocation14_spill] sm:$0xff] }
0x1632   : > { %v3159_v49 = vpop.f32.mrf.mxu0 }
0x1633   : > { %3212 = vrot.lane.b32.xlu0 %v3159_v49, %s8534_s30  ;;  %v8541_v49 = vld [vmem:[#allocation15_spill] sm:$0xff] }
0x1634   : > { %v5731_v17 = vpop.f32.mrf.mxu0 }
0x1636   : > { %v3169_v5 = vpop.f32.mrf.mxu0 }
0x1638   : > { %v5734_v46 = vpop.f32.mrf.mxu0 }
0x163a   : > { %v3179_v28 = vpop.f32.mrf.mxu0 }
0x163c   : > { %v5737_v42 = vpop.f32.mrf.mxu0 }
0x163e   : > { %v3189_v43 = vpop.f32.mrf.mxu0 }
0x1640   : > { %v5740_v19 = vpop.f32.mrf.mxu0 }
0x1641   : > { %3226 = vrot.lane.b32.xlu1 %v5740_v19, %s8493_s26 }
0x1642   : > { %v3199_v44 = vpop.f32.mrf.mxu0 }
0x1643   : > { %3224 = vrot.lane.b32.xlu0 %v3199_v44, %s8493_s26 }
0x1645   : > { %3208 = vrot.lane.b32.xlu1 %v3149_v54, %s8534_s30  ;;  %v8539_v54 = vld [vmem:[#allocation13_spill] sm:$0xff] }
0x1647   : > { %3222 = vrot.lane.b32.xlu0 %v5737_v42, %s8493_s26  ;;  %v8546_v42 = vld [vmem:[#allocation20_spill] sm:$0xff] }
0x1649   : > { %3220 = vrot.lane.b32.xlu1 %v3189_v43, %s8493_s26  ;;  %v8547_v43 = vld [vmem:[#allocation21_spill] sm:$0xff] }
0x169f   : > { %v3211_v16 = vpop.permute.xlu1 %3210 }
0x16a0   : > { %v3217_v20 = vsel %vm682_vm2, 0.0, %v3211_v16 }
0x16a1   : > { %v3233_v2 = vadd.f32 %v5731_v17, %v3217_v20  ;;  %v8542_v17 = vld [vmem:[#allocation16_spill] sm:$0xff] }
0x16a3   : > { %v3215_v1 = vpop.permute.xlu1 %3214 }
0x16a4   : > { %v3219_v4 = vsel %vm682_vm2, 0.0, %v3215_v1 }
0x16a5   : > { %v3213_v12 = vpop.permute.xlu0 %3212  ;;  %v3235_v47 = vadd.f32 %v5734_v46, %v3219_v4  ;;  %v8544_v46 = vld [vmem:[#allocation18_spill] sm:$0xff] }
0x16a6   : > { %v3218_v26 = vsel %vm682_vm2, 0.0, %v3213_v12 }
0x16a7   : > { %v3234_v11 = vadd.f32 %v3218_v26, %v3179_v28  ;;  %v8545_v28 = vld [vmem:[#allocation19_spill] sm:$0xff] }
0x16b3   : > { %v3227_v60 = vpop.permute.xlu1 %3226 }
0x16b4   : > { %v3231_v32 = vsel %vm695_vm3, 0.0, %v3227_v60 }
0x16b5   : > { %v3239_v33 = vadd.f32 %v3235_v47, %v3231_v32  ;;  %v3225_v3 = vpop.permute.xlu0 %3224 }
0x16b6   : > { %v3230_v61 = vsel %vm695_vm3, 0.0, %v3225_v3 }
0x16b7   : > { %v3243_v63 = vadd.f32 %v3239_v33, %v6741_v39  ;;  %v3238_v23 = vadd.f32 %v3234_v11, %v3230_v61  ;;  %v3209_v62 = vpop.permute.xlu1 %3208 }
0x16b8   : > { %v3216_v50 = vsel %vm682_vm2, 0.0, %v3209_v62 }
0x16b9   : > { %v3242_v31 = vadd.f32 %v3238_v23, %v6743_v41  ;;  %5741 = vmatprep.subr.mxu1 %v3243_v63  ;;  %v3223_v10 = vpop.permute.xlu0 %3222  ;;  %v3232_v14 = vadd.f32 %v3216_v50, %v3169_v5  ;;  %v8543_v5 = vld [vmem:[#allocation17_spill] sm:$0xff] }
0x16ba   : > { %v3229_v35 = vsel %vm695_vm3, 0.0, %v3223_v10  ;;  %5742 = vmatpush3.msra.mxu1 %v3243_v63 }
0x16bb   : > { %v3237_v38 = vadd.f32 %v3233_v2, %v3229_v35  ;;  %v3221_v40 = vpop.permute.xlu1 %3220  ;;  %5743 = vmatprep.subr.mxu1 %v3242_v31 }
0x16bc   : > { %v3228_v34 = vsel %vm695_vm3, 0.0, %v3221_v40  ;;  %5744 = vmatpush3.msra.mxu1 %v3242_v31 }
0x16bd   : > { %v3241_v6 = vadd.f32 %v3237_v38, %v6739_v37  ;;  %v3236_v9 = vadd.f32 %v3232_v14, %v3228_v34 }
0x16bf   : > { %v3240_v24 = vadd.f32 %v3236_v9, %v6764_v8  ;;  %5745 = vmatprep.subr.mxu1 %v3241_v6 }
0x16c0   : > { %5746 = vmatpush3.msra.mxu1 %v3241_v6 }
0x16c1   : > { %5747 = vmatprep.subr.mxu1 %v3240_v24 }
0x16c2   : > { %5748 = vmatpush3.msra.mxu1 %v3240_v24 }
0x16c3   : > { %5750 = vmatmul.mubr.msk.f32.vlgmr.msra.gmra.mxu1 %vm520_vm1, %v8536_v36 }
0x16c4   : > { %5752 = vmatprep.mubr.msk.f32.mxu1 %vm520_vm1, %v8537_v25 }
0x16c7   : > { %5753 = vmatmul.mubr.msk.f32.gmra.mxu1 %vm520_vm1, %v8538_v29 }
0x16c8   : > { %5755 = vmatprep.mubr.msk.f32.mxu1 %vm520_vm1, %v8539_v54 }
0x16cb   : > { %5756 = vmatmul.mubr.msk.f32.gmra.mxu1 %vm520_vm1, %v8540_v15 }
0x16cc   : > { %5758 = vmatprep.mubr.msk.f32.mxu1 %vm520_vm1, %v8541_v49 }
0x16cf   : > { %5759 = vmatmul.mubr.msk.f32.gmra.mxu1 %vm520_vm1, %v8542_v17 }
0x16d0   : > { %5761 = vmatprep.mubr.msk.f32.mxu1 %vm520_vm1, %v8543_v5 }
0x16d3   : > { %5762 = vmatmul.mubr.msk.f32.gmra.mxu1 %vm520_vm1, %v8544_v46 }
0x16d4   : > { %5764 = vmatprep.mubr.msk.f32.mxu1 %vm520_vm1, %v8545_v28 }
0x16d7   : > { %5765 = vmatmul.mubr.msk.f32.gmra.mxu1 %vm520_vm1, %v8546_v42  ;;  %v8548_v42 = vld [vmem:[#allocation22_spill] sm:$0xff] }
0x16d8   : > { %5801 = vmatprep.mubr.msk.f32.mxu1 %vm520_vm1, %v8547_v43  ;;  %v8549_v43 = vld [vmem:[#allocation23_spill] sm:$0xff] }
0x1783   : > { %v5751_v19 = vpop.f32.mrf.mxu1 }
0x1784   : > { %3371 = vrot.lane.b32.xlu1 %v5751_v19, %s8507_s27  ;;  %v8550_v19 = vld [vmem:[#allocation24_spill] sm:$0xff] }
0x1785   : > { %v3310_v44 = vpop.f32.mrf.mxu1 }
0x1787   : > { %v5754_v16 = vpop.f32.mrf.mxu1 }
0x1788   : > { %3375 = vrot.lane.b32.xlu0 %v5754_v16, %s8507_s27  ;;  %v8552_v16 = vld [vmem:[#allocation26_spill] sm:$0xff] }
0x1789   : > { %v3320_v1 = vpop.f32.mrf.mxu1 }
0x178a   : > { %3373 = vrot.lane.b32.xlu1 %v3320_v1, %s8507_s27  ;;  %v8553_v1 = vld [vmem:[#allocation27_spill] sm:$0xff] }
0x178b   : > { %v5757_v12 = vpop.f32.mrf.mxu1 }
0x178d   : > { %v3330_v4 = vpop.f32.mrf.mxu1 }
0x178e   : > { %3369 = vrot.lane.b32.xlu1 %v3310_v44, %s8507_s27  ;;  %v8551_v44 = vld [vmem:[#allocation25_spill] sm:$0xff] }
0x178f   : > { %v5760_v26 = vpop.f32.mrf.mxu1 }
0x1791   : > { %v3340_v47 = vpop.f32.mrf.mxu1 }
0x1793   : > { %v5763_v60 = vpop.f32.mrf.mxu1 }
0x1795   : > { %v3350_v32 = vpop.f32.mrf.mxu1 }
0x1796   : > { %3381 = vrot.lane.b32.xlu1 %v3350_v32, %s8508_s28  ;;  %v8559_v32 = vld [vmem:[#allocation33_spill] sm:$0xff] }
0x1797   : > { %v5766_v11 = vpop.f32.mrf.mxu1 }
0x1798   : > { %3387 = vrot.lane.b32.xlu0 %v5766_v11, %s8508_s28 }
0x1799   : > { %v3360_v33 = vpop.f32.mrf.mxu1 }
0x179c   : > { %3385 = vrot.lane.b32.xlu0 %v3360_v33, %s8508_s28 }
0x17a0   : > { %3383 = vrot.lane.b32.xlu0 %v5763_v60, %s8508_s28  ;;  %v8558_v60 = vld [vmem:[#allocation32_spill] sm:$0xff] }
0x17f6   : > { %v3372_v3 = vpop.permute.xlu1 %3371 }
0x17f7   : > { %v3378_v34 = vsel %vm1268_vm12, 0.0, %v3372_v3 }
0x17f8   : > { %v3394_v25 = vadd.f32 %v5757_v12, %v3378_v34  ;;  %v8554_v12 = vld [vmem:[#allocation28_spill] sm:$0xff] }
0x17fa   : > { %v3376_v20 = vpop.permute.xlu0 %3375 }
0x17fb   : > { %v3380_v63 = vsel %vm1268_vm12, 0.0, %v3376_v20 }
0x17fc   : > { %v3374_v61 = vpop.permute.xlu1 %3373  ;;  %v3396_v23 = vadd.f32 %v5760_v26, %v3380_v63  ;;  %v8556_v26 = vld [vmem:[#allocation30_spill] sm:$0xff] }
0x17fd   : > { %v3379_v2 = vsel %vm1268_vm12, 0.0, %v3374_v61 }
0x17fe   : > { %v3395_v35 = vadd.f32 %v3379_v2, %v3340_v47  ;;  %v8557_v47 = vld [vmem:[#allocation31_spill] sm:$0xff] }
0x1800   : > { %v3370_v62 = vpop.permute.xlu1 %3369 }
0x1801   : > { %v3377_v6 = vsel %vm1268_vm12, 0.0, %v3370_v62 }
0x1802   : > { %v3393_v29 = vadd.f32 %v3377_v6, %v3330_v4  ;;  %v8555_v4 = vld [vmem:[#allocation29_spill] sm:$0xff] }
0x1808   : > { %v3382_v14 = vpop.permute.xlu1 %3381 }
0x1809   : > { %v3389_v36 = vsel %vm1281_vm13, 0.0, %v3382_v14 }
0x180a   : > { %v3388_v50 = vpop.permute.xlu0 %3387  ;;  %v3397_v17 = vadd.f32 %v3393_v29, %v3389_v36 }
0x180b   : > { %v3392_v31 = vsel %vm1281_vm13, 0.0, %v3388_v50 }
0x180c   : > { %v3400_v10 = vadd.f32 %v3396_v23, %v3392_v31  ;;  %v3401_v28 = vadd.f32 %v3397_v17, %v6862_v22 }
0x180e   : > { %v3404_v38 = vadd.f32 %v3400_v10, %v6837_v52  ;;  %v3386_v40 = vpop.permute.xlu0 %3385 }
0x180f   : > { %v3391_v9 = vsel %vm1281_vm13, 0.0, %v3386_v40 }
0x1810   : > { %v3399_v24 = vadd.f32 %v3395_v35, %v3391_v9  ;;  %5767 = vmatprep.subr.mxu0 %v3404_v38 }
0x1811   : > { %5768 = vmatpush3.msra.mxu0 %v3404_v38 }
0x1812   : > { %v3403_v54 = vadd.f32 %v3399_v24, %v6835_v48  ;;  %v3384_v15 = vpop.permute.xlu0 %3383 }
0x1813   : > { %v3390_v49 = vsel %vm1281_vm13, 0.0, %v3384_v15 }
0x1814   : > { %v3398_v5 = vadd.f32 %v3394_v25, %v3390_v49  ;;  %5769 = vmatprep.subr.mxu0 %v3403_v54 }
0x1815   : > { %5770 = vmatpush3.msra.mxu0 %v3403_v54 }
0x1816   : > { %v3402_v46 = vadd.f32 %v3398_v5, %v6839_v55 }
0x1818   : > { %5771 = vmatprep.subr.mxu0 %v3402_v46 }
0x1819   : > { %5772 = vmatpush3.msra.mxu0 %v3402_v46 }
0x181a   : > { %5773 = vmatprep.subr.mxu0 %v3401_v28 }
0x181b   : > { %5774 = vmatpush3.msra.mxu0 %v3401_v28 }
0x181c   : > { %5776 = vmatmul.mubr.msk.f32.vlgmr.msra.gmra.mxu0 %vm520_vm1, %v8548_v42 }
0x181d   : > { %5778 = vmatprep.mubr.msk.f32.mxu0 %vm520_vm1, %v8549_v43 }
0x1820   : > { %5779 = vmatmul.mubr.msk.f32.gmra.mxu0 %vm520_vm1, %v8550_v19 }
0x1821   : > { %5781 = vmatprep.mubr.msk.f32.mxu0 %vm520_vm1, %v8551_v44 }
0x1824   : > { %5782 = vmatmul.mubr.msk.f32.gmra.mxu0 %vm520_vm1, %v8552_v16 }
0x1825   : > { %5784 = vmatprep.mubr.msk.f32.mxu0 %vm520_vm1, %v8553_v1 }
0x1828   : > { %5785 = vmatmul.mubr.msk.f32.gmra.mxu0 %vm520_vm1, %v8554_v12 }
0x1829   : > { %5787 = vmatprep.mubr.msk.f32.mxu0 %vm520_vm1, %v8555_v4 }
0x182c   : > { %5788 = vmatmul.mubr.msk.f32.gmra.mxu0 %vm520_vm1, %v8556_v26 }
0x182d   : > { %5790 = vmatprep.mubr.msk.f32.mxu0 %vm520_vm1, %v8557_v47 }
0x1830   : > { %5791 = vmatmul.mubr.msk.f32.gmra.mxu0 %vm520_vm1, %v8558_v60  ;;  %v8561_v60 = vld [vmem:[#allocation34_spill] sm:$0xff] }
0x1831   : > { %5827 = vmatprep.mubr.msk.f32.mxu0 %vm520_vm1, %v8559_v32  ;;  %v8562_v32 = vld [vmem:[#allocation35_spill] sm:$0xff] }
0x18dc   : > { %v5777_v11 = vpop.f32.mrf.mxu0 }
0x18dd   : > { %3532 = vrot.lane.b32.xlu1 %v5777_v11, %s8521_s29  ;;  %v8563_v11 = vld [vmem:[#allocation36_spill] sm:$0xff] }
0x18de   : > { %v3471_v33 = vpop.f32.mrf.mxu0 }
0x18e0   : > { %v5780_v3 = vpop.f32.mrf.mxu0 }
0x18e1   : > { %3536 = vrot.lane.b32.xlu0 %v5780_v3, %s8521_s29  ;;  %v8565_v3 = vld [vmem:[#allocation38_spill] sm:$0xff] }
0x18e2   : > { %v3481_v20 = vpop.f32.mrf.mxu0 }
0x18e3   : > { %3534 = vrot.lane.b32.xlu1 %v3481_v20, %s8521_s29  ;;  %v8566_v20 = vld [vmem:[#allocation39_spill] sm:$0xff] }
0x18e4   : > { %v5783_v61 = vpop.f32.mrf.mxu0 }
0x18e6   : > { %v3491_v63 = vpop.f32.mrf.mxu0 }
0x18e7   : > { %3530 = vrot.lane.b32.xlu1 %v3471_v33, %s8521_s29  ;;  %v8564_v33 = vld [vmem:[#allocation37_spill] sm:$0xff] }
0x18e8   : > { %v5786_v23 = vpop.f32.mrf.mxu0 }
0x18ea   : > { %v3501_v62 = vpop.f32.mrf.mxu0 }
0x18ec   : > { %v5789_v50 = vpop.f32.mrf.mxu0 }
0x18ee   : > { %v3511_v2 = vpop.f32.mrf.mxu0 }
0x18ef   : > { %3542 = vrot.lane.b32.xlu1 %v3511_v2, %s8560_s20  ;;  %v8572_v2 = vld [vmem:[#allocation45_spill] sm:$0xff] }
0x18f0   : > { %v5792_v31 = vpop.f32.mrf.mxu0 }
0x18f1   : > { %3548 = vrot.lane.b32.xlu0 %v5792_v31, %s8560_s20 }
0x18f2   : > { %v3521_v10 = vpop.f32.mrf.mxu0 }
0x18f5   : > { %3546 = vrot.lane.b32.xlu0 %v3521_v10, %s8560_s20 }
0x18f9   : > { %3544 = vrot.lane.b32.xlu0 %v5789_v50, %s8560_s20  ;;  %v8571_v50 = vld [vmem:[#allocation44_spill] sm:$0xff] }
0x194f   : > { %v3533_v35 = vpop.permute.xlu1 %3532 }
0x1950   : > { %v3539_v17 = vsel %vm1505_vm14, 0.0, %v3533_v35 }
0x1951   : > { %v3555_v43 = vadd.f32 %v5783_v61, %v3539_v17  ;;  %v8567_v61 = vld [vmem:[#allocation40_spill] sm:$0xff] }
0x1953   : > { %v3537_v14 = vpop.permute.xlu0 %3536 }
0x1954   : > { %v3541_v40 = vsel %vm1505_vm14, 0.0, %v3537_v14 }
0x1955   : > { %v3535_v38 = vpop.permute.xlu1 %3534  ;;  %v3557_v34 = vadd.f32 %v5786_v23, %v3541_v40  ;;  %v8569_v23 = vld [vmem:[#allocation42_spill] sm:$0xff] }
0x1956   : > { %v3540_v24 = vsel %vm1505_vm14, 0.0, %v3535_v38 }
0x1957   : > { %v3556_v29 = vadd.f32 %v3540_v24, %v3501_v62  ;;  %v8570_v62 = vld [vmem:[#allocation43_spill] sm:$0xff] }
0x1959   : > { %v3531_v6 = vpop.permute.xlu1 %3530 }
0x195a   : > { %v3538_v5 = vsel %vm1505_vm14, 0.0, %v3531_v6 }
0x195b   : > { %v3554_v19 = vadd.f32 %v3538_v5, %v3491_v63  ;;  %v8568_v63 = vld [vmem:[#allocation41_spill] sm:$0xff] }
0x1961   : > { %v3543_v54 = vpop.permute.xlu1 %3542 }
0x1962   : > { %v3550_v42 = vsel %vm1518_vm15, 0.0, %v3543_v54 }
0x1963   : > { %v3549_v9 = vpop.permute.xlu0 %3548  ;;  %v3558_v12 = vadd.f32 %v3554_v19, %v3550_v42 }
0x1964   : > { %v3553_v36 = vsel %vm1518_vm15, 0.0, %v3549_v9 }
0x1965   : > { %v3561_v25 = vadd.f32 %v3557_v34, %v3553_v36  ;;  %v3562_v47 = vadd.f32 %v3558_v12, %v6962_v45 }
0x1967   : > { %v3565_v15 = vadd.f32 %v3561_v25, %v6937_v0  ;;  %v3547_v49 = vpop.permute.xlu0 %3546 }
0x1968   : > { %v3552_v46 = vsel %vm1518_vm15, 0.0, %v3547_v49 }
0x1969   : > { %v3560_v28 = vadd.f32 %v3556_v29, %v3552_v46  ;;  %5793 = vmatprep.subr.mxu1 %v3565_v15 }
0x196a   : > { %5794 = vmatpush3.msra.mxu1 %v3565_v15 }
0x196b   : > { %v3564_v44 = vadd.f32 %v3560_v28, %v6935_v58  ;;  %v3545_v16 = vpop.permute.xlu0 %3544 }
0x196c   : > { %v3551_v1 = vsel %vm1518_vm15, 0.0, %v3545_v16 }
0x196d   : > { %v3559_v4 = vadd.f32 %v3555_v43, %v3551_v1  ;;  %5795 = vmatprep.subr.mxu1 %v3564_v44 }
0x196e   : > { %5796 = vmatpush3.msra.mxu1 %v3564_v44 }
0x196f   : > { %v3563_v26 = vadd.f32 %v3559_v4, %v6939_v7 }
0x1971   : > { %5797 = vmatprep.subr.mxu1 %v3563_v26 }
0x1972   : > { %5798 = vmatpush3.msra.mxu1 %v3563_v26 }
0x1973   : > { %5799 = vmatprep.subr.mxu1 %v3562_v47 }
0x1974   : > { %5800 = vmatpush3.msra.mxu1 %v3562_v47 }
0x1975   : > { %5802 = vmatmul.mubr.msk.f32.vlgmr.msra.gmra.mxu1 %vm520_vm1, %v8561_v60 }
0x1976   : > { %5804 = vmatprep.mubr.msk.f32.mxu1 %vm520_vm1, %v8562_v32 }
0x1979   : > { %5805 = vmatmul.mubr.msk.f32.gmra.mxu1 %vm520_vm1, %v8563_v11 }
0x197a   : > { %5807 = vmatprep.mubr.msk.f32.mxu1 %vm520_vm1, %v8564_v33 }
0x197d   : > { %5808 = vmatmul.mubr.msk.f32.gmra.mxu1 %vm520_vm1, %v8565_v3 }
0x197e   : > { %5810 = vmatprep.mubr.msk.f32.mxu1 %vm520_vm1, %v8566_v20 }
0x1981   : > { %5811 = vmatmul.mubr.msk.f32.gmra.mxu1 %vm520_vm1, %v8567_v61 }
0x1982   : > { %5813 = vmatprep.mubr.msk.f32.mxu1 %vm520_vm1, %v8568_v63 }
0x1985   : > { %5814 = vmatmul.mubr.msk.f32.gmra.mxu1 %vm520_vm1, %v8569_v23 }
0x1986   : > { %5816 = vmatprep.mubr.msk.f32.mxu1 %vm520_vm1, %v8570_v62 }
0x1989   : > { %5817 = vmatmul.mubr.msk.f32.gmra.mxu1 %vm520_vm1, %v8571_v50  ;;  %v6237_v50 = vld [vmem:[%s8418_s3 + $0x8] sm:$0xff] }
0x198a   : > { %5853 = vmatprep.mubr.msk.f32.mxu1 %vm520_vm1, %v8572_v2  ;;  %v6238_v2 = vld [vmem:[%s8418_s3 + $0x10] sm:$0xff] }
0x1a35   : > { %v5803_v31 = vpop.f32.mrf.mxu1 }
0x1a36   : > { %3693 = vrot.lane.b32.xlu1 %v5803_v31, %s8534_s30  ;;  %v6239_v31 = vld [vmem:[%s8418_s3 + $0x18] sm:$0xff] }
0x1a37   : > { %v3632_v10 = vpop.f32.mrf.mxu1 }
0x1a39   : > { %v5806_v35 = vpop.f32.mrf.mxu1 }
0x1a3a   : > { %3697 = vrot.lane.b32.xlu0 %v5806_v35, %s8534_s30  ;;  %v6241_v35 = vld [vmem:[%s8418_s3 + $0x28] sm:$0xff] }
0x1a3b   : > { %v3642_v14 = vpop.f32.mrf.mxu1 }
0x1a3c   : > { %3695 = vrot.lane.b32.xlu1 %v3642_v14, %s8534_s30  ;;  %v6242_v14 = vld [vmem:[%s8418_s3 + $0x30] sm:$0xff] }
0x1a3d   : > { %v5809_v38 = vpop.f32.mrf.mxu1 }
0x1a3f   : > { %v3652_v40 = vpop.f32.mrf.mxu1 }
0x1a40   : > { %3691 = vrot.lane.b32.xlu1 %v3632_v10, %s8534_s30  ;;  %v6240_v10 = vld [vmem:[%s8418_s3 + $0x20] sm:$0xff] }
0x1a41   : > { %v5812_v34 = vpop.f32.mrf.mxu1 }
0x1a43   : > { %v3662_v6 = vpop.f32.mrf.mxu1 }
0x1a45   : > { %v5815_v9 = vpop.f32.mrf.mxu1 }
0x1a47   : > { %v3672_v24 = vpop.f32.mrf.mxu1 }
0x1a48   : > { %3703 = vrot.lane.b32.xlu1 %v3672_v24, %s8493_s26 }
0x1a49   : > { %v5818_v36 = vpop.f32.mrf.mxu1 }
0x1a4a   : > { %3709 = vrot.lane.b32.xlu0 %v5818_v36, %s8493_s26 }
0x1a4b   : > { %v3682_v25 = vpop.f32.mrf.mxu1 }
0x1a4e   : > { %3707 = vrot.lane.b32.xlu0 %v3682_v25, %s8493_s26 }
0x1a52   : > { %3705 = vrot.lane.b32.xlu0 %v5815_v9, %s8493_s26  ;;  %v6247_v9 = vld [vmem:[%s8418_s3 + $0x58] sm:$0xff] }
0x1aa8   : > { %v3694_v29 = vpop.permute.xlu1 %3693 }
0x1aa9   : > { %v3700_v12 = vsel %vm682_vm2, 0.0, %v3694_v29 }
0x1aaa   : > { %v3716_v32 = vadd.f32 %v5809_v38, %v3700_v12  ;;  %v6243_v38 = vld [vmem:[%s8418_s3 + $0x38] sm:$0xff] }
0x1aac   : > { %v3698_v54 = vpop.permute.xlu0 %3697 }
0x1aad   : > { %v3702_v49 = vsel %vm682_vm2, 0.0, %v3698_v54 }
0x1aae   : > { %v3696_v15 = vpop.permute.xlu1 %3695  ;;  %v3718_v17 = vadd.f32 %v5812_v34, %v3702_v49  ;;  %v6245_v34 = vld [vmem:[%s8418_s3 + $0x48] sm:$0xff] }
0x1aaf   : > { %v3701_v28 = vsel %vm682_vm2, 0.0, %v3696_v15 }
0x1ab0   : > { %v3717_v19 = vadd.f32 %v3701_v28, %v3662_v6  ;;  %v6246_v6 = vld [vmem:[%s8418_s3 + $0x50] sm:$0xff] }
0x1ab2   : > { %v3692_v5 = vpop.permute.xlu1 %3691 }
0x1ab3   : > { %v3699_v4 = vsel %vm682_vm2, 0.0, %v3692_v5 }
0x1ab4   : > { %v3715_v11 = vadd.f32 %v3699_v4, %v3652_v40  ;;  %v6244_v40 = vld [vmem:[%s8418_s3 + $0x40] sm:$0xff] }
0x1aba   : > { %v3704_v44 = vpop.permute.xlu1 %3703 }
0x1abb   : > { %v3711_v60 = vsel %vm695_vm3, 0.0, %v3704_v44 }
0x1abc   : > { %v3710_v46 = vpop.permute.xlu0 %3709  ;;  %v3719_v61 = vadd.f32 %v3715_v11, %v3711_v60 }
0x1abd   : > { %v3714_v42 = vsel %vm695_vm3, 0.0, %v3710_v46 }
0x1abe   : > { %v3722_v43 = vadd.f32 %v3718_v17, %v3714_v42  ;;  %v3723_v62 = vadd.f32 %v3719_v61, %v7047_v13 }
0x1ac0   : > { %v3726_v16 = vadd.f32 %v3722_v43, %v7024_v21  ;;  %v3708_v1 = vpop.permute.xlu0 %3707 }
0x1ac1   : > { %v3713_v26 = vsel %vm695_vm3, 0.0, %v3708_v1 }
0x1ac2   : > { %v3721_v47 = vadd.f32 %v3717_v19, %v3713_v26  ;;  %5819 = vmatprep.subr.mxu0 %v3726_v16 }
0x1ac3   : > { %5820 = vmatpush3.msra.mxu0 %v3726_v16 }
0x1ac4   : > { %v3725_v33 = vadd.f32 %v3721_v47, %v7022_v18  ;;  %v3706_v3 = vpop.permute.xlu0 %3705 }
0x1ac5   : > { %v3712_v20 = vsel %vm695_vm3, 0.0, %v3706_v3 }
0x1ac6   : > { %v3720_v63 = vadd.f32 %v3716_v32, %v3712_v20  ;;  %5821 = vmatprep.subr.mxu0 %v3725_v33 }
0x1ac7   : > { %5822 = vmatpush3.msra.mxu0 %v3725_v33 }
0x1ac8   : > { %v3724_v23 = vadd.f32 %v3720_v63, %v7026_v27 }
0x1aca   : > { %5823 = vmatprep.subr.mxu0 %v3724_v23 }
0x1acb   : > { %5824 = vmatpush3.msra.mxu0 %v3724_v23 }
0x1acc   : > { %5825 = vmatprep.subr.mxu0 %v3723_v62 }
0x1acd   : > { %5826 = vmatpush3.msra.mxu0 %v3723_v62 }
0x1ace   : > { %5828 = vmatmul.mubr.msk.f32.vlgmr.msra.gmra.mxu0 %vm520_vm1, %v6237_v50 }
0x1acf   : > { %5830 = vmatprep.mubr.msk.f32.mxu0 %vm520_vm1, %v6238_v2 }
0x1ad2   : > { %5831 = vmatmul.mubr.msk.f32.gmra.mxu0 %vm520_vm1, %v6239_v31 }
0x1ad3   : > { %5833 = vmatprep.mubr.msk.f32.mxu0 %vm520_vm1, %v6240_v10 }
0x1ad6   : > { %5834 = vmatmul.mubr.msk.f32.gmra.mxu0 %vm520_vm1, %v6241_v35 }
0x1ad7   : > { %5836 = vmatprep.mubr.msk.f32.mxu0 %vm520_vm1, %v6242_v14 }
0x1ada   : > { %5837 = vmatmul.mubr.msk.f32.gmra.mxu0 %vm520_vm1, %v6243_v38 }
0x1adb   : > { %5839 = vmatprep.mubr.msk.f32.mxu0 %vm520_vm1, %v6244_v40 }
0x1ade   : > { %5840 = vmatmul.mubr.msk.f32.gmra.mxu0 %vm520_vm1, %v6245_v34 }
0x1adf   : > { %5842 = vmatprep.mubr.msk.f32.mxu0 %vm520_vm1, %v6246_v6 }
0x1ae2   : > { %5843 = vmatmul.mubr.msk.f32.gmra.mxu0 %vm520_vm1, %v6247_v9 }
0x1ae3   : > { %5879 = vmatprep.mubr.msk.f32.mxu0 %vm520_vm1, %v7694_v59 }
0x1b8e   : > { %v5829_v24 = vpop.f32.mrf.mxu0 }
0x1b8f   : > { %3854 = vrot.lane.b32.xlu1 %v5829_v24, %s8534_s30 }
0x1b90   : > { %v3793_v36 = vpop.f32.mrf.mxu0 }
0x1b92   : > { %v5832_v25 = vpop.f32.mrf.mxu0 }
0x1b93   : > { %3858 = vrot.lane.b32.xlu0 %v5832_v25, %s8534_s30 }
0x1b94   : > { %v3803_v29 = vpop.f32.mrf.mxu0 }
0x1b95   : > { %3856 = vrot.lane.b32.xlu1 %v3803_v29, %s8534_s30 }
0x1b96   : > { %v5835_v54 = vpop.f32.mrf.mxu0 }
0x1b98   : > { %v3813_v15 = vpop.f32.mrf.mxu0 }
0x1b99   : > { %3852 = vrot.lane.b32.xlu1 %v3793_v36, %s8534_s30 }
0x1b9a   : > { %v5838_v49 = vpop.f32.mrf.mxu0 }
0x1b9c   : > { %v3823_v17 = vpop.f32.mrf.mxu0 }
0x1b9e   : > { %v5841_v5 = vpop.f32.mrf.mxu0 }
0x1ba0   : > { %v3833_v46 = vpop.f32.mrf.mxu0 }
0x1ba1   : > { %3864 = vrot.lane.b32.xlu1 %v3833_v46, %s8493_s26 }
0x1ba2   : > { %v5844_v59 = vpop.f32.mrf.mxu0 }
0x1ba3   : > { %3870 = vrot.lane.b32.xlu0 %v5844_v59, %s8493_s26 }
0x1ba4   : > { %v3843_v28 = vpop.f32.mrf.mxu0 }
0x1ba7   : > { %3868 = vrot.lane.b32.xlu0 %v3843_v28, %s8493_s26 }
0x1bab   : > { %3866 = vrot.lane.b32.xlu0 %v5841_v5, %s8493_s26 }
0x1c01   : > { %v3855_v42 = vpop.permute.xlu1 %3854 }
0x1c02   : > { %v3861_v23 = vsel %vm682_vm2, 0.0, %v3855_v42 }
0x1c03   : > { %v3877_v10 = vadd.f32 %v5835_v54, %v3861_v23 }
0x1c05   : > { %v3859_v44 = vpop.permute.xlu0 %3858 }
0x1c06   : > { %v3863_v1 = vsel %vm682_vm2, 0.0, %v3859_v44 }
0x1c07   : > { %v3857_v43 = vpop.permute.xlu1 %3856  ;;  %v3879_v47 = vadd.f32 %v5838_v49, %v3863_v1 }
0x1c08   : > { %v3862_v32 = vsel %vm682_vm2, 0.0, %v3857_v43 }
0x1c09   : > { %v3878_v20 = vadd.f32 %v3862_v32, %v3823_v17 }
0x1c0b   : > { %v3853_v19 = vpop.permute.xlu1 %3852 }
0x1c0c   : > { %v3860_v16 = vsel %vm682_vm2, 0.0, %v3853_v19 }
0x1c0d   : > { %v3876_v4 = vadd.f32 %v3860_v16, %v3813_v15 }
0x1c13   : > { %v3865_v12 = vpop.permute.xlu1 %3864 }
0x1c14   : > { %v3872_v26 = vsel %vm695_vm3, 0.0, %v3865_v12 }
0x1c15   : > { %v3871_v60 = vpop.permute.xlu0 %3870  ;;  %v3880_v11 = vadd.f32 %v3876_v4, %v3872_v26 }
0x1c16   : > { %v3875_v33 = vsel %vm695_vm3, 0.0, %v3871_v60 }
0x1c17   : > { %v3883_v3 = vadd.f32 %v3879_v47, %v3875_v33  ;;  %v3884_v62 = vadd.f32 %v3880_v11, %v6623_v30 }
0x1c19   : > { %v3887_v61 = vadd.f32 %v3883_v3, %v6596_v53  ;;  %v3869_v63 = vpop.permute.xlu0 %3868  ;;  %v3888_v40 = vsub.f32 0.0, %v3884_v62 }
0x1c1a   : > { %v3874_v50 = vsel %vm695_vm3, 0.0, %v3869_v63 }
0x1c1b   : > { %v3891_v2 = vsub.f32 0.0, %v3887_v61  ;;  %v3882_v31 = vadd.f32 %v3878_v20, %v3874_v50  ;;  %v3892_v24 = vmul.f32 1.442695, %v3888_v40 }
0x1c1d   : > { %v3898_v35 = vmul.f32 1.442695, %v3891_v2  ;;  %v3886_v14 = vadd.f32 %v3882_v31, %v6594_v51  ;;  %v3867_v38 = vpop.permute.xlu0 %3866 }
0x1c1e   : > { %v3873_v53 = vsel %vm695_vm3, 0.0, %v3867_v38 }
0x1c1f   : > { %6127 = vpow2.f32 %v3898_v35  ;;  %v3890_v34 = vsub.f32 0.0, %v3886_v14  ;;  %v3881_v6 = vadd.f32 %v3877_v10, %v3873_v53 }
0x1c21   : > { %v3896_v9 = vmul.f32 1.442695, %v3890_v34  ;;  %v3885_v30 = vadd.f32 %v3881_v6, %v6598_v56 }
0x1c23   : > { %6129 = vpow2.f32 %v3896_v9  ;;  %v3889_v36 = vsub.f32 0.0, %v3885_v30 }
0x1c24   : > { %6131 = vpow2.f32 %v3892_v24 }
0x1c25   : > { %v3894_v25 = vmul.f32 1.442695, %v3889_v36 }
0x1c27   : > { %6133 = vpow2.f32 %v3894_v25 }
0x1c2c   : > { %v6128_v29 = vpop.eup %6127 }
0x1c2d   : > { %v3903_v54 = vadd.f32 1.0, %v6128_v29 }
0x1c2f   : > { %6135 = vrcp.f32 %v3903_v54 }
0x1c30   : > { %v6130_v51 = vpop.eup %6129 }
0x1c31   : > { %v3902_v15 = vadd.f32 1.0, %v6130_v51  ;;  %v6132_v49 = vpop.eup %6131 }
0x1c32   : > { %v3900_v46 = vadd.f32 1.0, %v6132_v49 }
0x1c33   : > { %6137 = vrcp.f32 %v3902_v15 }
0x1c34   : > { %v6134_v17 = vpop.eup %6133 }
0x1c35   : > { %v3901_v5 = vadd.f32 1.0, %v6134_v17 }
0x1c37   : > { %6139 = vrcp.f32 %v3901_v5 }
0x1c38   : > { %6141 = vrcp.f32 %v3900_v46 }
0x1c3c   : > { %v6136_v59 = vpop.eup %6135 }
0x1c3d   : > { %3914 = vadd.xlane.f32.xlu0 %v6136_v59 }
0x1c40   : > { %v6138_v56 = vpop.eup %6137 }
0x1c41   : > { %3912 = vadd.xlane.f32.xlu1 %v6138_v56 }
0x1c44   : > { %v6140_v28 = vpop.eup %6139 }
0x1c45   : > { %3910 = vadd.xlane.f32.xlu0 %v6140_v28  ;;  %v6142_v42 = vpop.eup %6141 }
0x1c49   : > { %3908 = vadd.xlane.f32.xlu0 %v6142_v42 }
0x1cc6   : > { %v3915_v43 = vpop.xlane.xlu0 %3914 }
0x1cc7   : > { %v3919_v19 = vmul.f32 0.0078125, %v3915_v43 }
0x1cc9   : > { %v8036_v44 = vsub.f32 %v6136_v59, %v3919_v19 }
0x1cca   : > { %v3913_v16 = vpop.xlane.xlu1 %3912 }
0x1ccb   : > { %v3918_v1 = vmul.f32 0.0078125, %v3913_v16  ;;  %v3927_v12 = vmul.f32 %v8036_v44, %v8036_v44 }
0x1ccd   : > { %v8040_v4 = vsub.f32 %v6138_v56, %v3918_v1  ;;  %3934 = vadd.xlane.f32.xlu1 %v3927_v12  ;;  %v6248_v1 = vld [vmem:[%s8420_s5] ss:$0 sm:$0xff] }
0x1cce   : > { %v3911_v26 = vpop.xlane.xlu0 %3910 }
0x1ccf   : > { %v3917_v47 = vmul.f32 0.0078125, %v3911_v26  ;;  %v3926_v60 = vmul.f32 %v8040_v4, %v8040_v4 }
0x1cd1   : > { %v8044_v32 = vsub.f32 %v6140_v28, %v3917_v47  ;;  %3932 = vadd.xlane.f32.xlu0 %v3926_v60  ;;  %v6249_v47 = vld [vmem:[%s8421_s6] ss:$0 sm:$0xff] }
0x1cd2   : > { %v3909_v11 = vpop.xlane.xlu0 %3908 }
0x1cd3   : > { %v3916_v33 = vmul.f32 0.0078125, %v3909_v11  ;;  %v3925_v3 = vmul.f32 %v8044_v32, %v8044_v32 }
0x1cd5   : > { %v8048_v20 = vsub.f32 %v6142_v42, %v3916_v33  ;;  %3930 = vadd.xlane.f32.xlu1 %v3925_v3 }
0x1cd7   : > { %v3924_v61 = vmul.f32 %v8048_v20, %v8048_v20 }
0x1cd9   : > { %3928 = vadd.xlane.f32.xlu0 %v3924_v61 }
0x1d56   : > { %v3935_v63 = vpop.xlane.xlu1 %3934 }
0x1d57   : > { %v3939_v23 = vmul.f32 0.007874016, %v3935_v63 }
0x1d59   : > { %6143 = vrsqrt.f32 %v3939_v23  ;;  %vm3963_vm9 = vcmp.eq.f32.partialorder %v3939_v23, inf  ;;  %v3966_v40 = vand.u32 2147483648, %v3939_v23  ;;  %vm3965_vm10 = vcmp.eq.f32.partialorder %v3939_v23, 0.0 }
0x1d5a   : > { %v3933_v62 = vpop.xlane.xlu0 %3932 }
0x1d5b   : > { %v3938_v50 = vmul.f32 0.007874016, %v3933_v62 }
0x1d5d   : > { %6145 = vrsqrt.f32 %v3938_v50  ;;  %vm3956_vm11 = vcmp.eq.f32.partialorder %v3938_v50, inf  ;;  %v3959_v24 = vand.u32 2147483648, %v3938_v50  ;;  %vm3958_vm0 = vcmp.eq.f32.partialorder %v3938_v50, 0.0 }
0x1d5e   : > { %v3931_v2 = vpop.xlane.xlu1 %3930 }
0x1d5f   : > { %v3937_v31 = vmul.f32 0.007874016, %v3931_v2 }
0x1d61   : > { %6147 = vrsqrt.f32 %v3937_v31  ;;  %vm3949_vm4 = vcmp.eq.f32.partialorder %v3937_v31, inf  ;;  %v3952_v15 = vand.u32 2147483648, %v3937_v31  ;;  %vm3951_vm5 = vcmp.eq.f32.partialorder %v3937_v31, 0.0 }
0x1d62   : > { %v3929_v10 = vpop.xlane.xlu0 %3928 }
0x1d63   : > { %v3936_v35 = vmul.f32 0.007874016, %v3929_v10  ;;  %v6253_v10 = vld [vmem:[%s8418_s3 + $0x80] sm:$0xff] }
0x1d65   : > { %6149 = vrsqrt.f32 %v3936_v35  ;;  %vm3942_vm6 = vcmp.eq.f32.partialorder %v3936_v35, inf  ;;  %v3945_v56 = vand.u32 2147483648, %v3936_v35  ;;  %vm3944_vm7 = vcmp.eq.f32.partialorder %v3936_v35, 0.0 }
0x1d66   : > { %v6144_v14 = vpop.eup %6143 }
0x1d67   : > { %v3962_v38 = vmul.f32 %v6144_v14, %v3939_v23  ;;  %v6255_v14 = vld [vmem:[%s8418_s3 + $0x90] sm:$0xff] }
0x1d69   : > { %v3964_v53 = vsel %vm3963_vm9, %v3939_v23, %v3962_v38  ;;  %v6256_v38 = vld [vmem:[%s8418_s3 + $0x98] sm:$0xff] }
0x1d6a   : > { %v6146_v34 = vpop.eup %6145  ;;  %v3967_v6 = vsel %vm3965_vm10, %v3966_v40, %v3964_v53  ;;  %v6257_v40 = vld [vmem:[%s8418_s3 + $0xa0] sm:$0xff]  ;;  %v6258_v53 = vld [vmem:[%s8418_s3 + $0xa8] sm:$0xff] }
0x1d6b   : > { %v3971_v9 = vadd.f32 1e-06, %v3967_v6  ;;  %v3955_v30 = vmul.f32 %v6146_v34, %v3938_v50  ;;  %v6259_v34 = vld [vmem:[%s8418_s3 + $0xb0] sm:$0xff]  ;;  %v6260_v6 = vld [vmem:[%s8418_s3 + $0xb8] sm:$0xff] }
0x1d6d   : > { %6151 = vrcp.f32 %v3971_v9  ;;  %v3957_v36 = vsel %vm3956_vm11, %v3938_v50, %v3955_v30  ;;  %v6261_v9 = vld [vmem:[%s8418_s3 + $0x120] sm:$0xff] }
0x1d6e   : > { %v6148_v25 = vpop.eup %6147  ;;  %v3960_v29 = vsel %vm3958_vm0, %v3959_v24, %v3957_v36 }
0x1d6f   : > { %v3970_v54 = vadd.f32 1e-06, %v3960_v29  ;;  %v3948_v51 = vmul.f32 %v6148_v25, %v3937_v31 }
0x1d71   : > { %6153 = vrcp.f32 %v3970_v54  ;;  %v3950_v49 = vsel %vm3949_vm4, %v3937_v31, %v3948_v51 }
0x1d72   : > { %v6150_v17 = vpop.eup %6149  ;;  %v3953_v5 = vsel %vm3951_vm5, %v3952_v15, %v3950_v49 }
0x1d73   : > { %v3969_v46 = vadd.f32 1e-06, %v3953_v5  ;;  %v3941_v59 = vmul.f32 %v6150_v17, %v3936_v35 }
0x1d75   : > { %6155 = vrcp.f32 %v3969_v46  ;;  %v3943_v28 = vsel %vm3942_vm6, %v3936_v35, %v3941_v59  ;;  %v6254_v35 = vld [vmem:[%s8418_s3 + $0x88] sm:$0xff] }
0x1d76   : > { %v3946_v42 = vsel %vm3944_vm7, %v3945_v56, %v3943_v28 }
0x1d77   : > { %v3968_v43 = vadd.f32 1e-06, %v3946_v42 }
0x1d79   : > { %6157 = vrcp.f32 %v3968_v43 }
0x1d7a   : > { %v6152_v19 = vpop.eup %6151 }
0x1d7b   : > { %v3979_v16 = vmul.f32 %v6152_v19, %v8036_v44 }
0x1d7d   : > { %v3983_v12 = vmul.f32 %v6248_v1, %v3979_v16 }
0x1d7e   : > { %v6154_v26 = vpop.eup %6153 }
0x1d7f   : > { %v3987_v60 = vadd.f32 %v6249_v47, %v3983_v12  ;;  %v3978_v11 = vmul.f32 %v6154_v26, %v8040_v4  ;;  %v6250_v4 = vld [vmem:[%s8418_s3 + $0x68] sm:$0xff] }
0x1d81   : > { %5845 = vmatprep.subr.mxu1 %v3987_v60  ;;  %v3982_v33 = vmul.f32 %v6248_v1, %v3978_v11 }
0x1d82   : > { %v6156_v3 = vpop.eup %6155  ;;  %5846 = vmatpush3.msra.mxu1 %v3987_v60 }
0x1d83   : > { %v3986_v61 = vadd.f32 %v6249_v47, %v3982_v33  ;;  %v3977_v44 = vmul.f32 %v6156_v3, %v8044_v32  ;;  %v6251_v32 = vld [vmem:[%s8418_s3 + $0x70] sm:$0xff] }
0x1d85   : > { %5847 = vmatprep.subr.mxu1 %v3986_v61  ;;  %v3981_v63 = vmul.f32 %v6248_v1, %v3977_v44 }
0x1d86   : > { %v6158_v23 = vpop.eup %6157  ;;  %5848 = vmatpush3.msra.mxu1 %v3986_v61 }
0x1d87   : > { %v3985_v62 = vadd.f32 %v6249_v47, %v3981_v63  ;;  %v3976_v50 = vmul.f32 %v6158_v23, %v8048_v20  ;;  %v6252_v20 = vld [vmem:[%s8418_s3 + $0x78] sm:$0xff] }
0x1d89   : > { %5849 = vmatprep.subr.mxu1 %v3985_v62  ;;  %v3980_v2 = vmul.f32 %v6248_v1, %v3976_v50 }
0x1d8a   : > { %5850 = vmatpush3.msra.mxu1 %v3985_v62 }
0x1d8b   : > { %v3984_v31 = vadd.f32 %v6249_v47, %v3980_v2 }
0x1d8d   : > { %5851 = vmatprep.subr.mxu1 %v3984_v31 }
0x1d8e   : > { %5852 = vmatpush3.msra.mxu1 %v3984_v31 }
0x1d8f   : > { %5854 = vmatmul.mubr.msk.f32.vlgmr.msra.gmra.mxu1 %vm520_vm1, %v6250_v4 }
0x1d90   : > { %5856 = vmatprep.mubr.msk.f32.mxu1 %vm520_vm1, %v6251_v32 }
0x1d93   : > { %5857 = vmatmul.mubr.msk.f32.gmra.mxu1 %vm520_vm1, %v6252_v20 }
0x1d94   : > { %5859 = vmatprep.mubr.msk.f32.mxu1 %vm520_vm1, %v6253_v10 }
0x1d97   : > { %5860 = vmatmul.mubr.msk.f32.gmra.mxu1 %vm520_vm1, %v6254_v35  ;;  %v6263_v35 = vld [vmem:[%s8418_s3 + $0xd0] sm:$0xff] }
0x1d98   : > { %5862 = vmatprep.mubr.msk.f32.mxu1 %vm520_vm1, %v6255_v14  ;;  %v6266_v14 = vld [vmem:[%s8418_s3 + $0xe8] sm:$0xff] }
0x1d9b   : > { %5863 = vmatmul.mubr.msk.f32.gmra.mxu1 %vm520_vm1, %v6256_v38  ;;  %v6267_v38 = vld [vmem:[%s8418_s3 + $0xf0] sm:$0xff] }
0x1d9c   : > { %5865 = vmatprep.mubr.msk.f32.mxu1 %vm520_vm1, %v6257_v40  ;;  %v6268_v40 = vld [vmem:[%s8418_s3 + $0xf8] sm:$0xff] }
0x1d9f   : > { %5866 = vmatmul.mubr.msk.f32.gmra.mxu1 %vm520_vm1, %v6258_v53  ;;  %v6269_v53 = vld [vmem:[%s8418_s3 + $0x100] sm:$0xff] }
0x1da0   : > { %5868 = vmatprep.mubr.msk.f32.mxu1 %vm520_vm1, %v6259_v34  ;;  %v6270_v34 = vld [vmem:[%s8418_s3 + $0x108] sm:$0xff] }
0x1da3   : > { %5869 = vmatmul.mubr.msk.f32.gmra.mxu1 %vm520_vm1, %v6260_v6  ;;  %v6271_v6 = vld [vmem:[%s8418_s3 + $0x110] sm:$0xff] }
0x1da4   : > { %5905 = vmatprep.mubr.msk.f32.mxu1 %vm520_vm1, %v6261_v9  ;;  %v6272_v9 = vld [vmem:[%s8418_s3 + $0x118] sm:$0xff] }
0x1e4f   : > { %v5855_v30 = vpop.f32.mrf.mxu1 }
0x1e50   : > { %4115 = vrot.lane.b32.xlu1 %v5855_v30, %s8534_s30  ;;  %v6273_v30 = vld [vmem:[%s8418_s3 + $0x180] sm:$0xff] }
0x1e51   : > { %v4054_v24 = vpop.f32.mrf.mxu1 }
0x1e53   : > { %v5858_v36 = vpop.f32.mrf.mxu1 }
0x1e54   : > { %4119 = vrot.lane.b32.xlu1 %v5858_v36, %s8534_s30 }
0x1e55   : > { %v4064_v25 = vpop.f32.mrf.mxu1 }
0x1e56   : > { %4117 = vrot.lane.b32.xlu0 %v4064_v25, %s8534_s30 }
0x1e57   : > { %v5861_v29 = vpop.f32.mrf.mxu1 }
0x1e59   : > { %v4074_v54 = vpop.f32.mrf.mxu1 }
0x1e5b   : > { %v5864_v51 = vpop.f32.mrf.mxu1 }
0x1e5d   : > { %v4084_v15 = vpop.f32.mrf.mxu1 }
0x1e5f   : > { %v5867_v49 = vpop.f32.mrf.mxu1 }
0x1e61   : > { %v4094_v17 = vpop.f32.mrf.mxu1 }
0x1e63   : > { %v5870_v5 = vpop.f32.mrf.mxu1 }
0x1e64   : > { %4131 = vrot.lane.b32.xlu1 %v5870_v5, %s8493_s26 }
0x1e65   : > { %v4104_v46 = vpop.f32.mrf.mxu1 }
0x1e66   : > { %4129 = vrot.lane.b32.xlu0 %v4104_v46, %s8493_s26 }
0x1e68   : > { %4113 = vrot.lane.b32.xlu1 %v4054_v24, %s8534_s30 }
0x1e6a   : > { %4127 = vrot.lane.b32.xlu0 %v5867_v49, %s8493_s26 }
0x1e6c   : > { %4125 = vrot.lane.b32.xlu1 %v4094_v17, %s8493_s26 }
0x1ec2   : > { %v4116_v59 = vpop.permute.xlu1 %4115 }
0x1ec3   : > { %v4122_v60 = vsel %vm682_vm2, 0.0, %v4116_v59 }
0x1ec4   : > { %v4138_v63 = vadd.f32 %v5861_v29, %v4122_v60 }
0x1ec6   : > { %v4120_v56 = vpop.permute.xlu1 %4119 }
0x1ec7   : > { %v4124_v42 = vsel %vm682_vm2, 0.0, %v4120_v56 }
0x1ec8   : > { %v4118_v28 = vpop.permute.xlu0 %4117  ;;  %v4140_v19 = vadd.f32 %v5864_v51, %v4124_v42 }
0x1ec9   : > { %v4123_v43 = vsel %vm682_vm2, 0.0, %v4118_v28 }
0x1eca   : > { %v4139_v12 = vadd.f32 %v4123_v43, %v4084_v15 }
0x1ed6   : > { %v4132_v16 = vpop.permute.xlu1 %4131 }
0x1ed7   : > { %v4136_v1 = vsel %vm695_vm3, 0.0, %v4132_v16 }
0x1ed8   : > { %v4144_v26 = vadd.f32 %v4140_v19, %v4136_v1  ;;  %v4130_v47 = vpop.permute.xlu0 %4129 }
0x1ed9   : > { %v4135_v11 = vsel %vm695_vm3, 0.0, %v4130_v47 }
0x1eda   : > { %v4148_v33 = vadd.f32 %v4144_v26, %v6741_v39  ;;  %v4143_v3 = vadd.f32 %v4139_v12, %v4135_v11  ;;  %v4114_v61 = vpop.permute.xlu1 %4113 }
0x1edb   : > { %v4121_v44 = vsel %vm682_vm2, 0.0, %v4114_v61 }
0x1edc   : > { %v4147_v23 = vadd.f32 %v4143_v3, %v6743_v41  ;;  %5871 = vmatprep.subr.mxu0 %v4148_v33  ;;  %v4128_v62 = vpop.permute.xlu0 %4127  ;;  %v4137_v2 = vadd.f32 %v4121_v44, %v4074_v54  ;;  %v6262_v41 = vld [vmem:[%s8418_s3 + $0xc8] sm:$0xff] }
0x1edd   : > { %v4134_v50 = vsel %vm695_vm3, 0.0, %v4128_v62  ;;  %5872 = vmatpush3.msra.mxu0 %v4148_v33 }
0x1ede   : > { %v4142_v31 = vadd.f32 %v4138_v63, %v4134_v50  ;;  %v4126_v4 = vpop.permute.xlu1 %4125  ;;  %5873 = vmatprep.subr.mxu0 %v4147_v23 }
0x1edf   : > { %v4133_v39 = vsel %vm695_vm3, 0.0, %v4126_v4  ;;  %5874 = vmatpush3.msra.mxu0 %v4147_v23 }
0x1ee0   : > { %v4146_v32 = vadd.f32 %v4142_v31, %v6739_v37  ;;  %v4141_v20 = vadd.f32 %v4137_v2, %v4133_v39  ;;  %v6264_v37 = vld [vmem:[%s8418_s3 + $0xd8] sm:$0xff] }
0x1ee2   : > { %v4145_v10 = vadd.f32 %v4141_v20, %v6764_v8  ;;  %5875 = vmatprep.subr.mxu0 %v4146_v32  ;;  %v6265_v8 = vld [vmem:[%s8418_s3 + $0xe0] sm:$0xff] }
0x1ee3   : > { %5876 = vmatpush3.msra.mxu0 %v4146_v32 }
0x1ee4   : > { %5877 = vmatprep.subr.mxu0 %v4145_v10 }
0x1ee5   : > { %5878 = vmatpush3.msra.mxu0 %v4145_v10 }
0x1ee6   : > { %5880 = vmatmul.mubr.msk.f32.vlgmr.msra.gmra.mxu0 %vm520_vm1, %v6262_v41  ;;  %v6275_v41 = vld [vmem:[%s8418_s3 + $0x130] sm:$0xff] }
0x1ee7   : > { %5882 = vmatprep.mubr.msk.f32.mxu0 %vm520_vm1, %v6263_v35  ;;  %v6278_v35 = vld [vmem:[%s8418_s3 + $0x148] sm:$0xff] }
0x1eea   : > { %5883 = vmatmul.mubr.msk.f32.gmra.mxu0 %vm520_vm1, %v6264_v37  ;;  %v6279_v37 = vld [vmem:[%s8418_s3 + $0x150] sm:$0xff] }
0x1eeb   : > { %5885 = vmatprep.mubr.msk.f32.mxu0 %vm520_vm1, %v6265_v8  ;;  %v6280_v8 = vld [vmem:[%s8418_s3 + $0x158] sm:$0xff] }
0x1eee   : > { %5886 = vmatmul.mubr.msk.f32.gmra.mxu0 %vm520_vm1, %v6266_v14  ;;  %v6281_v14 = vld [vmem:[%s8418_s3 + $0x160] sm:$0xff] }
0x1eef   : > { %5888 = vmatprep.mubr.msk.f32.mxu0 %vm520_vm1, %v6267_v38  ;;  %v6282_v38 = vld [vmem:[%s8418_s3 + $0x168] sm:$0xff] }
0x1ef2   : > { %5889 = vmatmul.mubr.msk.f32.gmra.mxu0 %vm520_vm1, %v6268_v40  ;;  %v6283_v40 = vld [vmem:[%s8418_s3 + $0x170] sm:$0xff] }
0x1ef3   : > { %5891 = vmatprep.mubr.msk.f32.mxu0 %vm520_vm1, %v6269_v53  ;;  %v6284_v53 = vld [vmem:[%s8418_s3 + $0x178] sm:$0xff] }
0x1ef6   : > { %5892 = vmatmul.mubr.msk.f32.gmra.mxu0 %vm520_vm1, %v6270_v34 }
0x1ef7   : > { %5894 = vmatprep.mubr.msk.f32.mxu0 %vm520_vm1, %v6271_v6 }
0x1efa   : > { %5895 = vmatmul.mubr.msk.f32.gmra.mxu0 %vm520_vm1, %v6272_v9 }
0x1efb   : > { %5931 = vmatprep.mubr.msk.f32.mxu0 %vm520_vm1, %v6273_v30 }
0x1fa6   : > { %v5881_v24 = vpop.f32.mrf.mxu0 }
0x1fa7   : > { %4276 = vrot.lane.b32.xlu1 %v5881_v24, %s8507_s27 }
0x1fa8   : > { %v4215_v36 = vpop.f32.mrf.mxu0 }
0x1faa   : > { %v5884_v25 = vpop.f32.mrf.mxu0 }
0x1fab   : > { %4280 = vrot.lane.b32.xlu0 %v5884_v25, %s8507_s27 }
0x1fac   : > { %v4225_v29 = vpop.f32.mrf.mxu0 }
0x1fad   : > { %4278 = vrot.lane.b32.xlu1 %v4225_v29, %s8507_s27 }
0x1fae   : > { %v5887_v54 = vpop.f32.mrf.mxu0 }
0x1fb0   : > { %v4235_v51 = vpop.f32.mrf.mxu0 }
0x1fb1   : > { %4274 = vrot.lane.b32.xlu1 %v4215_v36, %s8507_s27  ;;  %s5091_s27 = sshll.u32 %s6483_s11, 5  ;;  %s365_s11 = sand.u32 1, %s6348_s14  }
0x1fb2   : > { %v5890_v15 = vpop.f32.mrf.mxu0  ;;  %s8375_s17 = scalar_lea.sflag [#allocation3], %s365_s11 }
0x1fb4   : > { %v4245_v49 = vpop.f32.mrf.mxu0 }
0x1fb6   : > { %v5893_v17 = vpop.f32.mrf.mxu0 }
0x1fb8   : > { %v4255_v5 = vpop.f32.mrf.mxu0 }
0x1fb9   : > { %4286 = vrot.lane.b32.xlu1 %v4255_v5, %s8508_s28 }
0x1fba   : > { %v5896_v46 = vpop.f32.mrf.mxu0 }
0x1fbb   : > { %4292 = vrot.lane.b32.xlu0 %v5896_v46, %s8508_s28 }
0x1fbc   : > { %v4265_v59 = vpop.f32.mrf.mxu0 }
0x1fbf   : > { %4290 = vrot.lane.b32.xlu0 %v4265_v59, %s8508_s28 }
0x1fc3   : > { %4288 = vrot.lane.b32.xlu0 %v5893_v17, %s8508_s28 }
0x2019   : > { %v4277_v56 = vpop.permute.xlu1 %4276 }
0x201a   : > { %v4283_v61 = vsel %vm1268_vm12, 0.0, %v4277_v56 }
0x201b   : > { %v4299_v50 = vadd.f32 %v5887_v54, %v4283_v61 }
0x201d   : > { %v4281_v28 = vpop.permute.xlu0 %4280 }
0x201e   : > { %v4285_v43 = vsel %vm1268_vm12, 0.0, %v4281_v28 }
0x201f   : > { %v4279_v42 = vpop.permute.xlu1 %4278  ;;  %v4301_v19 = vadd.f32 %v5890_v15, %v4285_v43 }
0x2020   : > { %v4284_v12 = vsel %vm1268_vm12, 0.0, %v4279_v42 }
0x2021   : > { %v4300_v60 = vadd.f32 %v4284_v12, %v4245_v49 }
0x2023   : > { %v4275_v16 = vpop.permute.xlu1 %4274 }
0x2024   : > { %v4282_v44 = vsel %vm1268_vm12, 0.0, %v4275_v16 }
0x2025   : > { %v4298_v2 = vadd.f32 %v4282_v44, %v4235_v51 }
0x202b   : > { %v4287_v11 = vpop.permute.xlu1 %4286 }
0x202c   : > { %v4294_v62 = vsel %vm1281_vm13, 0.0, %v4287_v11 }
0x202d   : > { %v4293_v1 = vpop.permute.xlu0 %4292  ;;  %v4302_v39 = vadd.f32 %v4298_v2, %v4294_v62 }
0x202e   : > { %v4297_v26 = vsel %vm1281_vm13, 0.0, %v4293_v1 }
0x202f   : > { %v4305_v47 = vadd.f32 %v4301_v19, %v4297_v26  ;;  %v4306_v10 = vadd.f32 %v4302_v39, %v6862_v22  ;;  %v6277_v22 = vld [vmem:[%s8418_s3 + $0x140] sm:$0xff]  ;;  %v6289_v39 = vld [vmem:[%s8418_s3 + $0x1a8] sm:$0xff] }
0x2031   : > { %v4309_v33 = vadd.f32 %v4305_v47, %v6837_v52  ;;  %v4291_v3 = vpop.permute.xlu0 %4290 }
0x2032   : > { %v4296_v63 = vsel %vm1281_vm13, 0.0, %v4291_v3 }
0x2033   : > { %v4304_v23 = vadd.f32 %v4300_v60, %v4296_v63  ;;  %5897 = vmatprep.subr.mxu1 %v4309_v33 }
0x2034   : > { %5898 = vmatpush3.msra.mxu1 %v4309_v33 }
0x2035   : > { %v4308_v52 = vadd.f32 %v4304_v23, %v6835_v48  ;;  %v4289_v31 = vpop.permute.xlu0 %4288  ;;  %v6274_v48 = vld [vmem:[%s8418_s3 + $0x128] sm:$0xff] }
0x2036   : > { %v4295_v4 = vsel %vm1281_vm13, 0.0, %v4289_v31 }
0x2037   : > { %v4303_v32 = vadd.f32 %v4299_v50, %v4295_v4  ;;  %5899 = vmatprep.subr.mxu1 %v4308_v52  ;;  %v6286_v4 = vld [vmem:[%s8418_s3 + $0x190] sm:$0xff] }
0x2038   : > { %5900 = vmatpush3.msra.mxu1 %v4308_v52 }
0x2039   : > { %v4307_v20 = vadd.f32 %v4303_v32, %v6839_v55  ;;  %v6276_v55 = vld [vmem:[%s8418_s3 + $0x138] sm:$0xff]  ;;  %v6290_v32 = vld [vmem:[%s8418_s3 + $0x1b0] sm:$0xff] }
0x203b   : > { %5901 = vmatprep.subr.mxu1 %v4307_v20 }
0x203c   : > { %5902 = vmatpush3.msra.mxu1 %v4307_v20  ;;  %v6291_v20 = vld [vmem:[%s8418_s3 + $0x1b8] sm:$0xff] }
0x203d   : > { %5903 = vmatprep.subr.mxu1 %v4306_v10 }
0x203e   : > { %5904 = vmatpush3.msra.mxu1 %v4306_v10  ;;  %v6292_v10 = vld [vmem:[%s8418_s3 + $0x1c0] sm:$0xff] }
0x203f   : > { %5906 = vmatmul.mubr.msk.f32.vlgmr.msra.gmra.mxu1 %vm520_vm1, %v6274_v48  ;;  %v6293_v48 = vld [vmem:[%s8418_s3 + $0x1c8] sm:$0xff] }
0x2040   : > { %5908 = vmatprep.mubr.msk.f32.mxu1 %vm520_vm1, %v6275_v41  ;;  %v6294_v41 = vld [vmem:[%s8418_s3 + $0x1d0] sm:$0xff] }
0x2043   : > { %5909 = vmatmul.mubr.msk.f32.gmra.mxu1 %vm520_vm1, %v6276_v55  ;;  %v6295_v55 = vld [vmem:[%s8418_s3 + $0x1d8] sm:$0xff] }
0x2044   : > { %5911 = vmatprep.mubr.msk.f32.mxu1 %vm520_vm1, %v6277_v22 }
0x2047   : > { %5912 = vmatmul.mubr.msk.f32.gmra.mxu1 %vm520_vm1, %v6278_v35 }
0x2048   : > { %5914 = vmatprep.mubr.msk.f32.mxu1 %vm520_vm1, %v6279_v37 }
0x204b   : > { %5915 = vmatmul.mubr.msk.f32.gmra.mxu1 %vm520_vm1, %v6280_v8 }
0x204c   : > { %5917 = vmatprep.mubr.msk.f32.mxu1 %vm520_vm1, %v6281_v14 }
0x204f   : > { %5918 = vmatmul.mubr.msk.f32.gmra.mxu1 %vm520_vm1, %v6282_v38 }
0x2050   : > { %5920 = vmatprep.mubr.msk.f32.mxu1 %vm520_vm1, %v6283_v40 }
0x2053   : > { %5921 = vmatmul.mubr.msk.f32.gmra.mxu1 %vm520_vm1, %v6284_v53 }
0x20ff   : > { %v5907_v34 = vpop.f32.mrf.mxu1 }
0x2100   : > { %4437 = vrot.lane.b32.xlu1 %v5907_v34, %s8521_s29 }
0x2101   : > { %v4376_v6 = vpop.f32.mrf.mxu1 }
0x2103   : > { %v5910_v9 = vpop.f32.mrf.mxu1 }
0x2104   : > { %4441 = vrot.lane.b32.xlu0 %v5910_v9, %s8521_s29 }
0x2105   : > { %v4386_v30 = vpop.f32.mrf.mxu1 }
0x2106   : > { %4439 = vrot.lane.b32.xlu1 %v4386_v30, %s8521_s29 }
0x2107   : > { %v5913_v24 = vpop.f32.mrf.mxu1 }
0x2109   : > { %v4396_v36 = vpop.f32.mrf.mxu1 }
0x210a   : > { %4435 = vrot.lane.b32.xlu1 %v4376_v6, %s8521_s29  ;;  %s377_s29 = scalar_lea.vmem %s8424_s9, %s5091_s27  ;;  %s6302_s27 = scalar_lea.vmem %s6301_s21, 1024 }
0x210b   : > { %v5916_v25 = vpop.f32.mrf.mxu1 }
0x210d   : > { %v4406_v29 = vpop.f32.mrf.mxu1 }
0x210f   : > { %v5919_v54 = vpop.f32.mrf.mxu1 }
0x2111   : > { %v4416_v51 = vpop.f32.mrf.mxu1 }
0x2112   : > { %4447 = vrot.lane.b32.xlu1 %v4416_v51, %s8560_s20 }
0x2113   : > { %v5922_v15 = vpop.f32.mrf.mxu1 }
0x2114   : > { %4453 = vrot.lane.b32.xlu0 %v5922_v15, %s8560_s20  ;;  %v4633_v15 = vld [vmem:[%s377_s29 + $0x8] sm:$0xff] }
0x2115   : > { %v4426_v49 = vpop.f32.mrf.mxu1 }
0x2118   : > { %4451 = vrot.lane.b32.xlu0 %v4426_v49, %s8560_s20 }
0x211c   : > { %4449 = vrot.lane.b32.xlu0 %v5919_v54, %s8560_s20 }
0x2172   : > { %v4438_v17 = vpop.permute.xlu1 %4437 }
0x2173   : > { %v4444_v60 = vsel %vm1505_vm14, 0.0, %v4438_v17 }
0x2174   : > { %v4460_v44 = vadd.f32 %v5913_v24, %v4444_v60 }
0x2176   : > { %v4442_v5 = vpop.permute.xlu0 %4441 }
0x2177   : > { %v4446_v59 = vsel %vm1505_vm14, 0.0, %v4442_v5  ;;  %v4632_v5 = vld [vmem:[%s377_s29] sm:$0xff] }
0x2178   : > { %v4440_v46 = vpop.permute.xlu1 %4439  ;;  %v4462_v56 = vadd.f32 %v5916_v25, %v4446_v59 }
0x2179   : > { %v4445_v43 = vsel %vm1505_vm14, 0.0, %v4440_v46 }
0x217a   : > { %v4461_v1 = vadd.f32 %v4445_v43, %v4406_v29 }
0x217c   : > { %v4436_v28 = vpop.permute.xlu1 %4435 }
0x217d   : > { %v4443_v11 = vsel %vm1505_vm14, 0.0, %v4436_v28  ;;  %v4637_v28 = vadd.f32 1.0, %v4633_v15 }
0x217e   : > { %v4459_v63 = vadd.f32 %v4443_v11, %v4396_v36 }
0x2184   : > { %v4448_v12 = vpop.permute.xlu1 %4447 }
0x2185   : > { %v4455_v61 = vsel %vm1518_vm15, 0.0, %v4448_v12 }
0x2186   : > { %v4454_v42 = vpop.permute.xlu0 %4453  ;;  %v4463_v50 = vadd.f32 %v4459_v63, %v4455_v61 }
0x2187   : > { %v4458_v19 = vsel %vm1518_vm15, 0.0, %v4454_v42 }
0x2188   : > { %v4466_v16 = vadd.f32 %v4462_v56, %v4458_v19  ;;  %v4467_v31 = vadd.f32 %v4463_v50, %v6962_v45  ;;  %v6288_v45 = vld [vmem:[%s8418_s3 + $0x1a0] sm:$0xff]  ;;  %v4636_v19 = vadd.f32 1.0, %v4632_v5 }
0x218a   : > { %v4470_v26 = vadd.f32 %v4466_v16, %v6937_v0  ;;  %v4452_v47 = vpop.permute.xlu0 %4451 }
0x218b   : > { %v4457_v33 = vsel %vm1518_vm15, 0.0, %v4452_v47 }
0x218c   : > { %v4465_v3 = vadd.f32 %v4461_v1, %v4457_v33  ;;  %5923 = vmatprep.subr.mxu0 %v4470_v26  ;;  %v4635_v1 = vld [vmem:[%s377_s29 + $0x18] sm:$0xff] }
0x218d   : > { %5924 = vmatpush3.msra.mxu0 %v4470_v26 }
0x218e   : > { %v4469_v0 = vadd.f32 %v4465_v3, %v6935_v58  ;;  %v4450_v23 = vpop.permute.xlu0 %4449  ;;  %v6285_v58 = vld [vmem:[%s8418_s3 + $0x188] sm:$0xff] }
0x218f   : > { %v4456_v62 = vsel %vm1518_vm15, 0.0, %v4450_v23 }
0x2190   : > { %v4464_v2 = vadd.f32 %v4460_v44, %v4456_v62  ;;  %5925 = vmatprep.subr.mxu0 %v4469_v0  ;;  %v4639_v44 = vadd.f32 1.0, %v4635_v1 }
0x2191   : > { %5926 = vmatpush3.msra.mxu0 %v4469_v0  ;;  %v4634_v0 = vld [vmem:[%s377_s29 + $0x10] sm:$0xff] }
0x2192   : > { %v4468_v52 = vadd.f32 %v4464_v2, %v6939_v7  ;;  %v6287_v7 = vld [vmem:[%s8418_s3 + $0x198] sm:$0xff] }
0x2194   : > { %5927 = vmatprep.subr.mxu0 %v4468_v52 }
0x2195   : > { %5928 = vmatpush3.msra.mxu0 %v4468_v52 }
0x2196   : > { %5929 = vmatprep.subr.mxu0 %v4467_v31 }
0x2197   : > { %5930 = vmatpush3.msra.mxu0 %v4467_v31  ;;  %v4638_v31 = vadd.f32 1.0, %v4634_v0 }
0x2198   : > { %5932 = vmatmul.mubr.msk.f32.vlgmr.msra.gmra.mxu0 %vm520_vm1, %v6285_v58 }
0x2199   : > { %5934 = vmatprep.mubr.msk.f32.mxu0 %vm520_vm1, %v6286_v4 }
0x219c   : > { %5935 = vmatmul.mubr.msk.f32.gmra.mxu0 %vm520_vm1, %v6287_v7 }
0x219d   : > { %5937 = vmatprep.mubr.msk.f32.mxu0 %vm520_vm1, %v6288_v45 }
0x21a0   : > { %5938 = vmatmul.mubr.msk.f32.gmra.mxu0 %vm520_vm1, %v6289_v39 }
0x21a1   : > { %5940 = vmatprep.mubr.msk.f32.mxu0 %vm520_vm1, %v6290_v32 }
0x21a4   : > { %5941 = vmatmul.mubr.msk.f32.gmra.mxu0 %vm520_vm1, %v6291_v20 }
0x21a5   : > { %5943 = vmatprep.mubr.msk.f32.mxu0 %vm520_vm1, %v6292_v10 }
0x21a8   : > { %5944 = vmatmul.mubr.msk.f32.gmra.mxu0 %vm520_vm1, %v6293_v48 }
0x21a9   : > { %5946 = vmatprep.mubr.msk.f32.mxu0 %vm520_vm1, %v6294_v41 }
0x21ac   : > { %5947 = vmatmul.mubr.msk.f32.gmra.mxu0 %vm520_vm1, %v6295_v55 }
0x2258   : > { %v5933_v22 = vpop.f32.mrf.mxu0 }
0x2259   : > { %4598 = vrot.lane.b32.xlu1 %v5933_v22, %s8534_s30 }
0x225a   : > { %v4537_v35 = vpop.f32.mrf.mxu0 }
0x225b   : > { %4596 = vrot.lane.b32.xlu0 %v4537_v35, %s8534_s30 }
0x225c   : > { %v5936_v37 = vpop.f32.mrf.mxu0 }
0x225d   : > { %4602 = vrot.lane.b32.xlu1 %v5936_v37, %s8534_s30 }
0x225e   : > { %v4547_v8 = vpop.f32.mrf.mxu0 }
0x225f   : > { %4600 = vrot.lane.b32.xlu0 %v4547_v8, %s8534_s30 }
0x2260   : > { %v5939_v14 = vpop.f32.mrf.mxu0 }
0x2262   : > { %v4557_v38 = vpop.f32.mrf.mxu0 }
0x2264   : > { %v5942_v40 = vpop.f32.mrf.mxu0 }
0x2266   : > { %v4567_v53 = vpop.f32.mrf.mxu0 }
0x2268   : > { %v5945_v34 = vpop.f32.mrf.mxu0 }
0x2269   : > { %4610 = vrot.lane.b32.xlu1 %v5945_v34, %s8493_s26  ;;  %v8574_v34 = vld [vmem:[#allocation8_spill] sm:$0xff] }
0x226a   : > { %v4577_v6 = vpop.f32.mrf.mxu0 }
0x226b   : > { %4608 = vrot.lane.b32.xlu0 %v4577_v6, %s8493_s26 }
0x226c   : > { %v5948_v9 = vpop.f32.mrf.mxu0 }
0x226d   : > { %4614 = vrot.lane.b32.xlu1 %v5948_v9, %s8493_s26 }
0x226e   : > { %v4587_v30 = vpop.f32.mrf.mxu0 }
0x226f   : > { %4612 = vrot.lane.b32.xlu0 %v4587_v30, %s8493_s26  ;;  %s4768_s26 = sshll.u32 %s365_s11, 5 }
0x2270   : > { %s367_s20 = scalar_lea.vmem [#allocation2], %s4768_s26 }
0x2271   : > { %s4690_s18 = sshll.u32 %s367_s20, 4  ;;  %s8373_s18 = int_to_ptr.vmem [resolvable:$true] %s4690_s18 }
0x2272   : > { %s6296_s4 = scalar_lea.vmem %s8373_s18, 512  ;;  %p6303_p0 = scmp.lt.s32.totalorder %s8373_s18, %s6301_s21 }
0x2273   : > { %p6297_p11 = scmp.ne.s32.totalorder %s8373_s18, %s6296_s4  ;;  %p6304_p1 = scmp.lt.s32.totalorder %s6302_s27, %s6296_s4 }
0x2275   : > { %p6298_p12 = pnand %p6297_p11, %p6461_p5  ;;  %p6305_p2 = por %p6304_p1, %p6303_p0 }
0x2277   : > { %p6299_p13 = pneg %p6298_p12 }
0x2279   : > { %p6306_p3 = pnand %p6305_p2, %p6299_p13 }
0x22cb   : > { %v4599_v24 = vpop.permute.xlu1 %4598 }
0x22cc   : > { %v4605_v29 = vsel %vm682_vm2, 0.0, %v4599_v24  ;;  %v8575_v24 = vld [vmem:[#allocation5_spill] sm:$0xff] }
0x22cd   : > { %v4597_v36 = vpop.permute.xlu0 %4596  ;;  %v4621_v49 = vadd.f32 %v5939_v14, %v4605_v29  ;;  %v8573_v14 = vld [vmem:[#allocation7_spill] sm:$0xff] }
0x22ce   : > { %v4604_v51 = vsel %vm682_vm2, 0.0, %v4597_v36 }
0x22cf   : > { %v4603_v25 = vpop.permute.xlu1 %4602  ;;  %v4620_v56 = vadd.f32 %v4604_v51, %v4557_v38 }
0x22d0   : > { %v4607_v46 = vsel %vm682_vm2, 0.0, %v4603_v25 }
0x22d1   : > { %v4601_v54 = vpop.permute.xlu0 %4600  ;;  %v4623_v12 = vadd.f32 %v5942_v40, %v4607_v46 }
0x22d2   : > { %v4606_v26 = vsel %vm682_vm2, 0.0, %v4601_v54  ;;  %v8576_v54 = vld [vmem:[#allocation6_spill] sm:$0xff] }
0x22d3   : > { %v4622_v62 = vadd.f32 %v4606_v26, %v4567_v53 }
0x22db   : > { %v4611_v17 = vpop.permute.xlu1 %4610 }
0x22dc   : > { %v4617_v59 = vsel %vm695_vm3, 0.0, %v4611_v17 }
0x22dd   : > { %v4625_v42 = vadd.f32 %v4621_v49, %v4617_v59  ;;  %v4609_v43 = vpop.permute.xlu0 %4608 }
0x22de   : > { %v4616_v16 = vsel %vm695_vm3, 0.0, %v4609_v43 }
0x22df   : > { %v4629_v47 = vadd.f32 %v4625_v42, %v7026_v27  ;;  %v4624_v60 = vadd.f32 %v4620_v56, %v4616_v16  ;;  %v4615_v11 = vpop.permute.xlu1 %4614 }
0x22e0   : > { %v4619_v33 = vsel %vm695_vm3, 0.0, %v4615_v11 }
0x22e1   : > { %v4641_v3 = vmul.f32 %v4637_v28, %v4629_v47  ;;  %v4628_v61 = vadd.f32 %v4624_v60, %v7047_v13  ;;  %v4627_v63 = vadd.f32 %v4623_v12, %v4619_v33  ;;  %v4613_v23 = vpop.permute.xlu0 %4612  ;;  %v4665_v38 = vadd.f32 %v4629_v47, %v8573_v14 }
0x22e2   : > { %v4618_v50 = vsel %vm695_vm3, 0.0, %v4613_v23 }
0x22e3   : > { %v4645_v2 = vsub.f32 0.0, %v4641_v3  ;;  %v4640_v52 = vmul.f32 %v4636_v19, %v4628_v61  ;;  %v4631_v27 = vadd.f32 %v4627_v63, %v7024_v21  ;;  %v4626_v58 = vadd.f32 %v4622_v62, %v4618_v50 }
0x22e4   : > { %v4664_v6 = vadd.f32 %v4628_v61, %v8574_v34 }
0x22e5   : > { %v4650_v4 = vmul.f32 1.442695, %v4645_v2  ;;  %v4644_v7 = vsub.f32 0.0, %v4640_v52  ;;  %v4643_v45 = vmul.f32 %v4639_v44, %v4631_v27  ;;  %v4630_v39 = vadd.f32 %v4626_v58, %v7022_v18 }
0x22e6   : > { %v4667_v36 = vadd.f32 %v4631_v27, %v8575_v24 }
0x22e7   : > { %6159 = vpow2.f32 %v4650_v4  ;;  %v4648_v13 = vmul.f32 1.442695, %v4644_v7  ;;  %v4647_v32 = vsub.f32 0.0, %v4643_v45  ;;  %v4642_v20 = vmul.f32 %v4638_v31, %v4630_v39 }
0x22e8   : > { %v4666_v51 = vadd.f32 %v4630_v39, %v8576_v54 }
0x22e9   : > { %6161 = vpow2.f32 %v4648_v13  ;;  %v4654_v10 = vmul.f32 1.442695, %v4647_v32  ;;  %v4646_v57 = vsub.f32 0.0, %v4642_v20 }
0x22eb   : > { %6163 = vpow2.f32 %v4654_v10  ;;  %v4652_v48 = vmul.f32 1.442695, %v4646_v57 }
0x22ed   : > { %6165 = vpow2.f32 %v4652_v48 }
0x22f4   : > { %v6160_v41 = vpop.eup %6159 }
0x22f5   : > { %v4657_v21 = vadd.f32 1.0, %v6160_v41 }
0x22f6   : > { %v6162_v55 = vpop.eup %6161 }
0x22f7   : > { %6167 = vrcp.f32 %v4657_v21  ;;  %v4656_v22 = vadd.f32 1.0, %v6162_v55 }
0x22f8   : > { %v6164_v35 = vpop.eup %6163 }
0x22f9   : > { %6169 = vrcp.f32 %v4656_v22  ;;  %v4659_v37 = vadd.f32 1.0, %v6164_v35 }
0x22fa   : > { %v6166_v18 = vpop.eup %6165 }
0x22fb   : > { %6171 = vrcp.f32 %v4659_v37  ;;  %v4658_v8 = vadd.f32 1.0, %v6166_v18 }
0x22fd   : > { %6173 = vrcp.f32 %v4658_v8 }
0x2304   : > { %v6168_v40 = vpop.eup %6167 }
0x2305   : > { %v4669_v53 = vmul.f32 %v6168_v40, %v4665_v38 }
0x2306   : > { %v6170_v9 = vpop.eup %6169 }
0x2307   : > { %4673 = vst [vmem:[%s367_s20 + $0x8] sm:$0xff] %v4669_v53  ;;  %v4668_v30 = vmul.f32 %v6170_v9, %v4664_v6 }
0x2308   : > { %v6172_v25 = vpop.eup %6171 }
0x2309   : > { %4672 = vst [vmem:[%s367_s20] sm:$0xff] %v4668_v30  ;;  %v4671_v29 = vmul.f32 %v6172_v25, %v4667_v36 }
0x230a   : > { %v6174_v15 = vpop.eup %6173 }
0x230b   : > { %4675 = vst [vmem:[%s367_s20 + $0x18] sm:$0xff] %v4671_v29  ;;  %v4670_v49 = vmul.f32 %v6174_v15, %v4666_v51 }
0x230d   : > { %4674 = vst [vmem:[%s367_s20 + $0x10] sm:$0xff] %v4670_v49 }
0x230e   : > { %6309 = shalt.err (!%p6306_p3)
}
0x230f   : > { %s6310_s30 = scalar_lea.hbm %s8371_s2, 512  ;;  %s6314_s11 = scalar_lea.hbm %s8425_s10, 1024 }
0x2310   : > { %p6311_p4 = scmp.ne.s32.totalorder %s8371_s2, %s6310_s30  ;;  %p6315_p9 = scmp.lt.s32.totalorder %s8371_s2, %s8425_s10 }
0x2311   : > { %p6316_p10 = scmp.lt.s32.totalorder %s6314_s11, %s6310_s30 }
0x2312   : > { %p6312_p7 = pnand %p6311_p4, %p6461_p5 }
0x2313   : > { %p6317_p11 = por %p6316_p10, %p6315_p9 }
0x2314   : > { %p6313_p8 = pneg %p6312_p7 }
0x2316   : > { %p6318_p12 = pnand %p6317_p11, %p6313_p8 }
0x2318   : > { %6321 = shalt.err (!%p6318_p12)
}
0x2319   : > { %s6366_s12 = smov 128   ;;  %s6367_s0 = smov 8  }
0x231a   : > { %5949 = dma.vmem_to_hbm [thread:$0]  (%p6461_p5), %s8373_s18, 512, %s8371_s2, %s8375_s17, %s6366_s12, %s6366_s12, %s6367_s0  }
0x231b PF: > { %p5955_p13 = scmp.ge.s32.totalorder %s6356_s16, 2  ;;  %s4705_s1 = sand.u32 1, %s6344_s13  }
0x231c   : > { %s4706_s4 = scalar_lea.sflag [#allocation3], %s4705_s1 }
0x231d   : > { %p5952_p0 = pnand %p5955_p13, %p6465_p6 }
0x231f   : > { %p5953_p1 = pneg %p5952_p0 }
0x2321   : > { %6339 = dma.done.wait (%p5953_p1), %s4706_s4, 512  }
0x2322   : > { %6341 = vsyncadd (%p5953_p1), %s4706_s4, 4294966784  ;;  %p20_p2 = scmp.ge.s32.totalorder %s6448_s19, 4   ;;  %s8577_s13 = smov %s6348_s14 }
0x2323   : > { %s8578_s14 = smov %s6352_s15  ;;  %s8579_s15 = smov %s6459_s22 }
0x2324   : > { %s8580_s16 = smov %s6448_s19  ;;  %22 = sbr.rel (!%p20_p2) target bundleno = 8 (0x8), region = 106 }
0x2329   :  { %4711 = vsyncpa [#allocation3], 1 }
0x232a   :  { %4713 = vsyncpa [#allocation3 + $0x1], 1 }

</bundles_post_ra>
